<compile_context>
chip_gen: v6e
topology: v6e:2x2x1
jax: 0.10.0
libtpu: 0.0.40
codegen_flags: <defaults>
</compile_context>

<pallas_src>
from functools import partial

import jax
import jax.numpy as jnp
from jax.experimental import pallas as pl
from jax.experimental.pallas import tpu as pltpu

NEG_SLOPE = 0.2
IN_EPS = 1e-5
COP = 128            # lane-dense channel padding carried between layers


# -----------------------------------------------------------------------------
# Pallas kernels
# -----------------------------------------------------------------------------
def conv_lrelu_kernel(y_ref, w_ref, b_ref, o_ref, *, offsets):
    """4-tap (2x2/s1 on parity layout) conv + bias + LeakyReLU(0.2).   (conv1)

    y_ref : (1, Ty, K)   bf16  parity-packed, spatially flattened input rows
    w_ref : (4, K, COP)  bf16  per-tap weight matrices
    b_ref : (1, COP)     f32
    o_ref : (1, M, COP)  bf16  M = Ho*(Wo+1) flattened output rows
    """
    m = o_ref.shape[1]
    acc = jnp.dot(y_ref[0, offsets[0]:offsets[0] + m, :], w_ref[0],
                  preferred_element_type=jnp.float32)
    for t in range(1, 4):
        off = offsets[t]
        acc = acc + jnp.dot(y_ref[0, off:off + m, :], w_ref[t],
                            preferred_element_type=jnp.float32)
    z = acc + b_ref[...]
    o_ref[0] = jnp.maximum(z, NEG_SLOPE * z).astype(o_ref.dtype)


def conv_in_lrelu_kernel(y_ref, w_ref, b_ref, mask_ref, o_ref, *,
                         offsets, inv_n):
    """4-tap conv + bias + InstanceNorm (per sample/channel) + LeakyReLU(0.2).
                                                                (conv2 / conv3)
    mask_ref : (1, M, 1) f32 -- 1.0 on valid rows (wo < Wo), 0.0 on junk rows.
    """
    m = o_ref.shape[1]
    acc = jnp.dot(y_ref[0, offsets[0]:offsets[0] + m, :], w_ref[0],
                  preferred_element_type=jnp.float32)
    for t in range(1, 4):
        off = offsets[t]
        acc = acc + jnp.dot(y_ref[0, off:off + m, :], w_ref[t],
                            preferred_element_type=jnp.float32)
    z = acc + b_ref[...]                                   # (M, COP) f32
    mask = mask_ref[0]                                     # (M, 1)   f32
    mean = jnp.sum(z * mask, axis=0, keepdims=True) * inv_n
    centered = z - mean                                    # junk rows are masked
    var = jnp.sum(centered * centered * mask, axis=0, keepdims=True) * inv_n
    zn = centered * jax.lax.rsqrt(var + IN_EPS)
    o_ref[0] = jnp.maximum(zn, NEG_SLOPE * zn).astype(o_ref.dtype)


def conv4_pool_kernel(a_ref, mask_ref, w_ref, b_ref, o_ref, *, offsets, inv_p):
    """Conv2d(128,1,3,1) + AdaptiveAvgPool2d(1), pool folded before the dot.

    avgpool(conv(a)) = b + (1/P) * sum_t w_t . (masked sum of the t-shifted
    rows of the flattened conv3 activation).

    a_ref : (1, M3, COP) bf16 ; mask_ref (1, L, 1) f32 ; w_ref (9, 1, COP) f32
    b_ref : (1, 1, 1) f32     ; o_ref (1, 1, 1) f32
    """
    wlen = mask_ref.shape[1]
    mask = mask_ref[0]                                     # (L, 1)
    acc = jnp.zeros((1, a_ref.shape[2]), jnp.float32)
    for t in range(9):
        off = offsets[t]
        win = a_ref[0, off:off + wlen, :].astype(jnp.float32)   # (L, COP)
        acc = acc + jnp.sum(win * mask, axis=0, keepdims=True) * w_ref[t]
    o_ref[0] = jnp.sum(acc, axis=1, keepdims=True) * inv_p + b_ref[0]


# -----------------------------------------------------------------------------
# Wrapper-side layout helpers (pure reshape/transpose/pad, no data blowup)
# -----------------------------------------------------------------------------
def _space_to_depth_rows(x_nhwc, ho, wo):
    """Parity-pack a stride-2 conv input and flatten spatially.

    (N, Hin, Win, C) -> (N, (ho+1)*(wo+1)+1, 4*C) bf16, where row
    h'*(wo+1)+w' holds the four input pixels (2h'+pi, 2w'+pj) concatenated
    over (pi, pj, c).  One zero row is appended so every shifted window of
    length ho*(wo+1) stays in bounds.
    """
    n, _, _, c = x_nhwc.shape
    y = x_nhwc[:, :2 * (ho + 1), :2 * (wo + 1), :]
    y = y.reshape(n, ho + 1, 2, wo + 1, 2, c)
    y = jnp.transpose(y, (0, 1, 3, 2, 4, 5))
    y = y.reshape(n, (ho + 1) * (wo + 1), 4 * c)
    y = jnp.pad(y, ((0, 0), (0, 1), (0, 0)))
    return y.astype(jnp.bfloat16)


def _prep_conv_weights(w_oihw, bias, cin_pad):
    """(Co,Ci,4,4) -> per-tap (4, 4*cin_pad, COP) bf16 matrices + (1,COP) bias.

    Tap t = 2a+b of the equivalent 2x2/s1 conv; K rows ordered (pi, pj, c) to
    match the parity-packed activation, zero rows for padded input channels.
    """
    co, ci, _, _ = w_oihw.shape
    w = w_oihw.reshape(co, ci, 2, 2, 2, 2)                # (co, ci, a, pi, b, pj)
    w = jnp.transpose(w, (2, 4, 3, 5, 1, 0))              # (a, b, pi, pj, ci, co)
    w = jnp.pad(w, ((0, 0),) * 4 + ((0, cin_pad - ci), (0, COP - co)))
    w = w.reshape(4, 4 * cin_pad, COP).astype(jnp.bfloat16)
    b = jnp.pad(bias.reshape(1, co), ((0, 0), (0, COP - co))).astype(jnp.float32)
    return w, b


def _unflatten(a_flat, ho, wo):
    """(N, ho*(wo+1), C) flattened activation -> (N, ho, wo, C) NHWC."""
    n, _, c = a_flat.shape
    return a_flat.reshape(n, ho, wo + 1, c)[:, :, :wo, :]


# -----------------------------------------------------------------------------
# Layer wrappers
# -----------------------------------------------------------------------------
def conv4x4s2_block(x_nhwc, w_oihw, bias, *, instance_norm):
    """Conv2d(k=4, s=2) [+ InstanceNorm2d] + LeakyReLU(0.2) as one Pallas call.

    Returns the flattened (N, Ho*(Wo+1), COP) bf16 activation plus (Ho, Wo).
    """
    n, hin, win, cin = x_nhwc.shape
    ho = (hin - 4) // 2 + 1
    wo = (win - 4) // 2 + 1
    m = ho * (wo + 1)
    k = 4 * cin
    offsets = (0, 1, wo + 1, wo + 2)        # tap (a, b) -> a*(wo+1) + b

    y = _space_to_depth_rows(x_nhwc, ho, wo)               # (n, Ty, k) bf16
    ty = y.shape[1]
    w_taps, b = _prep_conv_weights(w_oihw, bias, cin)

    cost = pl.CostEstimate(
        flops=2 * n * 4 * m * k * COP, transcendentals=0,
        bytes_accessed=n * ty * k * 2 + 4 * k * COP * 2 + n * m * COP * 2)

    in_specs = [
        pl.BlockSpec((1, ty, k), lambda i: (i, 0, 0)),
        pl.BlockSpec((4, k, COP), lambda i: (0, 0, 0)),
        pl.BlockSpec((1, COP), lambda i: (0, 0)),
    ]
    args = [y, w_taps, b]
    if instance_norm:
        mask = (jnp.arange(m) % (wo + 1) < wo).astype(jnp.float32)
        args.append(mask.reshape(1, m, 1))
        in_specs.append(pl.BlockSpec((1, m, 1), lambda i: (0, 0, 0)))
        kernel = partial(conv_in_lrelu_kernel, offsets=offsets,
                         inv_n=1.0 / (ho * wo))
    else:
        kernel = partial(conv_lrelu_kernel, offsets=offsets)

    out = pl.pallas_call(
        kernel,
        out_shape=jax.ShapeDtypeStruct((n, m, COP), jnp.bfloat16),
        grid=(n,),
        in_specs=in_specs,
        out_specs=pl.BlockSpec((1, m, COP), lambda i: (i, 0, 0)),
        compiler_params=pltpu.CompilerParams(
            dimension_semantics=("parallel",)),
        cost_estimate=cost,
    )(*args)
    return out, ho, wo


def conv4_and_pool(a3_flat, ho3, wo3, w_oihw, bias):
    """Conv2d(128,1,3,1) + AdaptiveAvgPool2d(1) on the flattened conv3 act."""
    n, m3, cop = a3_flat.shape
    ci = w_oihw.shape[1]
    ho4, wo4 = ho3 - 2, wo3 - 2
    wlen = (ho4 - 1) * (wo3 + 1) + wo4       # shifted-window length (rows)
    offsets = tuple(i * (wo3 + 1) + j for i in range(3) for j in range(3))

    r = jnp.arange(wlen)
    mask = ((r % (wo3 + 1) < wo4) & (r // (wo3 + 1) < ho4)).astype(jnp.float32)
    mask = mask.reshape(1, wlen, 1)
    w_taps = jnp.transpose(w_oihw[0], (1, 2, 0))           # (3, 3, ci)
    w_taps = jnp.pad(w_taps, ((0, 0), (0, 0), (0, cop - ci)))
    w_taps = w_taps.reshape(9, 1, cop).astype(jnp.float32)
    b = bias.reshape(1, 1, 1).astype(jnp.float32)

    out = pl.pallas_call(
        partial(conv4_pool_kernel, offsets=offsets, inv_p=1.0 / (ho4 * wo4)),
        out_shape=jax.ShapeDtypeStruct((n, 1, 1), jnp.float32),
        grid=(n,),
        in_specs=[
            pl.BlockSpec((1, m3, cop), lambda i: (i, 0, 0)),
            pl.BlockSpec((1, wlen, 1), lambda i: (0, 0, 0)),
            pl.BlockSpec((9, 1, cop), lambda i: (0, 0, 0)),
            pl.BlockSpec((1, 1, 1), lambda i: (0, 0, 0)),
        ],
        out_specs=pl.BlockSpec((1, 1, 1), lambda i: (i, 0, 0)),
        compiler_params=pltpu.CompilerParams(
            dimension_semantics=("parallel",)),
    )(a3_flat, mask, w_taps, b)
    return out.reshape(n, 1)


# -----------------------------------------------------------------------------
# Parameter init (deterministic, synthetic — shapes match the PyTorch module)
# -----------------------------------------------------------------------------
def init_params(key):
    shapes = {
        "conv1": (32, 3, 4, 4),
        "conv2": (64, 32, 4, 4),
        "conv3": (128, 64, 4, 4),
        "conv4": (1, 128, 3, 3),
    }
    params = {}
    for name, shp in shapes.items():
        key, kw_, kb_ = jax.random.split(key, 3)
        fan_in = shp[1] * shp[2] * shp[3]
        bound = 1.0 / jnp.sqrt(fan_in)
        params[name + "_w"] = jax.random.uniform(
            kw_, shp, jnp.float32, -bound, bound)
        params[name + "_b"] = jax.random.uniform(
            kb_, (shp[0],), jnp.float32, -bound, bound)
    return params


# -----------------------------------------------------------------------------
# Forward pass (matches ColorMapDiscriminator.forward)
# -----------------------------------------------------------------------------
def colormap_discriminator_forward(x_nchw, params):
    # NCHW -> NHWC
    x = jnp.transpose(x_nchw, (0, 2, 3, 1)).astype(jnp.float32)

    # conv1: Conv2d(3,32,4,2) + LeakyReLU(0.2)
    a1, ho1, wo1 = conv4x4s2_block(x, params["conv1_w"], params["conv1_b"],
                                   instance_norm=False)

    # conv2: Conv2d(32,64,4,2) + InstanceNorm2d + LeakyReLU(0.2)
    a2, ho2, wo2 = conv4x4s2_block(_unflatten(a1, ho1, wo1),
                                   params["conv2_w"], params["conv2_b"],
                                   instance_norm=True)

    # conv3: Conv2d(64,128,4,2) + InstanceNorm2d + LeakyReLU(0.2)
    # (InstanceNorm2d(64) with affine=False ignores num_features.)
    a3, ho3, wo3 = conv4x4s2_block(_unflatten(a2, ho2, wo2),
                                   params["conv3_w"], params["conv3_b"],
                                   instance_norm=True)

    # conv4: Conv2d(128,1,3,1) + AdaptiveAvgPool2d(1), then view(-1, 1)
    return conv4_and_pool(a3, ho3, wo3, params["conv4_w"], params["conv4_b"])


if __name__ == "__main__":
    key = jax.random.PRNGKey(0)
    k_params, k_x = jax.random.split(key)
    params = init_params(k_params)

    # Smallest spatial size that survives three k=4,s=2 convs and one k=3,s=1:
    # 38 -> 18 -> 8 -> 3 -> 1
    x = jax.random.normal(k_x, (2, 3, 38, 38), jnp.float32)

    fwd = jax.jit(colormap_discriminator_forward)
    out = jax.block_until_ready(fwd(x, params))
    assert out.shape == (2, 1), out.shape
    assert bool(jnp.all(jnp.isfinite(out)))
    print("KERNEL_OK")
</pallas_src>

<mosaic_0001>
module attributes {stable_mosaic.version = 11 : i64} {
  func.func @conv_lrelu_kernel(%arg0: i32, %arg1: memref<1x362x12xbf16, #tpu.memory_space<vmem>>, %arg2: memref<4x12x128xbf16, #tpu.memory_space<vmem>>, %arg3: memref<1x128xf32, #tpu.memory_space<vmem>>, %arg4: memref<1x342x128xbf16, #tpu.memory_space<vmem>>) attributes {dimension_semantics = [#tpu.dimension_semantics<parallel>], iteration_bounds = array<i64: 2>, scalar_prefetch = 0 : i64, scratch_operands = 0 : i64, tpu.core_type = #tpu.core_type<tc>, window_params = [{transform_indices = @transform_0, window_bounds = array<i64: 1, 362, 12>}, {pipeline_mode = #tpu.pipeline_mode<synchronous>, transform_indices = @transform_1, window_bounds = array<i64: 4, 12, 128>}, {pipeline_mode = #tpu.pipeline_mode<synchronous>, transform_indices = @transform_2, window_bounds = array<i64: 1, 128>}, {transform_indices = @transform_3, window_bounds = array<i64: 1, 342, 128>}]} {
    %c0 = arith.constant 0 : index
    %c0_0 = arith.constant 0 : index
    %c0_1 = arith.constant 0 : index
    %0 = vector.load %arg1[%c0, %c0_0, %c0_1] : memref<1x362x12xbf16, #tpu.memory_space<vmem>>, vector<1x342x12xbf16>
    %1 = vector.shape_cast %0 : vector<1x342x12xbf16> to vector<342x12xbf16>
    %c0_2 = arith.constant 0 : index
    %c0_3 = arith.constant 0 : index
    %c0_4 = arith.constant 0 : index
    %2 = vector.load %arg2[%c0_2, %c0_3, %c0_4] : memref<4x12x128xbf16, #tpu.memory_space<vmem>>, vector<1x12x128xbf16>
    %3 = vector.shape_cast %2 : vector<1x12x128xbf16> to vector<12x128xbf16>
    %cst = arith.constant dense<0.000000e+00> : vector<342x128xf32>
    %4 = tpu.matmul %1, %3, %cst {dimension_numbers = #tpu.dot_dimension_numbers<[1], [0], [0], [1], [0, 0, 1, 1], [], []>} : vector<342x12xbf16>, vector<12x128xbf16>, vector<342x128xf32> -> vector<342x128xf32>
    %c0_5 = arith.constant 0 : index
    %c1 = arith.constant 1 : index
    %c0_6 = arith.constant 0 : index
    %5 = vector.load %arg1[%c0_5, %c1, %c0_6] : memref<1x362x12xbf16, #tpu.memory_space<vmem>>, vector<1x342x12xbf16>
    %6 = vector.shape_cast %5 : vector<1x342x12xbf16> to vector<342x12xbf16>
    %c1_7 = arith.constant 1 : index
    %c0_8 = arith.constant 0 : index
    %c0_9 = arith.constant 0 : index
    %7 = vector.load %arg2[%c1_7, %c0_8, %c0_9] : memref<4x12x128xbf16, #tpu.memory_space<vmem>>, vector<1x12x128xbf16>
    %8 = vector.shape_cast %7 : vector<1x12x128xbf16> to vector<12x128xbf16>
    %cst_10 = arith.constant dense<0.000000e+00> : vector<342x128xf32>
    %9 = tpu.matmul %6, %8, %cst_10 {dimension_numbers = #tpu.dot_dimension_numbers<[1], [0], [0], [1], [0, 0, 1, 1], [], []>} : vector<342x12xbf16>, vector<12x128xbf16>, vector<342x128xf32> -> vector<342x128xf32>
    %10 = arith.addf %4, %9 : vector<342x128xf32>
    %c0_11 = arith.constant 0 : index
    %c19 = arith.constant 19 : index
    %c0_12 = arith.constant 0 : index
    %11 = vector.load %arg1[%c0_11, %c19, %c0_12] : memref<1x362x12xbf16, #tpu.memory_space<vmem>>, vector<1x342x12xbf16>
    %12 = vector.shape_cast %11 : vector<1x342x12xbf16> to vector<342x12xbf16>
    %c2 = arith.constant 2 : index
    %c0_13 = arith.constant 0 : index
    %c0_14 = arith.constant 0 : index
    %13 = vector.load %arg2[%c2, %c0_13, %c0_14] : memref<4x12x128xbf16, #tpu.memory_space<vmem>>, vector<1x12x128xbf16>
    %14 = vector.shape_cast %13 : vector<1x12x128xbf16> to vector<12x128xbf16>
    %cst_15 = arith.constant dense<0.000000e+00> : vector<342x128xf32>
    %15 = tpu.matmul %12, %14, %cst_15 {dimension_numbers = #tpu.dot_dimension_numbers<[1], [0], [0], [1], [0, 0, 1, 1], [], []>} : vector<342x12xbf16>, vector<12x128xbf16>, vector<342x128xf32> -> vector<342x128xf32>
    %16 = arith.addf %10, %15 : vector<342x128xf32>
    %c0_16 = arith.constant 0 : index
    %c20 = arith.constant 20 : index
    %c0_17 = arith.constant 0 : index
    %17 = vector.load %arg1[%c0_16, %c20, %c0_17] : memref<1x362x12xbf16, #tpu.memory_space<vmem>>, vector<1x342x12xbf16>
    %18 = vector.shape_cast %17 : vector<1x342x12xbf16> to vector<342x12xbf16>
    %c3 = arith.constant 3 : index
    %c0_18 = arith.constant 0 : index
    %c0_19 = arith.constant 0 : index
    %19 = vector.load %arg2[%c3, %c0_18, %c0_19] : memref<4x12x128xbf16, #tpu.memory_space<vmem>>, vector<1x12x128xbf16>
    %20 = vector.shape_cast %19 : vector<1x12x128xbf16> to vector<12x128xbf16>
    %cst_20 = arith.constant dense<0.000000e+00> : vector<342x128xf32>
    %21 = tpu.matmul %18, %20, %cst_20 {dimension_numbers = #tpu.dot_dimension_numbers<[1], [0], [0], [1], [0, 0, 1, 1], [], []>} : vector<342x12xbf16>, vector<12x128xbf16>, vector<342x128xf32> -> vector<342x128xf32>
    %22 = arith.addf %16, %21 : vector<342x128xf32>
    %c0_21 = arith.constant 0 : index
    %c0_22 = arith.constant 0 : index
    %23 = vector.load %arg3[%c0_21, %c0_22] : memref<1x128xf32, #tpu.memory_space<vmem>>, vector<1x128xf32>
    %24 = vector.broadcast %23 : vector<1x128xf32> to vector<342x128xf32>
    %25 = arith.addf %22, %24 : vector<342x128xf32>
    %cst_23 = arith.constant 2.000000e-01 : f32
    %26 = vector.broadcast %cst_23 : f32 to vector<342x128xf32>
    %27 = arith.mulf %26, %25 : vector<342x128xf32>
    %28 = arith.maximumf %25, %27 : vector<342x128xf32>
    %29 = arith.truncf %28 : vector<342x128xf32> to vector<342x128xbf16>
    %c0_24 = arith.constant 0 : index
    %c0_25 = arith.constant 0 : index
    %c0_26 = arith.constant 0 : index
    %30 = vector.load %arg4[%c0_24, %c0_25, %c0_26] : memref<1x342x128xbf16, #tpu.memory_space<vmem>>, vector<1x342x128xbf16>
    %31 = vector.shape_cast %30 : vector<1x342x128xbf16> to vector<342x128xbf16>
    %32 = vector.shape_cast %29 : vector<342x128xbf16> to vector<1x342x128xbf16>
    tpu.vector_store %arg4[%c0_24, %c0_25, %c0_26], %32 {strides = array<i32>} : memref<1x342x128xbf16, #tpu.memory_space<vmem>>, vector<1x342x128xbf16>,
    return
  }
  func.func @transform_0(%arg0: i32) -> (i32, i32, i32) {
    %c0_i32 = arith.constant 0 : i32
    %c0_i32_0 = arith.constant 0 : i32
    %c0_i32_1 = arith.constant 0 : i32
    return %arg0, %c0_i32, %c0_i32_0 : i32, i32, i32
  }
  func.func @transform_1(%arg0: i32) -> (i32, i32, i32) {
    %c0_i32 = arith.constant 0 : i32
    %c0_i32_0 = arith.constant 0 : i32
    %c0_i32_1 = arith.constant 0 : i32
    %c0_i32_2 = arith.constant 0 : i32
    return %c0_i32, %c0_i32_0, %c0_i32_1 : i32, i32, i32
  }
  func.func @transform_2(%arg0: i32) -> (i32, i32) {
    %c0_i32 = arith.constant 0 : i32
    %c0_i32_0 = arith.constant 0 : i32
    %c0_i32_1 = arith.constant 0 : i32
    return %c0_i32, %c0_i32_0 : i32, i32
  }
  func.func @transform_3(%arg0: i32) -> (i32, i32, i32) {
    %c0_i32 = arith.constant 0 : i32
    %c0_i32_0 = arith.constant 0 : i32
    %c0_i32_1 = arith.constant 0 : i32
    return %arg0, %c0_i32, %c0_i32_0 : i32, i32, i32
  }
}

module attributes {stable_mosaic.version = 11 : i64} {
  func.func @conv_in_lrelu_kernel(%arg0: i32, %arg1: memref<1x82x512xbf16, #tpu.memory_space<vmem>>, %arg2: memref<4x512x128xbf16, #tpu.memory_space<vmem>>, %arg3: memref<1x128xf32, #tpu.memory_space<vmem>>, %arg4: memref<1x72x1xf32, #tpu.memory_space<vmem>>, %arg5: memref<1x72x128xbf16, #tpu.memory_space<vmem>>) attributes {dimension_semantics = [#tpu.dimension_semantics<parallel>], iteration_bounds = array<i64: 2>, scalar_prefetch = 0 : i64, scratch_operands = 0 : i64, tpu.core_type = #tpu.core_type<tc>, window_params = [{transform_indices = @transform_0, window_bounds = array<i64: 1, 82, 512>}, {pipeline_mode = #tpu.pipeline_mode<synchronous>, transform_indices = @transform_1, window_bounds = array<i64: 4, 512, 128>}, {pipeline_mode = #tpu.pipeline_mode<synchronous>, transform_indices = @transform_2, window_bounds = array<i64: 1, 128>}, {pipeline_mode = #tpu.pipeline_mode<synchronous>, transform_indices = @transform_3, window_bounds = array<i64: 1, 72, 1>}, {transform_indices = @transform_4, window_bounds = array<i64: 1, 72, 128>}]} {
    %c0 = arith.constant 0 : index
    %c0_0 = arith.constant 0 : index
    %c0_1 = arith.constant 0 : index
    %0 = vector.load %arg1[%c0, %c0_0, %c0_1] : memref<1x82x512xbf16, #tpu.memory_space<vmem>>, vector<1x72x512xbf16>
    %1 = vector.shape_cast %0 : vector<1x72x512xbf16> to vector<72x512xbf16>
    %c0_2 = arith.constant 0 : index
    %c0_3 = arith.constant 0 : index
    %c0_4 = arith.constant 0 : index
    %2 = vector.load %arg2[%c0_2, %c0_3, %c0_4] : memref<4x512x128xbf16, #tpu.memory_space<vmem>>, vector<1x512x128xbf16>
    %3 = vector.shape_cast %2 : vector<1x512x128xbf16> to vector<512x128xbf16>
    %cst = arith.constant dense<0.000000e+00> : vector<72x128xf32>
    %4 = tpu.matmul %1, %3, %cst {dimension_numbers = #tpu.dot_dimension_numbers<[1], [0], [0], [1], [0, 0, 1, 1], [], []>} : vector<72x512xbf16>, vector<512x128xbf16>, vector<72x128xf32> -> vector<72x128xf32>
    %c0_5 = arith.constant 0 : index
    %c1 = arith.constant 1 : index
    %c0_6 = arith.constant 0 : index
    %5 = vector.load %arg1[%c0_5, %c1, %c0_6] : memref<1x82x512xbf16, #tpu.memory_space<vmem>>, vector<1x72x512xbf16>
    %6 = vector.shape_cast %5 : vector<1x72x512xbf16> to vector<72x512xbf16>
    %c1_7 = arith.constant 1 : index
    %c0_8 = arith.constant 0 : index
    %c0_9 = arith.constant 0 : index
    %7 = vector.load %arg2[%c1_7, %c0_8, %c0_9] : memref<4x512x128xbf16, #tpu.memory_space<vmem>>, vector<1x512x128xbf16>
    %8 = vector.shape_cast %7 : vector<1x512x128xbf16> to vector<512x128xbf16>
    %cst_10 = arith.constant dense<0.000000e+00> : vector<72x128xf32>
    %9 = tpu.matmul %6, %8, %cst_10 {dimension_numbers = #tpu.dot_dimension_numbers<[1], [0], [0], [1], [0, 0, 1, 1], [], []>} : vector<72x512xbf16>, vector<512x128xbf16>, vector<72x128xf32> -> vector<72x128xf32>
    %10 = arith.addf %4, %9 : vector<72x128xf32>
    %c0_11 = arith.constant 0 : index
    %c9 = arith.constant 9 : index
    %c0_12 = arith.constant 0 : index
    %11 = vector.load %arg1[%c0_11, %c9, %c0_12] : memref<1x82x512xbf16, #tpu.memory_space<vmem>>, vector<1x72x512xbf16>
    %12 = vector.shape_cast %11 : vector<1x72x512xbf16> to vector<72x512xbf16>
    %c2 = arith.constant 2 : index
    %c0_13 = arith.constant 0 : index
    %c0_14 = arith.constant 0 : index
    %13 = vector.load %arg2[%c2, %c0_13, %c0_14] : memref<4x512x128xbf16, #tpu.memory_space<vmem>>, vector<1x512x128xbf16>
    %14 = vector.shape_cast %13 : vector<1x512x128xbf16> to vector<512x128xbf16>
    %cst_15 = arith.constant dense<0.000000e+00> : vector<72x128xf32>
    %15 = tpu.matmul %12, %14, %cst_15 {dimension_numbers = #tpu.dot_dimension_numbers<[1], [0], [0], [1], [0, 0, 1, 1], [], []>} : vector<72x512xbf16>, vector<512x128xbf16>, vector<72x128xf32> -> vector<72x128xf32>
    %16 = arith.addf %10, %15 : vector<72x128xf32>
    %c0_16 = arith.constant 0 : index
    %c10 = arith.constant 10 : index
    %c0_17 = arith.constant 0 : index
    %17 = vector.load %arg1[%c0_16, %c10, %c0_17] : memref<1x82x512xbf16, #tpu.memory_space<vmem>>, vector<1x72x512xbf16>
    %18 = vector.shape_cast %17 : vector<1x72x512xbf16> to vector<72x512xbf16>
    %c3 = arith.constant 3 : index
    %c0_18 = arith.constant 0 : index
    %c0_19 = arith.constant 0 : index
    %19 = vector.load %arg2[%c3, %c0_18, %c0_19] : memref<4x512x128xbf16, #tpu.memory_space<vmem>>, vector<1x512x128xbf16>
    %20 = vector.shape_cast %19 : vector<1x512x128xbf16> to vector<512x128xbf16>
    %cst_20 = arith.constant dense<0.000000e+00> : vector<72x128xf32>
    %21 = tpu.matmul %18, %20, %cst_20 {dimension_numbers = #tpu.dot_dimension_numbers<[1], [0], [0], [1], [0, 0, 1, 1], [], []>} : vector<72x512xbf16>, vector<512x128xbf16>, vector<72x128xf32> -> vector<72x128xf32>
    %22 = arith.addf %16, %21 : vector<72x128xf32>
    %c0_21 = arith.constant 0 : index
    %c0_22 = arith.constant 0 : index
    %23 = vector.load %arg3[%c0_21, %c0_22] : memref<1x128xf32, #tpu.memory_space<vmem>>, vector<1x128xf32>
    %24 = vector.broadcast %23 : vector<1x128xf32> to vector<72x128xf32>
    %25 = arith.addf %22, %24 : vector<72x128xf32>
    %c0_23 = arith.constant 0 : index
    %c0_24 = arith.constant 0 : index
    %c0_25 = arith.constant 0 : index
    %26 = vector.load %arg4[%c0_23, %c0_24, %c0_25] : memref<1x72x1xf32, #tpu.memory_space<vmem>>, vector<1x72x1xf32>
    %27 = vector.shape_cast %26 : vector<1x72x1xf32> to vector<72x1xf32>
    %28 = vector.broadcast %27 : vector<72x1xf32> to vector<72x128xf32>
    %29 = arith.mulf %25, %28 : vector<72x128xf32>
    %cst_26 = arith.constant dense<0.000000e+00> : vector<128xf32>
    %30 = vector.multi_reduction <add>, %29, %cst_26 [0] : vector<72x128xf32> to vector<128xf32>
    %31 = vector.shape_cast %30 : vector<128xf32> to vector<1x128xf32>
    %cst_27 = arith.constant 1.562500e-02 : f32
    %32 = vector.broadcast %cst_27 : f32 to vector<1x128xf32>
    %33 = arith.mulf %31, %32 : vector<1x128xf32>
    %34 = vector.broadcast %33 : vector<1x128xf32> to vector<72x128xf32>
    %35 = arith.subf %25, %34 : vector<72x128xf32>
    %36 = arith.mulf %35, %35 : vector<72x128xf32>
    %37 = vector.broadcast %27 : vector<72x1xf32> to vector<72x128xf32>
    %38 = arith.mulf %36, %37 : vector<72x128xf32>
    %cst_28 = arith.constant dense<0.000000e+00> : vector<128xf32>
    %39 = vector.multi_reduction <add>, %38, %cst_28 [0] : vector<72x128xf32> to vector<128xf32>
    %40 = vector.shape_cast %39 : vector<128xf32> to vector<1x128xf32>
    %cst_29 = arith.constant 1.562500e-02 : f32
    %41 = vector.broadcast %cst_29 : f32 to vector<1x128xf32>
    %42 = arith.mulf %40, %41 : vector<1x128xf32>
    %cst_30 = arith.constant 9.99999974E-6 : f32
    %43 = vector.broadcast %cst_30 : f32 to vector<1x128xf32>
    %44 = arith.addf %42, %43 : vector<1x128xf32>
    %45 = math.rsqrt %44 : vector<1x128xf32>
    %46 = vector.broadcast %45 : vector<1x128xf32> to vector<72x128xf32>
    %47 = arith.mulf %35, %46 : vector<72x128xf32>
    %cst_31 = arith.constant 2.000000e-01 : f32
    %48 = vector.broadcast %cst_31 : f32 to vector<72x128xf32>
    %49 = arith.mulf %48, %47 : vector<72x128xf32>
    %50 = arith.maximumf %47, %49 : vector<72x128xf32>
    %51 = arith.truncf %50 : vector<72x128xf32> to vector<72x128xbf16>
    %c0_32 = arith.constant 0 : index
    %c0_33 = arith.constant 0 : index
    %c0_34 = arith.constant 0 : index
    %52 = vector.load %arg5[%c0_32, %c0_33, %c0_34] : memref<1x72x128xbf16, #tpu.memory_space<vmem>>, vector<1x72x128xbf16>
    %53 = vector.shape_cast %52 : vector<1x72x128xbf16> to vector<72x128xbf16>
    %54 = vector.shape_cast %51 : vector<72x128xbf16> to vector<1x72x128xbf16>
    tpu.vector_store %arg5[%c0_32, %c0_33, %c0_34], %54 {strides = array<i32>} : memref<1x72x128xbf16, #tpu.memory_space<vmem>>, vector<1x72x128xbf16>,
    return
  }
  func.func @transform_0(%arg0: i32) -> (i32, i32, i32) {
    %c0_i32 = arith.constant 0 : i32
    %c0_i32_0 = arith.constant 0 : i32
    %c0_i32_1 = arith.constant 0 : i32
    return %arg0, %c0_i32, %c0_i32_0 : i32, i32, i32
  }
  func.func @transform_1(%arg0: i32) -> (i32, i32, i32) {
    %c0_i32 = arith.constant 0 : i32
    %c0_i32_0 = arith.constant 0 : i32
    %c0_i32_1 = arith.constant 0 : i32
    %c0_i32_2 = arith.constant 0 : i32
    return %c0_i32, %c0_i32_0, %c0_i32_1 : i32, i32, i32
  }
  func.func @transform_2(%arg0: i32) -> (i32, i32) {
    %c0_i32 = arith.constant 0 : i32
    %c0_i32_0 = arith.constant 0 : i32
    %c0_i32_1 = arith.constant 0 : i32
    return %c0_i32, %c0_i32_0 : i32, i32
  }
  func.func @transform_3(%arg0: i32) -> (i32, i32, i32) {
    %c0_i32 = arith.constant 0 : i32
    %c0_i32_0 = arith.constant 0 : i32
    %c0_i32_1 = arith.constant 0 : i32
    %c0_i32_2 = arith.constant 0 : i32
    return %c0_i32, %c0_i32_0, %c0_i32_1 : i32, i32, i32
  }
  func.func @transform_4(%arg0: i32) -> (i32, i32, i32) {
    %c0_i32 = arith.constant 0 : i32
    %c0_i32_0 = arith.constant 0 : i32
    %c0_i32_1 = arith.constant 0 : i32
    return %arg0, %c0_i32, %c0_i32_0 : i32, i32, i32
  }
}

module attributes {stable_mosaic.version = 11 : i64} {
  func.func @conv_in_lrelu_kernel(%arg0: i32, %arg1: memref<1x17x512xbf16, #tpu.memory_space<vmem>>, %arg2: memref<4x512x128xbf16, #tpu.memory_space<vmem>>, %arg3: memref<1x128xf32, #tpu.memory_space<vmem>>, %arg4: memref<1x12x1xf32, #tpu.memory_space<vmem>>, %arg5: memref<1x12x128xbf16, #tpu.memory_space<vmem>>) attributes {dimension_semantics = [#tpu.dimension_semantics<parallel>], iteration_bounds = array<i64: 2>, scalar_prefetch = 0 : i64, scratch_operands = 0 : i64, tpu.core_type = #tpu.core_type<tc>, window_params = [{transform_indices = @transform_0, window_bounds = array<i64: 1, 17, 512>}, {pipeline_mode = #tpu.pipeline_mode<synchronous>, transform_indices = @transform_1, window_bounds = array<i64: 4, 512, 128>}, {pipeline_mode = #tpu.pipeline_mode<synchronous>, transform_indices = @transform_2, window_bounds = array<i64: 1, 128>}, {pipeline_mode = #tpu.pipeline_mode<synchronous>, transform_indices = @transform_3, window_bounds = array<i64: 1, 12, 1>}, {transform_indices = @transform_4, window_bounds = array<i64: 1, 12, 128>}]} {
    %c0 = arith.constant 0 : index
    %c0_0 = arith.constant 0 : index
    %c0_1 = arith.constant 0 : index
    %0 = vector.load %arg1[%c0, %c0_0, %c0_1] : memref<1x17x512xbf16, #tpu.memory_space<vmem>>, vector<1x12x512xbf16>
    %1 = vector.shape_cast %0 : vector<1x12x512xbf16> to vector<12x512xbf16>
    %c0_2 = arith.constant 0 : index
    %c0_3 = arith.constant 0 : index
    %c0_4 = arith.constant 0 : index
    %2 = vector.load %arg2[%c0_2, %c0_3, %c0_4] : memref<4x512x128xbf16, #tpu.memory_space<vmem>>, vector<1x512x128xbf16>
    %3 = vector.shape_cast %2 : vector<1x512x128xbf16> to vector<512x128xbf16>
    %cst = arith.constant dense<0.000000e+00> : vector<12x128xf32>
    %4 = tpu.matmul %1, %3, %cst {dimension_numbers = #tpu.dot_dimension_numbers<[1], [0], [0], [1], [0, 0, 1, 1], [], []>} : vector<12x512xbf16>, vector<512x128xbf16>, vector<12x128xf32> -> vector<12x128xf32>
    %c0_5 = arith.constant 0 : index
    %c1 = arith.constant 1 : index
    %c0_6 = arith.constant 0 : index
    %5 = vector.load %arg1[%c0_5, %c1, %c0_6] : memref<1x17x512xbf16, #tpu.memory_space<vmem>>, vector<1x12x512xbf16>
    %6 = vector.shape_cast %5 : vector<1x12x512xbf16> to vector<12x512xbf16>
    %c1_7 = arith.constant 1 : index
    %c0_8 = arith.constant 0 : index
    %c0_9 = arith.constant 0 : index
    %7 = vector.load %arg2[%c1_7, %c0_8, %c0_9] : memref<4x512x128xbf16, #tpu.memory_space<vmem>>, vector<1x512x128xbf16>
    %8 = vector.shape_cast %7 : vector<1x512x128xbf16> to vector<512x128xbf16>
    %cst_10 = arith.constant dense<0.000000e+00> : vector<12x128xf32>
    %9 = tpu.matmul %6, %8, %cst_10 {dimension_numbers = #tpu.dot_dimension_numbers<[1], [0], [0], [1], [0, 0, 1, 1], [], []>} : vector<12x512xbf16>, vector<512x128xbf16>, vector<12x128xf32> -> vector<12x128xf32>
    %10 = arith.addf %4, %9 : vector<12x128xf32>
    %c0_11 = arith.constant 0 : index
    %c4 = arith.constant 4 : index
    %c0_12 = arith.constant 0 : index
    %11 = vector.load %arg1[%c0_11, %c4, %c0_12] : memref<1x17x512xbf16, #tpu.memory_space<vmem>>, vector<1x12x512xbf16>
    %12 = vector.shape_cast %11 : vector<1x12x512xbf16> to vector<12x512xbf16>
    %c2 = arith.constant 2 : index
    %c0_13 = arith.constant 0 : index
    %c0_14 = arith.constant 0 : index
    %13 = vector.load %arg2[%c2, %c0_13, %c0_14] : memref<4x512x128xbf16, #tpu.memory_space<vmem>>, vector<1x512x128xbf16>
    %14 = vector.shape_cast %13 : vector<1x512x128xbf16> to vector<512x128xbf16>
    %cst_15 = arith.constant dense<0.000000e+00> : vector<12x128xf32>
    %15 = tpu.matmul %12, %14, %cst_15 {dimension_numbers = #tpu.dot_dimension_numbers<[1], [0], [0], [1], [0, 0, 1, 1], [], []>} : vector<12x512xbf16>, vector<512x128xbf16>, vector<12x128xf32> -> vector<12x128xf32>
    %16 = arith.addf %10, %15 : vector<12x128xf32>
    %c0_16 = arith.constant 0 : index
    %c5 = arith.constant 5 : index
    %c0_17 = arith.constant 0 : index
    %17 = vector.load %arg1[%c0_16, %c5, %c0_17] : memref<1x17x512xbf16, #tpu.memory_space<vmem>>, vector<1x12x512xbf16>
    %18 = vector.shape_cast %17 : vector<1x12x512xbf16> to vector<12x512xbf16>
    %c3 = arith.constant 3 : index
    %c0_18 = arith.constant 0 : index
    %c0_19 = arith.constant 0 : index
    %19 = vector.load %arg2[%c3, %c0_18, %c0_19] : memref<4x512x128xbf16, #tpu.memory_space<vmem>>, vector<1x512x128xbf16>
    %20 = vector.shape_cast %19 : vector<1x512x128xbf16> to vector<512x128xbf16>
    %cst_20 = arith.constant dense<0.000000e+00> : vector<12x128xf32>
    %21 = tpu.matmul %18, %20, %cst_20 {dimension_numbers = #tpu.dot_dimension_numbers<[1], [0], [0], [1], [0, 0, 1, 1], [], []>} : vector<12x512xbf16>, vector<512x128xbf16>, vector<12x128xf32> -> vector<12x128xf32>
    %22 = arith.addf %16, %21 : vector<12x128xf32>
    %c0_21 = arith.constant 0 : index
    %c0_22 = arith.constant 0 : index
    %23 = vector.load %arg3[%c0_21, %c0_22] : memref<1x128xf32, #tpu.memory_space<vmem>>, vector<1x128xf32>
    %24 = vector.broadcast %23 : vector<1x128xf32> to vector<12x128xf32>
    %25 = arith.addf %22, %24 : vector<12x128xf32>
    %c0_23 = arith.constant 0 : index
    %c0_24 = arith.constant 0 : index
    %c0_25 = arith.constant 0 : index
    %26 = vector.load %arg4[%c0_23, %c0_24, %c0_25] : memref<1x12x1xf32, #tpu.memory_space<vmem>>, vector<1x12x1xf32>
    %27 = vector.shape_cast %26 : vector<1x12x1xf32> to vector<12x1xf32>
    %28 = vector.broadcast %27 : vector<12x1xf32> to vector<12x128xf32>
    %29 = arith.mulf %25, %28 : vector<12x128xf32>
    %cst_26 = arith.constant dense<0.000000e+00> : vector<128xf32>
    %30 = vector.multi_reduction <add>, %29, %cst_26 [0] : vector<12x128xf32> to vector<128xf32>
    %31 = vector.shape_cast %30 : vector<128xf32> to vector<1x128xf32>
    %cst_27 = arith.constant 0.111111112 : f32
    %32 = vector.broadcast %cst_27 : f32 to vector<1x128xf32>
    %33 = arith.mulf %31, %32 : vector<1x128xf32>
    %34 = vector.broadcast %33 : vector<1x128xf32> to vector<12x128xf32>
    %35 = arith.subf %25, %34 : vector<12x128xf32>
    %36 = arith.mulf %35, %35 : vector<12x128xf32>
    %37 = vector.broadcast %27 : vector<12x1xf32> to vector<12x128xf32>
    %38 = arith.mulf %36, %37 : vector<12x128xf32>
    %cst_28 = arith.constant dense<0.000000e+00> : vector<128xf32>
    %39 = vector.multi_reduction <add>, %38, %cst_28 [0] : vector<12x128xf32> to vector<128xf32>
    %40 = vector.shape_cast %39 : vector<128xf32> to vector<1x128xf32>
    %cst_29 = arith.constant 0.111111112 : f32
    %41 = vector.broadcast %cst_29 : f32 to vector<1x128xf32>
    %42 = arith.mulf %40, %41 : vector<1x128xf32>
    %cst_30 = arith.constant 9.99999974E-6 : f32
    %43 = vector.broadcast %cst_30 : f32 to vector<1x128xf32>
    %44 = arith.addf %42, %43 : vector<1x128xf32>
    %45 = math.rsqrt %44 : vector<1x128xf32>
    %46 = vector.broadcast %45 : vector<1x128xf32> to vector<12x128xf32>
    %47 = arith.mulf %35, %46 : vector<12x128xf32>
    %cst_31 = arith.constant 2.000000e-01 : f32
    %48 = vector.broadcast %cst_31 : f32 to vector<12x128xf32>
    %49 = arith.mulf %48, %47 : vector<12x128xf32>
    %50 = arith.maximumf %47, %49 : vector<12x128xf32>
    %51 = arith.truncf %50 : vector<12x128xf32> to vector<12x128xbf16>
    %c0_32 = arith.constant 0 : index
    %c0_33 = arith.constant 0 : index
    %c0_34 = arith.constant 0 : index
    %52 = vector.load %arg5[%c0_32, %c0_33, %c0_34] : memref<1x12x128xbf16, #tpu.memory_space<vmem>>, vector<1x12x128xbf16>
    %53 = vector.shape_cast %52 : vector<1x12x128xbf16> to vector<12x128xbf16>
    %54 = vector.shape_cast %51 : vector<12x128xbf16> to vector<1x12x128xbf16>
    tpu.vector_store %arg5[%c0_32, %c0_33, %c0_34], %54 {strides = array<i32>} : memref<1x12x128xbf16, #tpu.memory_space<vmem>>, vector<1x12x128xbf16>,
    return
  }
  func.func @transform_0(%arg0: i32) -> (i32, i32, i32) {
    %c0_i32 = arith.constant 0 : i32
    %c0_i32_0 = arith.constant 0 : i32
    %c0_i32_1 = arith.constant 0 : i32
    return %arg0, %c0_i32, %c0_i32_0 : i32, i32, i32
  }
  func.func @transform_1(%arg0: i32) -> (i32, i32, i32) {
    %c0_i32 = arith.constant 0 : i32
    %c0_i32_0 = arith.constant 0 : i32
    %c0_i32_1 = arith.constant 0 : i32
    %c0_i32_2 = arith.constant 0 : i32
    return %c0_i32, %c0_i32_0, %c0_i32_1 : i32, i32, i32
  }
  func.func @transform_2(%arg0: i32) -> (i32, i32) {
    %c0_i32 = arith.constant 0 : i32
    %c0_i32_0 = arith.constant 0 : i32
    %c0_i32_1 = arith.constant 0 : i32
    return %c0_i32, %c0_i32_0 : i32, i32
  }
  func.func @transform_3(%arg0: i32) -> (i32, i32, i32) {
    %c0_i32 = arith.constant 0 : i32
    %c0_i32_0 = arith.constant 0 : i32
    %c0_i32_1 = arith.constant 0 : i32
    %c0_i32_2 = arith.constant 0 : i32
    return %c0_i32, %c0_i32_0, %c0_i32_1 : i32, i32, i32
  }
  func.func @transform_4(%arg0: i32) -> (i32, i32, i32) {
    %c0_i32 = arith.constant 0 : i32
    %c0_i32_0 = arith.constant 0 : i32
    %c0_i32_1 = arith.constant 0 : i32
    return %arg0, %c0_i32, %c0_i32_0 : i32, i32, i32
  }
}

module attributes {stable_mosaic.version = 11 : i64} {
  func.func @conv4_pool_kernel(%arg0: i32, %arg1: memref<1x12x128xbf16, #tpu.memory_space<vmem>>, %arg2: memref<1x1x1xf32, #tpu.memory_space<vmem>>, %arg3: memref<9x1x128xf32, #tpu.memory_space<vmem>>, %arg4: memref<1x1x1xf32, #tpu.memory_space<vmem>>, %arg5: memref<1x1x1xf32, #tpu.memory_space<vmem>>) attributes {dimension_semantics = [#tpu.dimension_semantics<parallel>], iteration_bounds = array<i64: 2>, scalar_prefetch = 0 : i64, scratch_operands = 0 : i64, tpu.core_type = #tpu.core_type<tc>, window_params = [{transform_indices = @transform_0, window_bounds = array<i64: 1, 12, 128>}, {pipeline_mode = #tpu.pipeline_mode<synchronous>, transform_indices = @transform_1, window_bounds = array<i64: 1, 1, 1>}, {pipeline_mode = #tpu.pipeline_mode<synchronous>, transform_indices = @transform_2, window_bounds = array<i64: 9, 1, 128>}, {pipeline_mode = #tpu.pipeline_mode<synchronous>, transform_indices = @transform_3, window_bounds = array<i64: 1, 1, 1>}, {transform_indices = @transform_4, window_bounds = array<i64: 1, 1, 1>}]} {
    %c0 = arith.constant 0 : index
    %c0_0 = arith.constant 0 : index
    %c0_1 = arith.constant 0 : index
    %0 = vector.load %arg2[%c0, %c0_0, %c0_1] : memref<1x1x1xf32, #tpu.memory_space<vmem>>, vector<1x1x1xf32>
    %1 = vector.shape_cast %0 : vector<1x1x1xf32> to vector<1x1xf32>
    %cst = arith.constant 0.000000e+00 : f32
    %2 = vector.broadcast %cst : f32 to vector<1x128xf32>
    %c0_2 = arith.constant 0 : index
    %c0_3 = arith.constant 0 : index
    %c0_4 = arith.constant 0 : index
    %3 = vector.load %arg1[%c0_2, %c0_3, %c0_4] : memref<1x12x128xbf16, #tpu.memory_space<vmem>>, vector<1x1x128xbf16>
    %4 = vector.shape_cast %3 : vector<1x1x128xbf16> to vector<1x128xbf16>
    %5 = arith.extf %4 : vector<1x128xbf16> to vector<1x128xf32>
    %6 = vector.broadcast %1 : vector<1x1xf32> to vector<1x128xf32>
    %7 = arith.mulf %5, %6 : vector<1x128xf32>
    %cst_5 = arith.constant dense<0.000000e+00> : vector<128xf32>
    %8 = vector.multi_reduction <add>, %7, %cst_5 [0] : vector<1x128xf32> to vector<128xf32>
    %9 = vector.shape_cast %8 : vector<128xf32> to vector<1x128xf32>
    %c0_6 = arith.constant 0 : index
    %c0_7 = arith.constant 0 : index
    %c0_8 = arith.constant 0 : index
    %10 = vector.load %arg3[%c0_6, %c0_7, %c0_8] : memref<9x1x128xf32, #tpu.memory_space<vmem>>, vector<1x1x128xf32>
    %11 = vector.shape_cast %10 : vector<1x1x128xf32> to vector<1x128xf32>
    %12 = arith.mulf %9, %11 : vector<1x128xf32>
    %13 = arith.addf %2, %12 : vector<1x128xf32>
    %c0_9 = arith.constant 0 : index
    %c1 = arith.constant 1 : index
    %c0_10 = arith.constant 0 : index
    %14 = vector.load %arg1[%c0_9, %c1, %c0_10] : memref<1x12x128xbf16, #tpu.memory_space<vmem>>, vector<1x1x128xbf16>
    %15 = vector.shape_cast %14 : vector<1x1x128xbf16> to vector<1x128xbf16>
    %16 = arith.extf %15 : vector<1x128xbf16> to vector<1x128xf32>
    %17 = vector.broadcast %1 : vector<1x1xf32> to vector<1x128xf32>
    %18 = arith.mulf %16, %17 : vector<1x128xf32>
    %cst_11 = arith.constant dense<0.000000e+00> : vector<128xf32>
    %19 = vector.multi_reduction <add>, %18, %cst_11 [0] : vector<1x128xf32> to vector<128xf32>
    %20 = vector.shape_cast %19 : vector<128xf32> to vector<1x128xf32>
    %c1_12 = arith.constant 1 : index
    %c0_13 = arith.constant 0 : index
    %c0_14 = arith.constant 0 : index
    %21 = vector.load %arg3[%c1_12, %c0_13, %c0_14] : memref<9x1x128xf32, #tpu.memory_space<vmem>>, vector<1x1x128xf32>
    %22 = vector.shape_cast %21 : vector<1x1x128xf32> to vector<1x128xf32>
    %23 = arith.mulf %20, %22 : vector<1x128xf32>
    %24 = arith.addf %13, %23 : vector<1x128xf32>
    %c0_15 = arith.constant 0 : index
    %c2 = arith.constant 2 : index
    %c0_16 = arith.constant 0 : index
    %25 = vector.load %arg1[%c0_15, %c2, %c0_16] : memref<1x12x128xbf16, #tpu.memory_space<vmem>>, vector<1x1x128xbf16>
    %26 = vector.shape_cast %25 : vector<1x1x128xbf16> to vector<1x128xbf16>
    %27 = arith.extf %26 : vector<1x128xbf16> to vector<1x128xf32>
    %28 = vector.broadcast %1 : vector<1x1xf32> to vector<1x128xf32>
    %29 = arith.mulf %27, %28 : vector<1x128xf32>
    %cst_17 = arith.constant dense<0.000000e+00> : vector<128xf32>
    %30 = vector.multi_reduction <add>, %29, %cst_17 [0] : vector<1x128xf32> to vector<128xf32>
    %31 = vector.shape_cast %30 : vector<128xf32> to vector<1x128xf32>
    %c2_18 = arith.constant 2 : index
    %c0_19 = arith.constant 0 : index
    %c0_20 = arith.constant 0 : index
    %32 = vector.load %arg3[%c2_18, %c0_19, %c0_20] : memref<9x1x128xf32, #tpu.memory_space<vmem>>, vector<1x1x128xf32>
    %33 = vector.shape_cast %32 : vector<1x1x128xf32> to vector<1x128xf32>
    %34 = arith.mulf %31, %33 : vector<1x128xf32>
    %35 = arith.addf %24, %34 : vector<1x128xf32>
    %c0_21 = arith.constant 0 : index
    %c4 = arith.constant 4 : index
    %c0_22 = arith.constant 0 : index
    %36 = vector.load %arg1[%c0_21, %c4, %c0_22] : memref<1x12x128xbf16, #tpu.memory_space<vmem>>, vector<1x1x128xbf16>
    %37 = vector.shape_cast %36 : vector<1x1x128xbf16> to vector<1x128xbf16>
    %38 = arith.extf %37 : vector<1x128xbf16> to vector<1x128xf32>
    %39 = vector.broadcast %1 : vector<1x1xf32> to vector<1x128xf32>
    %40 = arith.mulf %38, %39 : vector<1x128xf32>
    %cst_23 = arith.constant dense<0.000000e+00> : vector<128xf32>
    %41 = vector.multi_reduction <add>, %40, %cst_23 [0] : vector<1x128xf32> to vector<128xf32>
    %42 = vector.shape_cast %41 : vector<128xf32> to vector<1x128xf32>
    %c3 = arith.constant 3 : index
    %c0_24 = arith.constant 0 : index
    %c0_25 = arith.constant 0 : index
    %43 = vector.load %arg3[%c3, %c0_24, %c0_25] : memref<9x1x128xf32, #tpu.memory_space<vmem>>, vector<1x1x128xf32>
    %44 = vector.shape_cast %43 : vector<1x1x128xf32> to vector<1x128xf32>
    %45 = arith.mulf %42, %44 : vector<1x128xf32>
    %46 = arith.addf %35, %45 : vector<1x128xf32>
    %c0_26 = arith.constant 0 : index
    %c5 = arith.constant 5 : index
    %c0_27 = arith.constant 0 : index
    %47 = vector.load %arg1[%c0_26, %c5, %c0_27] : memref<1x12x128xbf16, #tpu.memory_space<vmem>>, vector<1x1x128xbf16>
    %48 = vector.shape_cast %47 : vector<1x1x128xbf16> to vector<1x128xbf16>
    %49 = arith.extf %48 : vector<1x128xbf16> to vector<1x128xf32>
    %50 = vector.broadcast %1 : vector<1x1xf32> to vector<1x128xf32>
    %51 = arith.mulf %49, %50 : vector<1x128xf32>
    %cst_28 = arith.constant dense<0.000000e+00> : vector<128xf32>
    %52 = vector.multi_reduction <add>, %51, %cst_28 [0] : vector<1x128xf32> to vector<128xf32>
    %53 = vector.shape_cast %52 : vector<128xf32> to vector<1x128xf32>
    %c4_29 = arith.constant 4 : index
    %c0_30 = arith.constant 0 : index
    %c0_31 = arith.constant 0 : index
    %54 = vector.load %arg3[%c4_29, %c0_30, %c0_31] : memref<9x1x128xf32, #tpu.memory_space<vmem>>, vector<1x1x128xf32>
    %55 = vector.shape_cast %54 : vector<1x1x128xf32> to vector<1x128xf32>
    %56 = arith.mulf %53, %55 : vector<1x128xf32>
    %57 = arith.addf %46, %56 : vector<1x128xf32>
    %c0_32 = arith.constant 0 : index
    %c6 = arith.constant 6 : index
    %c0_33 = arith.constant 0 : index
    %58 = vector.load %arg1[%c0_32, %c6, %c0_33] : memref<1x12x128xbf16, #tpu.memory_space<vmem>>, vector<1x1x128xbf16>
    %59 = vector.shape_cast %58 : vector<1x1x128xbf16> to vector<1x128xbf16>
    %60 = arith.extf %59 : vector<1x128xbf16> to vector<1x128xf32>
    %61 = vector.broadcast %1 : vector<1x1xf32> to vector<1x128xf32>
    %62 = arith.mulf %60, %61 : vector<1x128xf32>
    %cst_34 = arith.constant dense<0.000000e+00> : vector<128xf32>
    %63 = vector.multi_reduction <add>, %62, %cst_34 [0] : vector<1x128xf32> to vector<128xf32>
    %64 = vector.shape_cast %63 : vector<128xf32> to vector<1x128xf32>
    %c5_35 = arith.constant 5 : index
    %c0_36 = arith.constant 0 : index
    %c0_37 = arith.constant 0 : index
    %65 = vector.load %arg3[%c5_35, %c0_36, %c0_37] : memref<9x1x128xf32, #tpu.memory_space<vmem>>, vector<1x1x128xf32>
    %66 = vector.shape_cast %65 : vector<1x1x128xf32> to vector<1x128xf32>
    %67 = arith.mulf %64, %66 : vector<1x128xf32>
    %68 = arith.addf %57, %67 : vector<1x128xf32>
    %c0_38 = arith.constant 0 : index
    %c8 = arith.constant 8 : index
    %c0_39 = arith.constant 0 : index
    %69 = vector.load %arg1[%c0_38, %c8, %c0_39] : memref<1x12x128xbf16, #tpu.memory_space<vmem>>, vector<1x1x128xbf16>
    %70 = vector.shape_cast %69 : vector<1x1x128xbf16> to vector<1x128xbf16>
    %71 = arith.extf %70 : vector<1x128xbf16> to vector<1x128xf32>
    %72 = vector.broadcast %1 : vector<1x1xf32> to vector<1x128xf32>
    %73 = arith.mulf %71, %72 : vector<1x128xf32>
    %cst_40 = arith.constant dense<0.000000e+00> : vector<128xf32>
    %74 = vector.multi_reduction <add>, %73, %cst_40 [0] : vector<1x128xf32> to vector<128xf32>
    %75 = vector.shape_cast %74 : vector<128xf32> to vector<1x128xf32>
    %c6_41 = arith.constant 6 : index
    %c0_42 = arith.constant 0 : index
    %c0_43 = arith.constant 0 : index
    %76 = vector.load %arg3[%c6_41, %c0_42, %c0_43] : memref<9x1x128xf32, #tpu.memory_space<vmem>>, vector<1x1x128xf32>
    %77 = vector.shape_cast %76 : vector<1x1x128xf32> to vector<1x128xf32>
    %78 = arith.mulf %75, %77 : vector<1x128xf32>
    %79 = arith.addf %68, %78 : vector<1x128xf32>
    %c0_44 = arith.constant 0 : index
    %c9 = arith.constant 9 : index
    %c0_45 = arith.constant 0 : index
    %80 = vector.load %arg1[%c0_44, %c9, %c0_45] : memref<1x12x128xbf16, #tpu.memory_space<vmem>>, vector<1x1x128xbf16>
    %81 = vector.shape_cast %80 : vector<1x1x128xbf16> to vector<1x128xbf16>
    %82 = arith.extf %81 : vector<1x128xbf16> to vector<1x128xf32>
    %83 = vector.broadcast %1 : vector<1x1xf32> to vector<1x128xf32>
    %84 = arith.mulf %82, %83 : vector<1x128xf32>
    %cst_46 = arith.constant dense<0.000000e+00> : vector<128xf32>
    %85 = vector.multi_reduction <add>, %84, %cst_46 [0] : vector<1x128xf32> to vector<128xf32>
    %86 = vector.shape_cast %85 : vector<128xf32> to vector<1x128xf32>
    %c7 = arith.constant 7 : index
    %c0_47 = arith.constant 0 : index
    %c0_48 = arith.constant 0 : index
    %87 = vector.load %arg3[%c7, %c0_47, %c0_48] : memref<9x1x128xf32, #tpu.memory_space<vmem>>, vector<1x1x128xf32>
    %88 = vector.shape_cast %87 : vector<1x1x128xf32> to vector<1x128xf32>
    %89 = arith.mulf %86, %88 : vector<1x128xf32>
    %90 = arith.addf %79, %89 : vector<1x128xf32>
    %c0_49 = arith.constant 0 : index
    %c10 = arith.constant 10 : index
    %c0_50 = arith.constant 0 : index
    %91 = vector.load %arg1[%c0_49, %c10, %c0_50] : memref<1x12x128xbf16, #tpu.memory_space<vmem>>, vector<1x1x128xbf16>
    %92 = vector.shape_cast %91 : vector<1x1x128xbf16> to vector<1x128xbf16>
    %93 = arith.extf %92 : vector<1x128xbf16> to vector<1x128xf32>
    %94 = vector.broadcast %1 : vector<1x1xf32> to vector<1x128xf32>
    %95 = arith.mulf %93, %94 : vector<1x128xf32>
    %cst_51 = arith.constant dense<0.000000e+00> : vector<128xf32>
    %96 = vector.multi_reduction <add>, %95, %cst_51 [0] : vector<1x128xf32> to vector<128xf32>
    %97 = vector.shape_cast %96 : vector<128xf32> to vector<1x128xf32>
    %c8_52 = arith.constant 8 : index
    %c0_53 = arith.constant 0 : index
    %c0_54 = arith.constant 0 : index
    %98 = vector.load %arg3[%c8_52, %c0_53, %c0_54] : memref<9x1x128xf32, #tpu.memory_space<vmem>>, vector<1x1x128xf32>
    %99 = vector.shape_cast %98 : vector<1x1x128xf32> to vector<1x128xf32>
    %100 = arith.mulf %97, %99 : vector<1x128xf32>
    %101 = arith.addf %90, %100 : vector<1x128xf32>
    %cst_55 = arith.constant dense<0.000000e+00> : vector<1xf32>
    %102 = vector.multi_reduction <add>, %101, %cst_55 [1] : vector<1x128xf32> to vector<1xf32>
    %103 = vector.shape_cast %102 : vector<1xf32> to vector<1x1xf32>
    %cst_56 = arith.constant 1.000000e+00 : f32
    %104 = vector.broadcast %cst_56 : f32 to vector<1x1xf32>
    %105 = arith.mulf %103, %104 : vector<1x1xf32>
    %c0_57 = arith.constant 0 : index
    %c0_58 = arith.constant 0 : index
    %c0_59 = arith.constant 0 : index
    %106 = vector.load %arg4[%c0_57, %c0_58, %c0_59] : memref<1x1x1xf32, #tpu.memory_space<vmem>>, vector<1x1x1xf32>
    %107 = vector.shape_cast %106 : vector<1x1x1xf32> to vector<1x1xf32>
    %108 = arith.addf %105, %107 : vector<1x1xf32>
    %c0_60 = arith.constant 0 : index
    %c0_61 = arith.constant 0 : index
    %c0_62 = arith.constant 0 : index
    %109 = vector.load %arg5[%c0_60, %c0_61, %c0_62] : memref<1x1x1xf32, #tpu.memory_space<vmem>>, vector<1x1x1xf32>
    %110 = vector.shape_cast %109 : vector<1x1x1xf32> to vector<1x1xf32>
    %111 = vector.shape_cast %108 : vector<1x1xf32> to vector<1x1x1xf32>
    tpu.vector_store %arg5[%c0_60, %c0_61, %c0_62], %111 {strides = array<i32>} : memref<1x1x1xf32, #tpu.memory_space<vmem>>, vector<1x1x1xf32>,
    return
  }
  func.func @transform_0(%arg0: i32) -> (i32, i32, i32) {
    %c0_i32 = arith.constant 0 : i32
    %c0_i32_0 = arith.constant 0 : i32
    %c0_i32_1 = arith.constant 0 : i32
    return %arg0, %c0_i32, %c0_i32_0 : i32, i32, i32
  }
  func.func @transform_1(%arg0: i32) -> (i32, i32, i32) {
    %c0_i32 = arith.constant 0 : i32
    %c0_i32_0 = arith.constant 0 : i32
    %c0_i32_1 = arith.constant 0 : i32
    %c0_i32_2 = arith.constant 0 : i32
    return %c0_i32, %c0_i32_0, %c0_i32_1 : i32, i32, i32
  }
  func.func @transform_2(%arg0: i32) -> (i32, i32, i32) {
    %c0_i32 = arith.constant 0 : i32
    %c0_i32_0 = arith.constant 0 : i32
    %c0_i32_1 = arith.constant 0 : i32
    %c0_i32_2 = arith.constant 0 : i32
    return %c0_i32, %c0_i32_0, %c0_i32_1 : i32, i32, i32
  }
  func.func @transform_3(%arg0: i32) -> (i32, i32, i32) {
    %c0_i32 = arith.constant 0 : i32
    %c0_i32_0 = arith.constant 0 : i32
    %c0_i32_1 = arith.constant 0 : i32
    %c0_i32_2 = arith.constant 0 : i32
    return %c0_i32, %c0_i32_0, %c0_i32_1 : i32, i32, i32
  }
  func.func @transform_4(%arg0: i32) -> (i32, i32, i32) {
    %c0_i32 = arith.constant 0 : i32
    %c0_i32_0 = arith.constant 0 : i32
    %c0_i32_1 = arith.constant 0 : i32
    return %arg0, %c0_i32, %c0_i32_0 : i32, i32, i32
  }
}

</mosaic_0001>

<bundles_post_ra>
// kernel: colormap_discriminator_forward.4
= control target key start
LH: loop header
LB: loop body
LE: loop exit
PB: predicated region body
PF: predicated region fallthrough
CT: control target
= control target key end

     0   :  { %s3249_s12 = smov 0   ;;  %s3788_s0 = inlined_call_operand.vmem [shape: bf16[2,362,12], index: 0, kind: input, shape index: {}]   ;;  %s3789_s1 = inlined_call_operand.vmem [shape: bf16[4,12,128], index: 1, kind: input, shape index: {}]   ;;  %s3790_s2 = inlined_call_operand.vmem [shape: f32[1,128], index: 2, kind: input, shape index: {}]   ;;  %s3791_s3 = inlined_call_operand.vmem [shape: bf16[2,342,128], index: 3, kind: output, shape index: {}]  }
   0x1 LB: > { %s2516_s13 = sadd.s32 4294967295, %s3227_s12   ;;  %p2520_p0 = scmp.ge.s32.totalorder %s3227_s12, 1  ;;  %s3227_s12 = sphi %s3249_s12, %s13_s12  }
   0x2   : > { %p137_p1 = scmp.lt.s32.totalorder %s3227_s12, 3 }
   0x4   : > { %p138_p2 = pnand %p2520_p0, %p137_p1 }
   0x6   : > { %141 = sbr.rel (%p138_p2) target bundleno = 406 (0x196), region = 32 }
   0xb   : > { %vm577_vm0 = vcmask 1045504   ;;  %p161_p3 = scmp.lt.s32.totalorder %s2516_s13, 1  ;;  %v3171_v0 = vld [vmem:[%s3789_s1] sm:$0x3f]   ;;  %v3172_v1 = vld [vmem:[%s3789_s1 + $0x8] sm:$0x3f]  }
   0xc   : > { %3158 = vmatprep.subr.msk.bf16.mxu1 %vm577_vm0, %v3171_v0  ;;  %v843_v2 = vsel %vm577_vm0, %v3171_v0, 0  ;;  %3157 = vmatprep.subr.msk.bf16.mxu0 %vm577_vm0, %v3172_v1  ;;  %v579_v3 = vsel %vm577_vm0, %v3172_v1, 0  ;;  %v3175_v4 = vld [vmem:[%s3789_s1 + $0x10] sm:$0x3f]   ;;  %v3177_v5 = vld [vmem:[%s3789_s1 + $0x18] sm:$0x3f]  }
   0xd   : > { %s3799_s13 = smov (!%p161_p3, %s2516_s13), 1  ;;  %3020 = vmatpush3.bf16.msra.mxu1 %v843_v2  ;;  %2974 = vmatpush3.bf16.msra.mxu0 %v579_v3  ;;  %vm510_vm1 = vcmask 97280   ;;  %vm329_vm2 = vsmask.f32 7424  ;;  %v1856_v8 = vsel %vm577_vm0, %v3177_v5, 0  ;;  %v1480_v29 = vsel %vm577_vm0, %v3175_v4, 0 }
   0xe   : > { %s3161_s18 = smul.u32 184, %s3799_s13  ;;  %3159 = vmatprep.subr.msk.bf16.mxu0 %vm577_vm0, %v3175_v4  ;;  %3160 = vmatprep.subr.msk.bf16.mxu1 %vm577_vm0, %v3177_v5  ;;  %vm1210_vm3 = vsmask.f32 6400 }
   0xf   : > { %s3162_s28 = smul.u32 172, %s3799_s13 }
  0x10   : > { %s3279_s25 = scalar_lea.vmem %s3788_s0, %s3161_s18 }
  0x11   : > { %v3173_v6 = vld [vmem:[%s3279_s25] sm:$0xff]   ;;  %v3174_v7 = vld [vmem:[%s3279_s25 + $0x8] sm:$0xff]   ;;  %v3176_v13 = vld [vmem:[%s3279_s25 + $0x10] sm:$0xff]   ;;  %s3686_s4 = scalar_lea.vmem %s3791_s3, %s3162_s28 }
  0x12   : > { %3021 = vmatprep.mubr.msk.bf16.mxu1 %vm510_vm1, %v3173_v6  ;;  %v331_v9 = vshrl.u32 %v3173_v6, 16  ;;  %v333_v10 = vshll.u32 %v3173_v6, 16  ;;  %v338_v11 = vshll.u32 %v3174_v7, 16  ;;  %v342_v12 = vshrl.u32 %v3174_v7, 16  ;;  %v3178_v14 = vld [vmem:[%s3279_s25 + $0x18] sm:$0xff]   ;;  %v3179_v16 = vld [vmem:[%s3279_s25 + $0x20] sm:$0xff]  }
  0x13   : > { %3022 = vmatmul.mubr.msk.bf16.vlgmr.msra.gmra.mxu1 %vm510_vm1, %v3174_v7  ;;  %v346_v18 = vshll.u32 %v3176_v13, 16  ;;  %v350_v19 = vshrl.u32 %v3176_v13, 16  ;;  %v354_v20 = vshll.u32 %v3178_v14, 16  ;;  %v362_v22 = vshll.u32 %v3179_v16, 16  ;;  %v3180_v27 = vld [vmem:[%s3279_s25 + $0x28] sm:$0xff]   ;;  %v3181_v35 = vld [vmem:[%s3279_s25 + $0x30] sm:$0xff]  }
  0x14   : > { %v335_v15 = vrot.slane %v333_v10, 1  ;;  %3112 = vmatpush3.bf16.msra.mxu1 %v1856_v8  ;;  %v340_v17 = vrot.slane %v338_v11, 1  ;;  %3025 = vmatprep.mubr.msk.bf16.mxu1 %vm510_vm1, %v3176_v13  ;;  %v358_v26 = vshrl.u32 %v3178_v14, 16  ;;  %v366_v30 = vshrl.u32 %v3179_v16, 16  ;;  %v3182_v40 = vld [vmem:[%s3279_s25 + $0x38] sm:$0xff]   ;;  %v3183_v47 = vld [vmem:[%s3279_s25 + $0x40] sm:$0xff]  }
  0x15   : > { %v348_v24 = vrot.slane %v346_v18, 1  ;;  %v356_v25 = vrot.slane %v354_v20, 1  ;;  %v370_v33 = vshll.u32 %v3180_v27, 16  ;;  %v364_v34 = vrot.slane %v362_v22, 1  ;;  %v3184_v52 = vld [vmem:[%s3279_s25 + $0x48] sm:$0xff]   ;;  %v3316_v55 = vld [vmem:[%s3279_s25 + $0x90] sm:$0xff]  }
  0x16   : > { %v336_v21 = vor.u32 %v335_v15, %v331_v9  ;;  %v344_v23 = vor.u32 %v342_v12, %v340_v17  ;;  %v378_v41 = vshll.u32 %v3181_v35, 16  ;;  %v374_v43 = vshrl.u32 %v3180_v27, 16  ;;  %v3313_v54 = vld [vmem:[%s3279_s25 + $0x88] sm:$0xff]   ;;  %v3185_v61 = vld [vmem:[%s3279_s25 + $0x50] sm:$0xff]   ;;  %v3328_v3 = vld [vmem:[%s3279_s25 + $0x98] sm:$0xff]  }
  0x17   : > { %v352_v32 = vor.u32 %v350_v19, %v348_v24  ;;  %v360_v37 = vor.u32 %v358_v26, %v356_v25  ;;  %v368_v38 = vor.u32 %v366_v30, %v364_v34  ;;  %v372_v39 = vrot.slane %v370_v33, 1  ;;  %v3332_v5 = vld [vmem:[%s3279_s25 + $0xa0] sm:$0xff]   ;;  %v3186_v10 = vld [vmem:[%s3279_s25 + $0x58] sm:$0xff]  }
  0x18   : > { %v341_v28 = vsel %vm329_vm2, %v336_v21, %v340_v17  ;;  %v349_v31 = vsel %vm329_vm2, %v344_v23, %v348_v24  ;;  %v382_v45 = vshrl.u32 %v3181_v35, 16  ;;  %v386_v46 = vshll.u32 %v3182_v40, 16  ;;  %v3187_v33 = vld [vmem:[%s3279_s25 + $0x60] sm:$0xff]  }
  0x19   : > { %2975 = vmatprep.mubr.msk.bf16.mxu0 %vm510_vm1, %v341_v28  ;;  %v357_v36 = vsel %vm329_vm2, %v352_v32, %v356_v25  ;;  %v365_v42 = vsel %vm329_vm2, %v360_v37, %v364_v34  ;;  %v373_v44 = vsel %vm329_vm2, %v368_v38, %v372_v39  ;;  %v380_v48 = vrot.slane %v378_v41, 1 }
  0x1a   : > { %2976 = vmatmul.mubr.msk.bf16.vlgmr.msra.gmra.mxu0 %vm510_vm1, %v349_v31  ;;  %v376_v49 = vor.u32 %v374_v43, %v372_v39  ;;  %v388_v51 = vrot.slane %v386_v46, 1  ;;  %v394_v53 = vshll.u32 %v3183_v47, 16  ;;  %v390_v57 = vshrl.u32 %v3182_v40, 16  ;;  %v3188_v39 = vld [vmem:[%s3279_s25 + $0x68] sm:$0xff]  }
  0x1b   : > { %3066 = vmatpush3.bf16.msra.mxu0 %v1480_v29  ;;  %3026 = vmatmul.mubr.msk.bf16.gmra.mxu1 %vm510_vm1, %v3178_v14  ;;  %v384_v50 = vor.u32 %v382_v45, %v380_v48  ;;  %v398_v58 = vshrl.u32 %v3183_v47, 16  ;;  %v402_v60 = vshll.u32 %v3184_v52, 16  ;;  %v466_v62 = vshll.u32 %v3313_v54, 16 }
  0x1c   : > { %2979 = vmatprep.mubr.msk.bf16.mxu0 %vm510_vm1, %v357_v36  ;;  %3029 = vmatprep.mubr.msk.bf16.mxu1 %vm510_vm1, %v3179_v16  ;;  %v381_v56 = vsel %vm329_vm2, %v376_v49, %v380_v48  ;;  %v470_v63 = vshrl.u32 %v3313_v54, 16  ;;  %v396_v0 = vrot.slane %v394_v53, 1  ;;  %v474_v1 = vshll.u32 %v3316_v55, 16  ;;  %v3343_v16 = vld [vmem:[%s3279_s25 + $0xa8] ss:$0 sps:$4 sm:$0xff]  }
  0x1d   : > { %v389_v59 = vsel %vm329_vm2, %v384_v50, %v388_v51  ;;  %v3325_v2 = vrot.slane %v466_v62, 1  ;;  %v478_v4 = vshrl.u32 %v3316_v55, 16  ;;  %v392_v6 = vor.u32 %v390_v57, %v388_v51  ;;  %v3190_v51 = vld [vmem:[%s3279_s25 + $0x78] sm:$0xff]  }
  0x1e   : > { %v400_v7 = vor.u32 %v398_v58, %v396_v0  ;;  %v476_v8 = vrot.slane %v474_v1, 1  ;;  %v404_v9 = vrot.slane %v402_v60, 1  ;;  %v482_v12 = vshll.u32 %v3328_v3, 16 }
  0x1f   : > { %v472_v11 = vor.u32 %v470_v63, %v3325_v2  ;;  %v486_v13 = vshrl.u32 %v3328_v3, 16  ;;  %v490_v15 = vshll.u32 %v3332_v5, 16  ;;  %v494_v17 = vshrl.u32 %v3332_v5, 16 }
  0x20   : > { %v480_v14 = vor.u32 %v478_v4, %v476_v8  ;;  %v406_v18 = vshrl.u32 %v3184_v52, 16  ;;  %v410_v19 = vshll.u32 %v3185_v61, 16  ;;  %v484_v21 = vrot.slane %v482_v12, 1  ;;  %v3392_v12 = vld [vmem:[%s3279_s25 + $0x88] sm:$0xff]  }
  0x21   : > { %v3347_v20 = vsel %vm329_vm2, %v472_v11, %v476_v8  ;;  %v397_v22 = vsel %vm329_vm2, %v392_v6, %v396_v0  ;;  %v414_v23 = vshrl.u32 %v3185_v61, 16  ;;  %v492_v24 = vrot.slane %v490_v15, 1 }
  0x22   : > { %2980 = vmatmul.mubr.msk.bf16.gmra.mxu0 %vm510_vm1, %v365_v42  ;;  %v498_v25 = vshll.u32 %v3343_v16, 16  ;;  %v405_v26 = vsel %vm329_vm2, %v400_v7, %v404_v9  ;;  %v3353_v28 = vsel %vm329_vm2, %v480_v14, %v484_v21  ;;  %v488_v29 = vor.u32 %v486_v13, %v484_v21  ;;  %v3395_v13 = vld [vmem:[%s3279_s25 + $0x90] sm:$0xff]   ;;  %v1053_v21 = vld [vmem:[%s3279_s25 + $0x8] sm:$0xe] }
  0x23   : > { %3030 = vmatmul.mubr.msk.bf16.gmra.mxu1 %vm510_vm1, %v3180_v27  ;;  %2983 = vmatprep.mubr.msk.bf16.mxu0 %vm510_vm1, %v373_v44  ;;  %v418_v27 = vshll.u32 %v3186_v10, 16  ;;  %v496_v30 = vor.u32 %v494_v17, %v492_v24  ;;  %v412_v32 = vrot.slane %v410_v19, 1  ;;  %v422_v42 = vshrl.u32 %v3186_v10, 16 }
  0x24   : > { %3033 = vmatprep.mubr.msk.bf16.mxu1 %vm510_vm1, %v3181_v35  ;;  %v3355_v31 = vrot.slane %v498_v25, 1  ;;  %v3360_v34 = vsel %vm329_vm2, %v488_v29, %v492_v24  ;;  %v408_v35 = vor.u32 %v406_v18, %v404_v9  ;;  %v430_v44 = vshrl.u32 %v3187_v33, 16  ;;  %v3402_v18 = vld [vmem:[%s3279_s25 + $0x98] sm:$0xff]   ;;  %v3410_v24 = vld [vmem:[%s3279_s25 + $0xa0] sm:$0xff]  }
  0x25   : > { %v416_v37 = vor.u32 %v414_v23, %v412_v32  ;;  %v420_v38 = vrot.slane %v418_v27, 1  ;;  %v434_v45 = vshll.u32 %v3188_v39, 16  ;;  %v454_v6 = vshrl.u32 %v3190_v51, 16 }
  0x26   : > { %v3366_v36 = vsel %vm329_vm2, %v496_v30, %v3355_v31  ;;  %v413_v41 = vsel %vm329_vm2, %v408_v35, %v412_v32  ;;  %v1355_v17 = vshrl.u32 %v3392_v12, 16  ;;  %v1358_v19 = vshll.u32 %v3392_v12, 16  ;;  %v3421_v32 = vld [vmem:[%s3279_s25 + $0xa8] sm:$0xff]  }
  0x27   : > { %v421_v43 = vsel %vm329_vm2, %v416_v37, %v420_v38  ;;  %v424_v48 = vor.u32 %v422_v42, %v420_v38  ;;  %v436_v50 = vrot.slane %v434_v45, 1  ;;  %v1364_v23 = vshrl.u32 %v3395_v13, 16  ;;  %v3199_v42 = vld [vmem:[%s3279_s25 + $0x10] sm:$0xff]  }
  0x28   : > { %v1357_v25 = vrot.slane %v1355_v17, 1  ;;  %v1367_v29 = vshll.u32 %v3395_v13, 16  ;;  %v1373_v30 = vshrl.u32 %v3402_v18, 16  ;;  %v1376_v35 = vshll.u32 %v3402_v18, 16 }
  0x29   : > { %v1366_v27 = vrot.slane %v1364_v23, 1  ;;  %v1382_v38 = vshrl.u32 %v3410_v24, 16 }
  0x2a   : > { %2984 = vmatmul.mubr.msk.bf16.gmra.mxu0 %vm510_vm1, %v381_v56  ;;  %v438_v56 = vshrl.u32 %v3188_v39, 16  ;;  %v1375_v37 = vrot.slane %v1373_v30, 1 }
  0x2b   : > { %3034 = vmatmul.mubr.msk.bf16.gmra.mxu1 %vm510_vm1, %v3182_v40  ;;  %2987 = vmatprep.mubr.msk.bf16.mxu0 %vm510_vm1, %v389_v59  ;;  %v426_v40 = vshll.u32 %v3187_v33, 16  ;;  %v450_v59 = vshll.u32 %v3190_v51, 16  ;;  %v1384_v45 = vrot.slane %v1382_v38, 1  ;;  %v3204_v38 = vld [vmem:[%s3279_s25 + $0x30] sm:$0xff]  }
  0x2c   : > { %3037 = vmatprep.mubr.msk.bf16.mxu1 %vm510_vm1, %v3183_v47  ;;  %v3189_v47 = vld [vmem:[%s3279_s25 + $0x70] sm:$0xff]   ;;  %v440_v62 = vor.u32 %v438_v56, %v436_v50 }
  0x2d   : > { %v428_v46 = vrot.slane %v426_v40, 1  ;;  %v446_v58 = vshrl.u32 %v3189_v47, 16  ;;  %v452_v0 = vrot.slane %v450_v59, 1 }
  0x2f   : > { %v432_v49 = vor.u32 %v430_v44, %v428_v46  ;;  %v429_v53 = vsel %vm329_vm2, %v424_v48, %v428_v46  ;;  %v1391_v46 = vshrl.u32 %v3421_v32, 16 }
  0x31   : > { %v437_v57 = vsel %vm329_vm2, %v432_v49, %v436_v50  ;;  %v1394_v50 = vshll.u32 %v3421_v32, 16 }
  0x32   : > { %2988 = vmatmul.mubr.msk.bf16.gmra.mxu0 %vm510_vm1, %v397_v22  ;;  %v1054_v22 = vld [vmem:[%s3279_s25 + $0xc] sm:$0xf] }
  0x33   : > { %3038 = vmatmul.mubr.msk.bf16.gmra.mxu1 %vm510_vm1, %v3184_v52  ;;  %2991 = vmatprep.mubr.msk.bf16.mxu0 %vm510_vm1, %v405_v26  ;;  %v442_v52 = vshll.u32 %v3189_v47, 16  ;;  %v1360_v26 = vrot.slane %v1358_v19, 2  ;;  %v1396_v59 = vrot.slane %v1394_v50, 2  ;;  %v502_v19 = vshrl.u32 %v3343_v16, 16 }
  0x34   : > { %3041 = vmatprep.mubr.msk.bf16.mxu1 %vm510_vm1, %v3185_v61  ;;  %v3191_v61 = vld [vmem:[%s3279_s25 + $0x80] sm:$0xff]  }
  0x35   : > { %v444_v60 = vrot.slane %v442_v52, 1  ;;  %v458_v1 = vshll.u32 %v3191_v61, 16  ;;  %v462_v8 = vshrl.u32 %v3191_v61, 16  ;;  %v1393_v52 = vrot.slane %v1391_v46, 1 }
  0x36   : > { %v1259_v46 = vshll.u32 %v3204_v38, 16 }
  0x37   : > { %v448_v63 = vor.u32 %v446_v58, %v444_v60  ;;  %v445_v4 = vsel %vm329_vm2, %v440_v62, %v444_v60  ;;  %v460_v9 = vrot.slane %v458_v1, 1  ;;  %v1220_v60 = vshrl.u32 %v3199_v42, 16 }
  0x39   : > { %v453_v7 = vsel %vm329_vm2, %v448_v63, %v452_v0  ;;  %v464_v11 = vor.u32 %v462_v8, %v460_v9 }
  0x3a   : > { %2992 = vmatmul.mubr.msk.bf16.gmra.mxu0 %vm510_vm1, %v413_v41  ;;  %v1385_v41 = vshll.u32 %v3410_v24, 16 }
  0x3b   : > { %3042 = vmatmul.mubr.msk.bf16.gmra.mxu1 %vm510_vm1, %v3186_v10  ;;  %2995 = vmatprep.mubr.msk.bf16.mxu0 %vm510_vm1, %v421_v43  ;;  %v456_v10 = vor.u32 %v454_v6, %v452_v0  ;;  %v469_v15 = vsel %vm329_vm2, %v464_v11, %v3325_v2  ;;  %v1733_v2 = vld [vmem:[%s3279_s25 + $0x8] sm:$0xc]  ;;  %v3430_v43 = vor.u32 %v1360_v26, %v1357_v25  ;;  %v1742_v0 = vrot.slane %v3199_v42, 2  ;;  %v3196_v6 = vld [vmem:[%s3279_s25 + $0xa8] ss:$0 sps:$4 sm:$0x77]  }
  0x3c   : > { %3045 = vmatprep.mubr.msk.bf16.mxu1 %vm510_vm1, %v3187_v33  ;;  %v2596_v33 = vcombine.low %v1053_v21, %v1054_v22  ;;  %v2643_v40 = vcombine.low %v1733_v2, %v1054_v22  ;;  %v1387_v49 = vrot.slane %v1385_v41, 2 }
  0x3d   : > { %v461_v14 = vsel %vm329_vm2, %v456_v10, %v460_v9  ;;  %v1222_v10 = vrot.slane %v1220_v60, 1 }
  0x3e   : > { %v1388_v58 = vor.u32 %v1387_v49, %v1384_v45  ;;  %v1256_v45 = vshrl.u32 %v3204_v38, 16 }
  0x42   : > { %2996 = vmatmul.mubr.msk.bf16.gmra.mxu0 %vm510_vm1, %v429_v53 }
  0x43   : > { %3046 = vmatmul.mubr.msk.bf16.gmra.mxu1 %vm510_vm1, %v3188_v39  ;;  %2999 = vmatprep.mubr.msk.bf16.mxu0 %vm510_vm1, %v437_v57  ;;  %v3426_v39 = vld [vmem:[%s3279_s25 + $0xb0] sm:$0x1f]   ;;  %v1215_v57 = vshll.u32 %v2596_v33, 16 }
  0x44   : > { %3049 = vmatprep.mubr.msk.bf16.mxu1 %vm510_vm1, %v3189_v47  ;;  %v1212_v47 = vshrl.u32 %v2596_v33, 16  ;;  %v1400_v53 = vshrl.u32 %v3426_v39, 16  ;;  %v1403_v56 = vshll.u32 %v3426_v39, 16  ;;  %v3203_v33 = vld [vmem:[%s3279_s25 + $0x28] sm:$0xff]  }
  0x45   : > { %v1250_v41 = vshll.u32 %v3203_v33, 16 }
  0x46   : > { %v1402_v62 = vrot.slane %v1400_v53, 1  ;;  %v1405_v63 = vrot.slane %v1403_v56, 2  ;;  %v1214_v8 = vrot.slane %v1212_v47, 1  ;;  %v1750_v47 = vrot.slane %v3204_v38, 2 }
  0x47   : > { %v1252_v50 = vrot.slane %v1250_v41, 2 }
  0x4a   : > { %3000 = vmatmul.mubr.msk.bf16.gmra.mxu0 %vm510_vm1, %v445_v4  ;;  %v3454_v4 = vor.u32 %v1405_v63, %v1402_v62 }
  0x4b   : > { %3050 = vmatmul.mubr.msk.bf16.gmra.mxu1 %vm510_vm1, %v3190_v51  ;;  %3003 = vmatprep.mubr.msk.bf16.mxu0 %vm510_vm1, %v453_v7  ;;  %v3201_v7 = vld [vmem:[%s3279_s25 + $0x18] sm:$0xff]  }
  0x4c   : > { %3053 = vmatprep.mubr.msk.bf16.mxu1 %vm510_vm1, %v3191_v61  ;;  %v1223_v61 = vshll.u32 %v3199_v42, 16  ;;  %v1744_v21 = vrot.slane %v3201_v7, 2  ;;  %v1229_v22 = vshrl.u32 %v3201_v7, 16  ;;  %v1232_v23 = vshll.u32 %v3201_v7, 16 }
  0x4d   : > { %v1748_v42 = vrot.slane %v3203_v33, 2 }
  0x4e   : > { %v1225_v11 = vrot.slane %v1223_v61, 2  ;;  %v1231_v30 = vrot.slane %v1229_v22, 1  ;;  %v1234_v16 = vrot.slane %v1232_v23, 2  ;;  %v3208_v22 = vld [vmem:[%s3279_s25 + $0x50] sm:$0xff]  }
  0x4f   : > { %v1751_v60 = vsel %vm577_vm0, %v1748_v42, %v1750_v47 }
  0x50   : > { %v1226_v25 = vor.u32 %v1225_v11, %v1222_v10  ;;  %v3207_v11 = vld [vmem:[%s3279_s25 + $0x48] sm:$0xff]  }
  0x52   : > { %3004 = vmatmul.mubr.msk.bf16.gmra.mxu0 %vm510_vm1, %v461_v14  ;;  %v3202_v14 = vld [vmem:[%s3279_s25 + $0x20] sm:$0xff]  }
  0x53   : > { %3054 = vmatmul.mubr.msk.bf16.gmra.mxu1 %vm510_vm1, %v3313_v54  ;;  %3007 = vmatprep.mubr.msk.bf16.mxu0 %vm510_vm1, %v469_v15  ;;  %v1369_v54 = vrot.slane %v1367_v29, 2  ;;  %v1238_v26 = vshrl.u32 %v3202_v14, 16  ;;  %v1746_v29 = vrot.slane %v3202_v14, 2 }
  0x54   : > { %3057 = vmatprep.mubr.msk.bf16.mxu1 %vm510_vm1, %v3316_v55  ;;  %v1378_v55 = vrot.slane %v1376_v35, 2  ;;  %v1745_v35 = vsel %vm577_vm0, %v1742_v0, %v1744_v21 }
  0x55   : > { %v1370_v44 = vor.u32 %v1369_v54, %v1366_v27  ;;  %v1241_v27 = vshll.u32 %v3202_v14, 16  ;;  %v1240_v54 = vrot.slane %v1238_v26, 1  ;;  %v1749_v53 = vsel %vm577_vm0, %v1746_v29, %v1748_v42 }
  0x56   : > { %v1379_v48 = vor.u32 %v1378_v55, %v1375_v37  ;;  %v1247_v55 = vshrl.u32 %v3203_v33, 16  ;;  %v1286_v26 = vshll.u32 %v3207_v11, 16 }
  0x57   : > { %v3438_v51 = vsel %vm1210_vm3, %v3430_v43, %v1370_v44  ;;  %v1243_v37 = vrot.slane %v1241_v27, 2  ;;  %v1756_v27 = vrot.slane %v3207_v11, 2 }
  0x58   : > { %v3452_v1 = vsel %vm1210_vm3, %v1379_v48, %v1388_v58  ;;  %v1249_v49 = vrot.slane %v1247_v55, 1  ;;  %v3210_v55 = vld [vmem:[%s3279_s25 + $0x60] sm:$0xff]  }
  0x5a   : > { %3008 = vmatmul.mubr.msk.bf16.gmra.mxu0 %vm510_vm1, %v3347_v20  ;;  %v3447_v20 = vsel %vm1210_vm3, %v1370_v44, %v1379_v48  ;;  %v1244_v44 = vor.u32 %v1243_v37, %v1240_v54  ;;  %v1253_v61 = vor.u32 %v1252_v50, %v1249_v49  ;;  %v3209_v54 = vld [vmem:[%s3279_s25 + $0x58] sm:$0xff]   ;;  %v1313_v49 = vshll.u32 %v3210_v55, 16 }
  0x5b   : > { %3058 = vmatmul.mubr.msk.bf16.gmra.mxu1 %vm510_vm1, %v3328_v3  ;;  %3011 = vmatprep.mubr.msk.bf16.mxu0 %vm510_vm1, %v3353_v28  ;;  %v1741_v3 = vrot.slane %v2643_v40, 2  ;;  %v1397_v28 = vor.u32 %v1396_v59, %v1393_v52  ;;  %v1747_v40 = vsel %vm577_vm0, %v1744_v21, %v1746_v29  ;;  %v3205_v52 = vld [vmem:[%s3279_s25 + $0x38] sm:$0xff]   ;;  %v3206_v59 = vld [vmem:[%s3279_s25 + $0x40] sm:$0xff]   ;;  %v1762_v50 = vrot.slane %v3210_v55, 2 }
  0x5c   : > { %3061 = vmatprep.mubr.msk.bf16.mxu1 %vm510_vm1, %v3332_v5  ;;  %v1217_v5 = vrot.slane %v1215_v57, 2  ;;  %v1258_v57 = vrot.slane %v1256_v45, 1  ;;  %v1265_v62 = vshrl.u32 %v3205_v52, 16  ;;  %v1268_v63 = vshll.u32 %v3205_v52, 16 }
  0x5d   : > { %v3459_v9 = vsel %vm1210_vm3, %v1388_v58, %v1397_v28  ;;  %v3464_v15 = vsel %vm1210_vm3, %v1397_v28, %v3454_v4  ;;  %v1743_v17 = vsel %vm577_vm0, %v1741_v3, %v1742_v0  ;;  %v1261_v58 = vrot.slane %v1259_v46, 2 }
  0x5e   : > { %v1218_v2 = vor.u32 %v1217_v5, %v1214_v8  ;;  %v1752_v3 = vrot.slane %v3205_v52, 2  ;;  %v1274_v28 = vshrl.u32 %v3206_v59, 16  ;;  %v1754_v7 = vrot.slane %v3206_v59, 2 }
  0x5f   : > { %v1262_v0 = vor.u32 %v1261_v58, %v1258_v57  ;;  %v1254_v8 = vsel %vm1210_vm3, %v1244_v44, %v1253_v61  ;;  %v1267_v5 = vrot.slane %v1265_v62, 1  ;;  %v1270_v10 = vrot.slane %v1268_v63, 2  ;;  %v3211_v57 = vld [vmem:[%s3279_s25 + $0x68] sm:$0xff]   ;;  %v3212_v62 = vld [vmem:[%s3279_s25 + $0x70] sm:$0xff]  }
  0x60   : > { %v1753_v14 = vsel %vm577_vm0, %v1750_v47, %v1752_v3  ;;  %v1755_v23 = vsel %vm577_vm0, %v1752_v3, %v1754_v7  ;;  %v1757_v37 = vsel %vm577_vm0, %v1754_v7, %v1756_v27  ;;  %v1304_v45 = vshll.u32 %v3209_v54, 16 }
  0x61   : > { %v1760_v46 = vrot.slane %v3209_v54, 2 }
  0x62   : > { %3012 = vmatmul.mubr.msk.bf16.gmra.mxu0 %vm510_vm1, %v3360_v34  ;;  %v504_v34 = vor.u32 %v502_v19, %v3355_v31  ;;  %v1235_v31 = vor.u32 %v1234_v16, %v1231_v30  ;;  %v1276_v19 = vrot.slane %v1274_v28, 1  ;;  %v1295_v30 = vshll.u32 %v3208_v22, 16 }
  0x63   : > { %3062 = vmatmul.mubr.msk.bf16.gmra.mxu1 %vm510_vm1, %v3196_v6  ;;  %3015 = vmatprep.mubr.msk.bf16.mxu0 %vm510_vm1, %v3366_v36  ;;  %v1227_v36 = vsel %vm1210_vm3, %v1218_v2, %v1226_v25  ;;  %v1277_v6 = vshll.u32 %v3206_v59, 16  ;;  %v1271_v2 = vor.u32 %v1270_v10, %v1267_v5  ;;  %v1758_v16 = vrot.slane %v3208_v22, 2 }
  0x64   : > { %3113 = vmatprep.mubr.msk.bf16.mxu1 %vm510_vm1, %v1743_v17  ;;  %v1236_v48 = vsel %vm1210_vm3, %v1226_v25, %v1235_v31  ;;  %v1245_v56 = vsel %vm1210_vm3, %v1235_v31, %v1244_v44  ;;  %v1263_v17 = vsel %vm1210_vm3, %v1253_v61, %v1262_v0  ;;  %v1283_v25 = vshrl.u32 %v3207_v11, 16 }
  0x65   : > { %v1279_v21 = vrot.slane %v1277_v6, 2  ;;  %v1272_v33 = vsel %vm1210_vm3, %v1262_v0, %v1271_v2  ;;  %v1297_v31 = vrot.slane %v1295_v30, 2  ;;  %v1759_v41 = vsel %vm577_vm0, %v1756_v27, %v1758_v16 }
  0x66   : > { %v1301_v44 = vshrl.u32 %v3209_v54, 16  ;;  %v1761_v58 = vsel %vm577_vm0, %v1758_v16, %v1760_v46  ;;  %v1315_v61 = vrot.slane %v1313_v49, 2  ;;  %v1763_v63 = vsel %vm577_vm0, %v1760_v46, %v1762_v50 }
  0x67   : > { %v1280_v29 = vor.u32 %v1279_v21, %v1276_v19  ;;  %v1319_v0 = vshrl.u32 %v3211_v57, 16  ;;  %v1322_v28 = vshll.u32 %v3211_v57, 16  ;;  %v1764_v6 = vrot.slane %v3211_v57, 2  ;;  %v3213_v19 = vld [vmem:[%s3279_s25 + $0x78] sm:$0xff]  }
  0x68   : > { %v1331_v5 = vshll.u32 %v3212_v62, 16  ;;  %v1766_v10 = vrot.slane %v3212_v62, 2  ;;  %v1768_v30 = vrot.slane %v3213_v19, 2 }
  0x69   : > { %v1281_v38 = vsel %vm1210_vm3, %v1271_v2, %v1280_v29  ;;  %v1765_v21 = vsel %vm577_vm0, %v1762_v50, %v1764_v6 }
  0x6a   : > { %3016 = vmatmul.mubr.msk.bf16.gmra.mxu0 %vm510_vm1, %v504_v34  ;;  %v1292_v34 = vshrl.u32 %v3208_v22, 16  ;;  %v1333_v2 = vrot.slane %v1331_v5, 2 }
  0x6b   : > { %3114 = vmatmul.mubr.msk.bf16.vlgmr.msra.gmra.mxu1 %vm510_vm1, %v1745_v35  ;;  %3067 = vmatprep.mubr.msk.bf16.mxu0 %vm510_vm1, %v1227_v36  ;;  %v1285_v35 = vrot.slane %v1283_v25, 1  ;;  %v1288_v36 = vrot.slane %v1286_v26, 2  ;;  %v3214_v25 = vld [vmem:[%s3279_s25 + $0x80] sm:$0xff]   ;;  %v1767_v26 = vsel %vm577_vm0, %v1764_v6, %v1766_v10 }
  0x6c   : > { %3117 = vmatprep.mubr.msk.bf16.mxu1 %vm510_vm1, %v1747_v40  ;;  %v1294_v40 = vrot.slane %v1292_v34, 1  ;;  %v1340_v34 = vshll.u32 %v3213_v19, 16 }
  0x6d   : > { %v1289_v42 = vor.u32 %v1288_v36, %v1285_v35  ;;  %v1349_v35 = vshll.u32 %v3214_v25, 16  ;;  %v1770_v36 = vrot.slane %v3214_v25, 2 }
  0x6e   : > { %v1298_v47 = vor.u32 %v1297_v31, %v1294_v40  ;;  %v1769_v40 = vsel %vm577_vm0, %v1766_v10, %v1768_v30 }
  0x6f   : > { %v1290_v52 = vsel %vm1210_vm3, %v1280_v29, %v1289_v42  ;;  %v1337_v29 = vshrl.u32 %v3213_v19, 16 }
  0x70   : > { %v1299_v59 = vsel %vm1210_vm3, %v1289_v42, %v1298_v47  ;;  %v1771_v42 = vsel %vm577_vm0, %v1768_v30, %v1770_v36 }
  0x72   : > { %3068 = vmatmul.mubr.msk.bf16.vlgmr.msra.gmra.mxu0 %vm510_vm1, %v1236_v48  ;;  %v1310_v48 = vshrl.u32 %v3210_v55, 16 }
  0x73   : > { %3118 = vmatmul.mubr.msk.bf16.gmra.mxu1 %vm510_vm1, %v1749_v53  ;;  %3071 = vmatprep.mubr.msk.bf16.mxu0 %vm510_vm1, %v1245_v56  ;;  %v1303_v53 = vrot.slane %v1301_v44, 1  ;;  %v1306_v56 = vrot.slane %v1304_v45, 2  ;;  %v1772_v45 = vrot.slane %v3392_v12, 2  ;;  %v1776_v12 = vrot.slane %v3402_v18, 2 }
  0x74   : > { %3121 = vmatprep.mubr.msk.bf16.mxu1 %vm510_vm1, %v1751_v60  ;;  %v1312_v60 = vrot.slane %v1310_v48, 1  ;;  %v1780_v18 = vrot.slane %v3421_v32, 2 }
  0x75   : > { %v1307_v3 = vor.u32 %v1306_v56, %v1303_v53  ;;  %v1773_v49 = vsel %vm577_vm0, %v1770_v36, %v1772_v45 }
  0x76   : > { %v1316_v7 = vor.u32 %v1315_v61, %v1312_v60 }
  0x77   : > { %v1308_v11 = vsel %vm1210_vm3, %v1298_v47, %v1307_v3  ;;  %v1774_v47 = vrot.slane %v3395_v13, 2  ;;  %v1778_v13 = vrot.slane %v3410_v24, 2  ;;  %v1782_v24 = vrot.slane %v3426_v39, 2 }
  0x78   : > { %v1317_v22 = vsel %vm1210_vm3, %v1307_v3, %v1316_v7 }
  0x79   : > { %v1777_v56 = vsel %vm577_vm0, %v1774_v47, %v1776_v12  ;;  %v1779_v57 = vsel %vm577_vm0, %v1776_v12, %v1778_v13 }
  0x7a   : > { %3072 = vmatmul.mubr.msk.bf16.gmra.mxu0 %vm510_vm1, %v1254_v8  ;;  %v1328_v8 = vshrl.u32 %v3212_v62, 16 }
  0x7b   : > { %3122 = vmatmul.mubr.msk.bf16.gmra.mxu1 %vm510_vm1, %v1753_v14  ;;  %3075 = vmatprep.mubr.msk.bf16.mxu0 %vm510_vm1, %v1263_v17  ;;  %v1321_v14 = vrot.slane %v1319_v0, 1  ;;  %v1324_v17 = vrot.slane %v1322_v28, 2 }
  0x7c   : > { %3125 = vmatprep.mubr.msk.bf16.mxu1 %vm510_vm1, %v1755_v23  ;;  %v1330_v23 = vrot.slane %v1328_v8, 1 }
  0x7d   : > { %v1325_v27 = vor.u32 %v1324_v17, %v1321_v14 }
  0x7e   : > { %v1334_v16 = vor.u32 %v1333_v2, %v1330_v23 }
  0x7f   : > { %v1326_v54 = vsel %vm1210_vm3, %v1316_v7, %v1325_v27 }
  0x80   : > { %v1335_v31 = vsel %vm1210_vm3, %v1325_v27, %v1334_v16 }
  0x82   : > { %3076 = vmatmul.mubr.msk.bf16.gmra.mxu0 %vm510_vm1, %v1272_v33  ;;  %v1346_v33 = vshrl.u32 %v3214_v25, 16 }
  0x83   : > { %3126 = vmatmul.mubr.msk.bf16.gmra.mxu1 %vm510_vm1, %v1757_v37  ;;  %3079 = vmatprep.mubr.msk.bf16.mxu0 %vm510_vm1, %v1281_v38  ;;  %v1339_v37 = vrot.slane %v1337_v29, 1  ;;  %v1342_v38 = vrot.slane %v1340_v34, 2 }
  0x84   : > { %3129 = vmatprep.mubr.msk.bf16.mxu1 %vm510_vm1, %v1759_v41  ;;  %v1348_v55 = vrot.slane %v1346_v33, 1  ;;  %v1351_v41 = vrot.slane %v1349_v35, 2 }
  0x85   : > { %v1343_v44 = vor.u32 %v1342_v38, %v1339_v37 }
  0x86   : > { %v1352_v46 = vor.u32 %v1351_v41, %v1348_v55 }
  0x87   : > { %v1344_v48 = vsel %vm1210_vm3, %v1334_v16, %v1343_v44 }
  0x88   : > { %v1353_v50 = vsel %vm1210_vm3, %v1343_v44, %v1352_v46  ;;  %v1362_v53 = vsel %vm1210_vm3, %v1352_v46, %v3430_v43  ;;  %v1783_v43 = vsel %vm577_vm0, %v1780_v18, %v1782_v24 }
  0x8a   : > { %3080 = vmatmul.mubr.msk.bf16.gmra.mxu0 %vm510_vm1, %v1290_v52  ;;  %v1775_v52 = vsel %vm577_vm0, %v1772_v45, %v1774_v47 }
  0x8b   : > { %3130 = vmatmul.mubr.msk.bf16.gmra.mxu1 %vm510_vm1, %v1761_v58  ;;  %3083 = vmatprep.mubr.msk.bf16.mxu0 %vm510_vm1, %v1299_v59  ;;  %v1781_v58 = vsel %vm577_vm0, %v1778_v13, %v1780_v18 }
  0x8c   : > { %3133 = vmatprep.mubr.msk.bf16.mxu1 %vm510_vm1, %v1763_v63 }
  0x92   : > { %3084 = vmatmul.mubr.msk.bf16.gmra.mxu0 %vm510_vm1, %v1308_v11 }
  0x93   : > { %3134 = vmatmul.mubr.msk.bf16.gmra.mxu1 %vm510_vm1, %v1765_v21  ;;  %3087 = vmatprep.mubr.msk.bf16.mxu0 %vm510_vm1, %v1317_v22 }
  0x94   : > { %3137 = vmatprep.mubr.msk.bf16.mxu1 %vm510_vm1, %v1767_v26 }
  0x9a   : > { %3088 = vmatmul.mubr.msk.bf16.gmra.mxu0 %vm510_vm1, %v1326_v54 }
  0x9b   : > { %3138 = vmatmul.mubr.msk.bf16.gmra.mxu1 %vm510_vm1, %v1769_v40  ;;  %3091 = vmatprep.mubr.msk.bf16.mxu0 %vm510_vm1, %v1335_v31 }
  0x9c   : > { %3141 = vmatprep.mubr.msk.bf16.mxu1 %vm510_vm1, %v1771_v42 }
  0xa2   : > { %3092 = vmatmul.mubr.msk.bf16.gmra.mxu0 %vm510_vm1, %v1344_v48 }
  0xa3   : > { %3142 = vmatmul.mubr.msk.bf16.gmra.mxu1 %vm510_vm1, %v1773_v49  ;;  %3095 = vmatprep.mubr.msk.bf16.mxu0 %vm510_vm1, %v1353_v50 }
  0xa4   : > { %3145 = vmatprep.mubr.msk.bf16.mxu1 %vm510_vm1, %v1775_v52 }
  0xaa   : > { %3096 = vmatmul.mubr.msk.bf16.gmra.mxu0 %vm510_vm1, %v1362_v53 }
  0xab   : > { %3146 = vmatmul.mubr.msk.bf16.gmra.mxu1 %vm510_vm1, %v1777_v56  ;;  %3099 = vmatprep.mubr.msk.bf16.mxu0 %vm510_vm1, %v3438_v51 }
  0xac   : > { %3149 = vmatprep.mubr.msk.bf16.mxu1 %vm510_vm1, %v1779_v57 }
  0xb2   : > { %3100 = vmatmul.mubr.msk.bf16.gmra.mxu0 %vm510_vm1, %v3447_v20 }
  0xb3   : > { %3150 = vmatmul.mubr.msk.bf16.gmra.mxu1 %vm510_vm1, %v1781_v58  ;;  %3103 = vmatprep.mubr.msk.bf16.mxu0 %vm510_vm1, %v3452_v1 }
  0xb4   : > { %3153 = vmatprep.mubr.msk.bf16.mxu1 %vm510_vm1, %v1783_v43 }
  0xba   : > { %3104 = vmatmul.mubr.msk.bf16.gmra.mxu0 %vm510_vm1, %v3459_v9 }
  0xbb   : > { %3154 = vmatmul.mubr.msk.bf16.gmra.mxu1 %vm510_vm1, %v1782_v24  ;;  %3107 = vmatprep.mubr.msk.bf16.mxu0 %vm510_vm1, %v3464_v15 }
  0xc2   : > { %3108 = vmatmul.mubr.msk.bf16.gmra.mxu0 %vm510_vm1, %v3454_v4 }
  0xd3   : > { %v3023_v32 = vpop.f32.mrf.mxu1 }
  0xd5   : > { %v879_v39 = vpop.f32.mrf.mxu1 }
  0xd7   : > { %v3024_v51 = vpop.f32.mrf.mxu1 }
  0xd9   : > { %v882_v20 = vpop.f32.mrf.mxu1 }
  0xda   : > { %v2977_v59 = vpop.f32.mrf.mxu0 }
  0xdb   : > { %v3580_v60 = vadd.f32 %v3023_v32, %v2977_v59  ;;  %v3027_v1 = vpop.f32.mrf.mxu1 }
  0xdc   : > { %v615_v61 = vpop.f32.mrf.mxu0 }
  0xdd   : > { %v3582_v62 = vadd.f32 %v879_v39, %v615_v61  ;;  %v895_v9 = vpop.f32.mrf.mxu1 }
  0xde   : > { %v2978_v63 = vpop.f32.mrf.mxu0 }
  0xdf   : > { %v3584_v3 = vadd.f32 %v3024_v51, %v2978_v63  ;;  %v3028_v0 = vpop.f32.mrf.mxu1 }
  0xe0   : > { %v618_v15 = vpop.f32.mrf.mxu0 }
  0xe1   : > { %v3586_v28 = vadd.f32 %v882_v20, %v618_v15  ;;  %v898_v4 = vpop.f32.mrf.mxu1 }
  0xe2   : > { %v2981_v6 = vpop.f32.mrf.mxu0 }
  0xe3   : > { %v3588_v7 = vadd.f32 %v3027_v1, %v2981_v6  ;;  %v3031_v8 = vpop.f32.mrf.mxu1 }
  0xe4   : > { %v631_v5 = vpop.f32.mrf.mxu0 }
  0xe5   : > { %v3590_v10 = vadd.f32 %v895_v9, %v631_v5  ;;  %v911_v11 = vpop.f32.mrf.mxu1 }
  0xe6   : > { %v2982_v14 = vpop.f32.mrf.mxu0 }
  0xe7   : > { %v3592_v17 = vadd.f32 %v3028_v0, %v2982_v14  ;;  %v3032_v19 = vpop.f32.mrf.mxu1 }
  0xe8   : > { %v634_v21 = vpop.f32.mrf.mxu0 }
  0xe9   : > { %v3594_v22 = vadd.f32 %v898_v4, %v634_v21  ;;  %v914_v23 = vpop.f32.mrf.mxu1 }
  0xea   : > { %v2985_v2 = vpop.f32.mrf.mxu0 }
  0xeb   : > { %v3596_v25 = vadd.f32 %v3031_v8, %v2985_v2  ;;  %v3035_v26 = vpop.f32.mrf.mxu1 }
  0xec   : > { %v647_v27 = vpop.f32.mrf.mxu0 }
  0xed   : > { %v3598_v29 = vadd.f32 %v911_v11, %v647_v27  ;;  %v927_v34 = vpop.f32.mrf.mxu1 }
  0xee   : > { %v2986_v30 = vpop.f32.mrf.mxu0 }
  0xef   : > { %v3600_v16 = vadd.f32 %v3032_v19, %v2986_v30  ;;  %v3036_v33 = vpop.f32.mrf.mxu1 }
  0xf0   : > { %v650_v35 = vpop.f32.mrf.mxu0 }
  0xf1   : > { %v3602_v36 = vadd.f32 %v914_v23, %v650_v35  ;;  %v930_v54 = vpop.f32.mrf.mxu1 }
  0xf2   : > { %v2989_v37 = vpop.f32.mrf.mxu0 }
  0xf3   : > { %v3604_v38 = vadd.f32 %v3035_v26, %v2989_v37  ;;  %v3039_v40 = vpop.f32.mrf.mxu1 }
  0xf4   : > { %v663_v31 = vpop.f32.mrf.mxu0 }
  0xf5   : > { %v3606_v55 = vadd.f32 %v927_v34, %v663_v31  ;;  %v943_v41 = vpop.f32.mrf.mxu1 }
  0xf6   : > { %v2990_v42 = vpop.f32.mrf.mxu0 }
  0xf7   : > { %v3608_v44 = vadd.f32 %v3036_v33, %v2990_v42  ;;  %v3040_v45 = vpop.f32.mrf.mxu1 }
  0xf8   : > { %v666_v46 = vpop.f32.mrf.mxu0 }
  0xf9   : > { %v3610_v47 = vadd.f32 %v930_v54, %v666_v46  ;;  %v946_v48 = vpop.f32.mrf.mxu1 }
  0xfa   : > { %v2993_v49 = vpop.f32.mrf.mxu0 }
  0xfb   : > { %v3612_v50 = vadd.f32 %v3039_v40, %v2993_v49  ;;  %v3043_v52 = vpop.f32.mrf.mxu1 }
  0xfc   : > { %v679_v12 = vpop.f32.mrf.mxu0 }
  0xfd   : > { %v3614_v13 = vadd.f32 %v943_v41, %v679_v12  ;;  %v959_v53 = vpop.f32.mrf.mxu1 }
  0xfe   : > { %v2994_v56 = vpop.f32.mrf.mxu0 }
  0xff   : > { %v3616_v57 = vadd.f32 %v3040_v45, %v2994_v56  ;;  %v3044_v18 = vpop.f32.mrf.mxu1 }
 0x100   : > { %v682_v24 = vpop.f32.mrf.mxu0 }
 0x101   : > { %v3618_v58 = vadd.f32 %v946_v48, %v682_v24  ;;  %v962_v43 = vpop.f32.mrf.mxu1 }
 0x102   : > { %v2997_v32 = vpop.f32.mrf.mxu0 }
 0x103   : > { %v3620_v39 = vadd.f32 %v3043_v52, %v2997_v32  ;;  %v3047_v51 = vpop.f32.mrf.mxu1 }
 0x104   : > { %v695_v20 = vpop.f32.mrf.mxu0 }
 0x105   : > { %v3622_v59 = vadd.f32 %v959_v53, %v695_v20  ;;  %v975_v1 = vpop.f32.mrf.mxu1 }
 0x106   : > { %v2998_v61 = vpop.f32.mrf.mxu0 }
 0x107   : > { %v3624_v9 = vadd.f32 %v3044_v18, %v2998_v61  ;;  %v3048_v63 = vpop.f32.mrf.mxu1 }
 0x108   : > { %v698_v0 = vpop.f32.mrf.mxu0 }
 0x109   : > { %v3626_v15 = vadd.f32 %v962_v43, %v698_v0  ;;  %v978_v4 = vpop.f32.mrf.mxu1 }
 0x10a   : > { %v3001_v6 = vpop.f32.mrf.mxu0 }
 0x10b   : > { %v3628_v8 = vadd.f32 %v3047_v51, %v3001_v6  ;;  %v3051_v5 = vpop.f32.mrf.mxu1 }
 0x10c   : > { %v711_v11 = vpop.f32.mrf.mxu0 }
 0x10d   : > { %v3630_v14 = vadd.f32 %v975_v1, %v711_v11  ;;  %v991_v19 = vpop.f32.mrf.mxu1 }
 0x10e   : > { %v3002_v21 = vpop.f32.mrf.mxu0 }
 0x10f   : > { %v3632_v23 = vadd.f32 %v3048_v63, %v3002_v21  ;;  %v3052_v2 = vpop.f32.mrf.mxu1 }
 0x110   : > { %v714_v26 = vpop.f32.mrf.mxu0 }
 0x111   : > { %v3634_v27 = vadd.f32 %v978_v4, %v714_v26  ;;  %v994_v34 = vpop.f32.mrf.mxu1 }
 0x112   : > { %v3005_v30 = vpop.f32.mrf.mxu0 }
 0x113   : > { %v3636_v33 = vadd.f32 %v3051_v5, %v3005_v30  ;;  %v3055_v35 = vpop.f32.mrf.mxu1 }
 0x114   : > { %v727_v54 = vpop.f32.mrf.mxu0 }
 0x115   : > { %v3638_v37 = vadd.f32 %v991_v19, %v727_v54  ;;  %v1007_v40 = vpop.f32.mrf.mxu1 }
 0x116   : > { %v3006_v31 = vpop.f32.mrf.mxu0 }
 0x117   : > { %v3640_v41 = vadd.f32 %v3052_v2, %v3006_v31  ;;  %v3056_v42 = vpop.f32.mrf.mxu1 }
 0x118   : > { %v730_v45 = vpop.f32.mrf.mxu0 }
 0x119   : > { %v3642_v46 = vadd.f32 %v994_v34, %v730_v45  ;;  %v1010_v48 = vpop.f32.mrf.mxu1 }
 0x11a   : > { %v3009_v49 = vpop.f32.mrf.mxu0 }
 0x11b   : > { %v3644_v52 = vadd.f32 %v3055_v35, %v3009_v49  ;;  %v3059_v12 = vpop.f32.mrf.mxu1 }
 0x11c   : > { %v743_v53 = vpop.f32.mrf.mxu0 }
 0x11d   : > { %v3646_v56 = vadd.f32 %v1007_v40, %v743_v53  ;;  %v1023_v18 = vpop.f32.mrf.mxu1 }
 0x11e   : > { %v3010_v24 = vpop.f32.mrf.mxu0 }
 0x11f   : > { %v3648_v43 = vadd.f32 %v3056_v42, %v3010_v24  ;;  %v3060_v32 = vpop.f32.mrf.mxu1 }
 0x120   : > { %v746_v51 = vpop.f32.mrf.mxu0 }
 0x121   : > { %v3650_v20 = vadd.f32 %v1010_v48, %v746_v51  ;;  %v1026_v1 = vpop.f32.mrf.mxu1  ;;  %v3670_v51 = vld [vmem:[%s3790_s2] ss:$0 sm:$0xff] }
 0x122   : > { %v3013_v61 = vpop.f32.mrf.mxu0 }
 0x123   : > { %v3652_v63 = vadd.f32 %v3059_v12, %v3013_v61  ;;  %v3063_v0 = vpop.f32.mrf.mxu1 }
 0x124   : > { %v759_v4 = vpop.f32.mrf.mxu0 }
 0x125   : > { %v3654_v6 = vadd.f32 %v1023_v18, %v759_v4  ;;  %v1039_v5 = vpop.f32.mrf.mxu1 }
 0x126   : > { %v3014_v11 = vpop.f32.mrf.mxu0 }
 0x127   : > { %v3656_v19 = vadd.f32 %v3060_v32, %v3014_v11  ;;  %v3064_v21 = vpop.f32.mrf.mxu1 }
 0x128   : > { %v762_v2 = vpop.f32.mrf.mxu0 }
 0x129   : > { %v3658_v26 = vadd.f32 %v1026_v1, %v762_v2  ;;  %v1042_v34 = vpop.f32.mrf.mxu1 }
 0x12a   : > { %v3017_v30 = vpop.f32.mrf.mxu0 }
 0x12b   : > { %v3660_v35 = vadd.f32 %v3063_v0, %v3017_v30  ;;  %v3115_v54 = vpop.f32.mrf.mxu1 }
 0x12c   : > { %v775_v40 = vpop.f32.mrf.mxu0 }
 0x12d   : > { %3792 = vst [vmem:[#allocation2_spill] sm:$0xff] %v3660_v35  ;;  %v3662_v31 = vadd.f32 %v1039_v5, %v775_v40  ;;  %v1892_v42 = vpop.f32.mrf.mxu1 }
 0x12e   : > { %v3018_v45 = vpop.f32.mrf.mxu0 }
 0x12f   : > { %3793 = vst [vmem:[#allocation3_spill] sm:$0xff] %v3662_v31  ;;  %v3116_v48 = vpop.f32.mrf.mxu1 }
 0x130   : > { %v778_v49 = vpop.f32.mrf.mxu0 }
 0x131   : > { %v3664_v12 = vadd.f32 %v1042_v34, %v778_v49  ;;  %v1895_v53 = vpop.f32.mrf.mxu1 }
 0x132   : > { %v3069_v18 = vpop.f32.mrf.mxu0 }
 0x133   : > { %3794 = vst [vmem:[#allocation4_spill] sm:$0xff] %v3664_v12  ;;  %v1692_v24 = vadd.f32 %v3069_v18, %v3580_v60  ;;  %v3119_v32 = vpop.f32.mrf.mxu1 }
 0x134   : > { %v1516_v1 = vpop.f32.mrf.mxu0 }
 0x135   : > { %v2068_v61 = vadd.f32 %v3115_v54, %v1692_v24  ;;  %v1690_v0 = vadd.f32 %v1516_v1, %v3582_v62  ;;  %v1908_v4 = vpop.f32.mrf.mxu1 }
 0x136   : > { %v3070_v5 = vpop.f32.mrf.mxu0 }
 0x137   : > { %v2118_v11 = vadd.f32 %v3670_v51, %v2068_v61  ;;  %v2066_v21 = vadd.f32 %v1892_v42, %v1690_v0  ;;  %v1693_v2 = vadd.f32 %v3070_v5, %v3584_v3  ;;  %v3120_v34 = vpop.f32.mrf.mxu1 }
 0x138   : > { %v1519_v60 = vpop.f32.mrf.mxu0 }
 0x139   : > { %v2116_v30 = vadd.f32 %v3670_v51, %v2066_v21  ;;  %v2069_v40 = vadd.f32 %v3116_v48, %v1693_v2  ;;  %v1691_v45 = vadd.f32 %v1519_v60, %v3586_v28  ;;  %v1911_v49 = vpop.f32.mrf.mxu1  ;;  %v2161_v18 = vmul.f32 0.2, %v2118_v11 }
 0x13a   : > { %v3073_v54 = vpop.f32.mrf.mxu0 }
 0x13b   : > { %v2119_v62 = vadd.f32 %v3670_v51, %v2069_v40  ;;  %v2067_v24 = vadd.f32 %v1895_v53, %v1691_v45  ;;  %v3123_v1 = vpop.f32.mrf.mxu1  ;;  %v2159_v12 = vmul.f32 0.2, %v2116_v30  ;;  %v1696_v42 = vadd.f32 %v3073_v54, %v3588_v7 }
 0x13c   : > { %v1532_v61 = vpop.f32.mrf.mxu0  ;;  %v2204_v21 = vmax.f32 %v2118_v11, %v2161_v18 }
 0x13d   : > { %v2162_v3 = vmul.f32 0.2, %v2119_v62  ;;  %v2117_v0 = vadd.f32 %v3670_v51, %v2067_v24  ;;  %v1694_v5 = vadd.f32 %v1532_v61, %v3590_v10  ;;  %v1924_v48 = vpop.f32.mrf.mxu1  ;;  %v2072_v28 = vadd.f32 %v3119_v32, %v1696_v42 }
 0x13e   : > { %v3074_v2 = vpop.f32.mrf.mxu0  ;;  %v2202_v45 = vmax.f32 %v2116_v30, %v2159_v12 }
 0x13f   : > { %v2205_v60 = vmax.f32 %v2119_v62, %v2162_v3  ;;  %v2160_v31 = vmul.f32 0.2, %v2117_v0  ;;  %v2070_v35 = vadd.f32 %v1908_v4, %v1694_v5  ;;  %v1697_v53 = vadd.f32 %v3074_v2, %v3592_v17  ;;  %v3124_v40 = vpop.f32.mrf.mxu1 }
 0x140   : > { %v2122_v7 = vadd.f32 %v3670_v51, %v2072_v28  ;;  %v1535_v10 = vpop.f32.mrf.mxu0 }
 0x141   : > { %v2764_v11 = vpack.c.bf16 %v2205_v60, %v2204_v21  ;;  %v2203_v32 = vmax.f32 %v2117_v0, %v2160_v31  ;;  %v2120_v18 = vadd.f32 %v3670_v51, %v2070_v35  ;;  %v2073_v54 = vadd.f32 %v3120_v34, %v1697_v53  ;;  %v1927_v4 = vpop.f32.mrf.mxu1 }
 0x142   : > { %v2165_v62 = vmul.f32 0.2, %v2122_v7  ;;  %v1695_v17 = vadd.f32 %v1535_v10, %v3594_v22  ;;  %v3077_v12 = vpop.f32.mrf.mxu0 }
 0x143   : > { %2861 = vst [vmem:[%s3686_s4 + $0x8] sm:$0xff] %v2764_v11   ;;  %v2759_v30 = vpack.c.bf16 %v2203_v32, %v2202_v45  ;;  %v2123_v24 = vadd.f32 %v3670_v51, %v2073_v54  ;;  %v1700_v42 = vadd.f32 %v3077_v12, %v3596_v25  ;;  %v3127_v61 = vpop.f32.mrf.mxu1  ;;  %v2163_v21 = vmul.f32 0.2, %v2120_v18 }
 0x144   : > { %v2071_v3 = vadd.f32 %v1911_v49, %v1695_v17  ;;  %v1548_v5 = vpop.f32.mrf.mxu0  ;;  %v2208_v28 = vmax.f32 %v2122_v7, %v2165_v62 }
 0x145   : > { %2760 = vst [vmem:[%s3686_s4] sm:$0xff] %v2759_v30   ;;  %v2166_v31 = vmul.f32 0.2, %v2123_v24  ;;  %v2076_v0 = vadd.f32 %v3123_v1, %v1700_v42  ;;  %v1698_v35 = vadd.f32 %v1548_v5, %v3598_v29  ;;  %v1940_v34 = vpop.f32.mrf.mxu1  ;;  %v2206_v32 = vmax.f32 %v2120_v18, %v2163_v21 }
 0x146   : > { %v2121_v22 = vadd.f32 %v3670_v51, %v2071_v3  ;;  %v3078_v2 = vpop.f32.mrf.mxu0 }
 0x147   : > { %v2209_v60 = vmax.f32 %v2123_v24, %v2166_v31  ;;  %v2126_v53 = vadd.f32 %v3670_v51, %v2076_v0  ;;  %v2074_v45 = vadd.f32 %v1924_v48, %v1698_v35  ;;  %v1701_v25 = vadd.f32 %v3078_v2, %v3600_v16  ;;  %v3128_v49 = vpop.f32.mrf.mxu1 }
 0x148   : > { %v2164_v10 = vmul.f32 0.2, %v2121_v22  ;;  %v1551_v11 = vpop.f32.mrf.mxu0 }
 0x149   : > { %v2774_v54 = vpack.c.bf16 %v2209_v60, %v2208_v28  ;;  %v2077_v1 = vadd.f32 %v3124_v40, %v1701_v25  ;;  %v1943_v17 = vpop.f32.mrf.mxu1  ;;  %v2169_v7 = vmul.f32 0.2, %v2126_v53  ;;  %v2124_v62 = vadd.f32 %v3670_v51, %v2074_v45 }
 0x14a   : > { %v2207_v29 = vmax.f32 %v2121_v22, %v2164_v10  ;;  %v1699_v12 = vadd.f32 %v1551_v11, %v3602_v36  ;;  %v3081_v30 = vpop.f32.mrf.mxu0 }
 0x14b   : > { %2863 = vst [vmem:[%s3686_s4 + $0x18] sm:$0xff] %v2774_v54   ;;  %v2127_v48 = vadd.f32 %v3670_v51, %v2077_v1  ;;  %v1704_v16 = vadd.f32 %v3081_v30, %v3604_v38  ;;  %v3131_v24 = vpop.f32.mrf.mxu1  ;;  %v2212_v0 = vmax.f32 %v2126_v53, %v2169_v7  ;;  %v2167_v35 = vmul.f32 0.2, %v2124_v62 }
 0x14c   : > { %v2769_v42 = vpack.c.bf16 %v2207_v29, %v2206_v32  ;;  %v2075_v3 = vadd.f32 %v1927_v4, %v1699_v12  ;;  %v1564_v18 = vpop.f32.mrf.mxu0 }
 0x14d   : > { %v2170_v5 = vmul.f32 0.2, %v2127_v48  ;;  %v2080_v40 = vadd.f32 %v3127_v61, %v1704_v16  ;;  %v1702_v21 = vadd.f32 %v1564_v18, %v3606_v55  ;;  %v1956_v31 = vpop.f32.mrf.mxu1  ;;  %v2210_v53 = vmax.f32 %v2124_v62, %v2167_v35 }
 0x14e   : > { %2862 = vst [vmem:[%s3686_s4 + $0x10] sm:$0xff] %v2769_v42   ;;  %v2125_v36 = vadd.f32 %v3670_v51, %v2075_v3  ;;  %v3082_v28 = vpop.f32.mrf.mxu0 }
 0x14f   : > { %v2213_v22 = vmax.f32 %v2127_v48, %v2170_v5  ;;  %v2130_v2 = vadd.f32 %v3670_v51, %v2080_v40  ;;  %v2078_v38 = vadd.f32 %v1940_v34, %v1702_v21  ;;  %v1705_v60 = vadd.f32 %v3082_v28, %v3608_v44  ;;  %v3132_v4 = vpop.f32.mrf.mxu1 }
 0x150   : > { %v2168_v45 = vmul.f32 0.2, %v2125_v36  ;;  %v1567_v25 = vpop.f32.mrf.mxu0 }
 0x151   : > { %v2784_v61 = vpack.c.bf16 %v2213_v22, %v2212_v0  ;;  %v2128_v55 = vadd.f32 %v3670_v51, %v2078_v38  ;;  %v2081_v10 = vadd.f32 %v3128_v49, %v1705_v60  ;;  %v1959_v11 = vpop.f32.mrf.mxu1  ;;  %v2173_v54 = vmul.f32 0.2, %v2130_v2 }
 0x152   : > { %v2211_v32 = vmax.f32 %v2125_v36, %v2168_v45  ;;  %v1703_v1 = vadd.f32 %v1567_v25, %v3610_v47  ;;  %v3085_v29 = vpop.f32.mrf.mxu0 }
 0x153   : > { %2865 = vst [vmem:[%s3686_s4 + $0x28] sm:$0xff] %v2784_v61   ;;  %v2131_v34 = vadd.f32 %v3670_v51, %v2081_v10  ;;  %v1708_v44 = vadd.f32 %v3085_v29, %v3612_v50  ;;  %v3135_v7 = vpop.f32.mrf.mxu1  ;;  %v2171_v16 = vmul.f32 0.2, %v2128_v55  ;;  %v2216_v18 = vmax.f32 %v2130_v2, %v2173_v54 }
 0x154   : > { %v2779_v12 = vpack.c.bf16 %v2211_v32, %v2210_v53  ;;  %v2079_v30 = vadd.f32 %v1943_v17, %v1703_v1  ;;  %v1580_v48 = vpop.f32.mrf.mxu0 }
 0x155   : > { %v2174_v42 = vmul.f32 0.2, %v2131_v34  ;;  %v2084_v49 = vadd.f32 %v3131_v24, %v1708_v44  ;;  %v1706_v62 = vadd.f32 %v1580_v48, %v3614_v13  ;;  %v1972_v3 = vpop.f32.mrf.mxu1  ;;  %v2214_v28 = vmax.f32 %v2128_v55, %v2171_v16 }
 0x156   : > { %2864 = vst [vmem:[%s3686_s4 + $0x20] sm:$0xff] %v2779_v12   ;;  %v2129_v47 = vadd.f32 %v3670_v51, %v2079_v30  ;;  %v3086_v5 = vpop.f32.mrf.mxu0 }
 0x157   : > { %v2217_v40 = vmax.f32 %v2131_v34, %v2174_v42  ;;  %v2134_v21 = vadd.f32 %v3670_v51, %v2084_v49  ;;  %v2082_v50 = vadd.f32 %v1956_v31, %v1706_v62  ;;  %v1709_v0 = vadd.f32 %v3086_v5, %v3616_v57  ;;  %v3136_v17 = vpop.f32.mrf.mxu1 }
 0x158   : > { %v2172_v35 = vmul.f32 0.2, %v2129_v47  ;;  %v1583_v36 = vpop.f32.mrf.mxu0 }
 0x159   : > { %v2794_v24 = vpack.c.bf16 %v2217_v40, %v2216_v18  ;;  %v2085_v22 = vadd.f32 %v3132_v4, %v1709_v0  ;;  %v1975_v13 = vpop.f32.mrf.mxu1  ;;  %v2177_v2 = vmul.f32 0.2, %v2134_v21  ;;  %v2132_v60 = vadd.f32 %v3670_v51, %v2082_v50 }
 0x15a   : > { %v2215_v38 = vmax.f32 %v2129_v47, %v2172_v35  ;;  %v1707_v45 = vadd.f32 %v1583_v36, %v3618_v58  ;;  %v3089_v25 = vpop.f32.mrf.mxu0 }
 0x15b   : > { %2867 = vst [vmem:[%s3686_s4 + $0x38] sm:$0xff] %v2794_v24   ;;  %v2135_v31 = vadd.f32 %v3670_v51, %v2085_v22  ;;  %v1712_v57 = vadd.f32 %v3089_v25, %v3620_v39  ;;  %v3139_v61 = vpop.f32.mrf.mxu1  ;;  %v2220_v29 = vmax.f32 %v2134_v21, %v2177_v2  ;;  %v2175_v34 = vmul.f32 0.2, %v2132_v60 }
 0x15c   : > { %v2789_v10 = vpack.c.bf16 %v2215_v38, %v2214_v28  ;;  %v2083_v53 = vadd.f32 %v1959_v11, %v1707_v45  ;;  %v1596_v55 = vpop.f32.mrf.mxu0 }
 0x15d   : > { %v2178_v32 = vmul.f32 0.2, %v2135_v31  ;;  %v2088_v4 = vadd.f32 %v3135_v7, %v1712_v57  ;;  %v1710_v54 = vadd.f32 %v1596_v55, %v3622_v59  ;;  %v1988_v1 = vpop.f32.mrf.mxu1  ;;  %v2218_v18 = vmax.f32 %v2132_v60, %v2175_v34 }
 0x15e   : > { %2866 = vst [vmem:[%s3686_s4 + $0x30] sm:$0xff] %v2789_v10   ;;  %v2133_v58 = vadd.f32 %v3670_v51, %v2083_v53  ;;  %v3090_v44 = vpop.f32.mrf.mxu0 }
 0x15f   : > { %v2221_v12 = vmax.f32 %v2135_v31, %v2178_v32  ;;  %v2138_v30 = vadd.f32 %v3670_v51, %v2088_v4  ;;  %v2086_v39 = vadd.f32 %v1972_v3, %v1710_v54  ;;  %v1713_v48 = vadd.f32 %v3090_v44, %v3624_v9  ;;  %v3140_v11 = vpop.f32.mrf.mxu1 }
 0x160   : > { %v2176_v16 = vmul.f32 0.2, %v2133_v58  ;;  %v1599_v42 = vpop.f32.mrf.mxu0 }
 0x161   : > { %v2804_v7 = vpack.c.bf16 %v2221_v12, %v2220_v29  ;;  %v2136_v59 = vadd.f32 %v3670_v51, %v2086_v39  ;;  %v2089_v49 = vadd.f32 %v3136_v17, %v1713_v48  ;;  %v1991_v62 = vpop.f32.mrf.mxu1  ;;  %v2181_v5 = vmul.f32 0.2, %v2138_v30 }
 0x162   : > { %v2219_v47 = vmax.f32 %v2133_v58, %v2176_v16  ;;  %v1711_v40 = vadd.f32 %v1599_v42, %v3626_v15  ;;  %v3093_v21 = vpop.f32.mrf.mxu0 }
 0x163   : > { %2869 = vst [vmem:[%s3686_s4 + $0x48] sm:$0xff] %v2804_v7   ;;  %v2139_v3 = vadd.f32 %v3670_v51, %v2089_v49  ;;  %v1716_v9 = vadd.f32 %v3093_v21, %v3628_v8  ;;  %v3143_v50 = vpop.f32.mrf.mxu1  ;;  %v2179_v28 = vmul.f32 0.2, %v2136_v59  ;;  %v2224_v2 = vmax.f32 %v2138_v30, %v2181_v5 }
 0x164   : > { %v2799_v0 = vpack.c.bf16 %v2219_v47, %v2218_v18  ;;  %v2087_v35 = vadd.f32 %v1975_v13, %v1711_v40  ;;  %v1612_v36 = vpop.f32.mrf.mxu0 }
 0x165   : > { %v2182_v24 = vmul.f32 0.2, %v2139_v3  ;;  %v2092_v17 = vadd.f32 %v3139_v61, %v1716_v9  ;;  %v1714_v22 = vadd.f32 %v1612_v36, %v3630_v14  ;;  %v2004_v38 = vpop.f32.mrf.mxu1  ;;  %v2222_v53 = vmax.f32 %v2136_v59, %v2179_v28 }
 0x166   : > { %2868 = vst [vmem:[%s3686_s4 + $0x40] sm:$0xff] %v2799_v0   ;;  %v2137_v15 = vadd.f32 %v3670_v51, %v2087_v35  ;;  %v3094_v60 = vpop.f32.mrf.mxu0 }
 0x167   : > { %v2225_v45 = vmax.f32 %v2139_v3, %v2182_v24  ;;  %v2142_v25 = vadd.f32 %v3670_v51, %v2092_v17  ;;  %v2090_v8 = vadd.f32 %v1988_v1, %v1714_v22  ;;  %v1717_v31 = vadd.f32 %v3094_v60, %v3632_v23  ;;  %v3144_v13 = vpop.f32.mrf.mxu1 }
 0x168   : > { %v2180_v57 = vmul.f32 0.2, %v2137_v15  ;;  %v1615_v10 = vpop.f32.mrf.mxu0 }
 0x169   : > { %v2814_v61 = vpack.c.bf16 %v2225_v45, %v2224_v2  ;;  %v2093_v55 = vadd.f32 %v3140_v11, %v1717_v31  ;;  %v2007_v14 = vpop.f32.mrf.mxu1  ;;  %v2185_v4 = vmul.f32 0.2, %v2142_v25  ;;  %v2140_v54 = vadd.f32 %v3670_v51, %v2090_v8 }
 0x16a   : > { %v2223_v32 = vmax.f32 %v2137_v15, %v2180_v57  ;;  %v1715_v29 = vadd.f32 %v1615_v10, %v3634_v27  ;;  %v3097_v34 = vpop.f32.mrf.mxu0 }
 0x16b   : > { %2871 = vst [vmem:[%s3686_s4 + $0x58] sm:$0xff] %v2814_v61   ;;  %v2143_v1 = vadd.f32 %v3670_v51, %v2093_v55  ;;  %v1720_v23 = vadd.f32 %v3097_v34, %v3636_v33  ;;  %v3147_v58 = vpop.f32.mrf.mxu1  ;;  %v2228_v42 = vmax.f32 %v2142_v25, %v2185_v4  ;;  %v2183_v7 = vmul.f32 0.2, %v2140_v54 }
 0x16c   : > { %v2809_v44 = vpack.c.bf16 %v2223_v32, %v2222_v53  ;;  %v2091_v12 = vadd.f32 %v1991_v62, %v1715_v29  ;;  %v1628_v30 = vpop.f32.mrf.mxu0 }
 0x16d   : > { %v2186_v39 = vmul.f32 0.2, %v2143_v1  ;;  %v2096_v48 = vadd.f32 %v3143_v50, %v1720_v23  ;;  %v1718_v11 = vadd.f32 %v1628_v30, %v3638_v37  ;;  %v2020_v16 = vpop.f32.mrf.mxu1  ;;  %v2226_v50 = vmax.f32 %v2140_v54, %v2183_v7 }
 0x16e   : > { %2870 = vst [vmem:[%s3686_s4 + $0x50] sm:$0xff] %v2809_v44   ;;  %v2141_v27 = vadd.f32 %v3670_v51, %v2091_v12  ;;  %v3098_v59 = vpop.f32.mrf.mxu0 }
 0x16f   : > { %v2229_v49 = vmax.f32 %v2143_v1, %v2186_v39  ;;  %v2146_v18 = vadd.f32 %v3670_v51, %v2096_v48  ;;  %v2094_v33 = vadd.f32 %v2004_v38, %v1718_v11  ;;  %v1721_v47 = vadd.f32 %v3098_v59, %v3640_v41  ;;  %v3148_v62 = vpop.f32.mrf.mxu1 }
 0x170   : > { %v2184_v5 = vmul.f32 0.2, %v2141_v27  ;;  %v1631_v40 = vpop.f32.mrf.mxu0 }
 0x171   : > { %v2824_v21 = vpack.c.bf16 %v2229_v49, %v2228_v42  ;;  %v2144_v37 = vadd.f32 %v3670_v51, %v2094_v33  ;;  %v2097_v3 = vadd.f32 %v3144_v13, %v1721_v47  ;;  %v2023_v9 = vpop.f32.mrf.mxu1  ;;  %v2189_v35 = vmul.f32 0.2, %v2146_v18 }
 0x172   : > { %v2227_v0 = vmax.f32 %v2141_v27, %v2184_v5  ;;  %v1719_v36 = vadd.f32 %v1631_v40, %v3642_v46  ;;  %v3101_v28 = vpop.f32.mrf.mxu0 }
 0x173   : > { %2873 = vst [vmem:[%s3686_s4 + $0x68] sm:$0xff] %v2824_v21   ;;  %v2147_v24 = vadd.f32 %v3670_v51, %v2097_v3  ;;  %v1724_v41 = vadd.f32 %v3101_v28, %v3644_v52  ;;  %v3151_v17 = vpop.f32.mrf.mxu1  ;;  %v2187_v15 = vmul.f32 0.2, %v2144_v37  ;;  %v2232_v31 = vmax.f32 %v2146_v18, %v2189_v35  ;;  %v3795_v28 = vld [vmem:[#allocation2_spill] sm:$0xff] }
 0x174   : > { %v2819_v22 = vpack.c.bf16 %v2227_v0, %v2226_v50  ;;  %v2095_v38 = vadd.f32 %v2007_v14, %v1719_v36  ;;  %v1644_v2 = vpop.f32.mrf.mxu0 }
 0x175   : > { %v2190_v60 = vmul.f32 0.2, %v2147_v24  ;;  %v2100_v45 = vadd.f32 %v3147_v58, %v1724_v41  ;;  %v1722_v25 = vadd.f32 %v1644_v2, %v3646_v56  ;;  %v2036_v8 = vpop.f32.mrf.mxu1  ;;  %v2230_v32 = vmax.f32 %v2144_v37, %v2187_v15  ;;  %v3796_v2 = vld [vmem:[#allocation3_spill] sm:$0xff] }
 0x176   : > { %2872 = vst [vmem:[%s3686_s4 + $0x60] sm:$0xff] %v2819_v22   ;;  %v2145_v46 = vadd.f32 %v3670_v51, %v2095_v38  ;;  %v3102_v13 = vpop.f32.mrf.mxu0 }
 0x177   : > { %v2233_v57 = vmax.f32 %v2147_v24, %v2190_v60  ;;  %v2150_v10 = vadd.f32 %v3670_v51, %v2100_v45  ;;  %v2098_v52 = vadd.f32 %v2020_v16, %v1722_v25  ;;  %v1725_v53 = vadd.f32 %v3102_v13, %v3648_v43  ;;  %v3152_v61 = vpop.f32.mrf.mxu1 }
 0x178   : > { %v2188_v55 = vmul.f32 0.2, %v2145_v46  ;;  %v1647_v14 = vpop.f32.mrf.mxu0 }
 0x179   : > { %v2834_v4 = vpack.c.bf16 %v2233_v57, %v2232_v31  ;;  %v2101_v54 = vadd.f32 %v3148_v62, %v1725_v53  ;;  %v2039_v56 = vpop.f32.mrf.mxu1  ;;  %v2193_v34 = vmul.f32 0.2, %v2150_v10  ;;  %v2148_v1 = vadd.f32 %v3670_v51, %v2098_v52 }
 0x17a   : > { %v2231_v29 = vmax.f32 %v2145_v46, %v2188_v55  ;;  %v1723_v23 = vadd.f32 %v1647_v14, %v3650_v20  ;;  %v3105_v58 = vpop.f32.mrf.mxu0 }
 0x17b   : > { %2875 = vst [vmem:[%s3686_s4 + $0x78] sm:$0xff] %v2834_v4   ;;  %v2151_v44 = vadd.f32 %v3670_v51, %v2101_v54  ;;  %v1728_v43 = vadd.f32 %v3105_v58, %v3652_v63  ;;  %v3155_v12 = vpop.f32.mrf.mxu1  ;;  %v2236_v27 = vmax.f32 %v2150_v10, %v2193_v34  ;;  %v2191_v59 = vmul.f32 0.2, %v2148_v1 }
 0x17c   : > { %v2829_v30 = vpack.c.bf16 %v2231_v29, %v2230_v32  ;;  %v2099_v39 = vadd.f32 %v2023_v9, %v1723_v23  ;;  %v1660_v48 = vpop.f32.mrf.mxu0 }
 0x17d   : > { %v2194_v11 = vmul.f32 0.2, %v2151_v44  ;;  %v2104_v16 = vadd.f32 %v3151_v17, %v1728_v43  ;;  %v1726_v42 = vadd.f32 %v1660_v48, %v3654_v6  ;;  %v2052_v7 = vpop.f32.mrf.mxu1  ;;  %v2234_v6 = vmax.f32 %v2148_v1, %v2191_v59 }
 0x17e   : > { %2874 = vst [vmem:[%s3686_s4 + $0x70] sm:$0xff] %v2829_v30   ;;  %v2149_v20 = vadd.f32 %v3670_v51, %v2099_v39  ;;  %v3106_v49 = vpop.f32.mrf.mxu0 }
 0x17f   : > { %v2237_v18 = vmax.f32 %v2151_v44, %v2194_v11  ;;  %v2154_v33 = vadd.f32 %v3670_v51, %v2104_v16  ;;  %v2102_v63 = vadd.f32 %v2036_v8, %v1726_v42  ;;  %v1729_v47 = vadd.f32 %v3106_v49, %v3656_v19  ;;  %v3156_v62 = vpop.f32.mrf.mxu1 }
 0x180   : > { %v2192_v5 = vmul.f32 0.2, %v2149_v20  ;;  %v1663_v40 = vpop.f32.mrf.mxu0 }
 0x181   : > { %v2844_v21 = vpack.c.bf16 %v2237_v18, %v2236_v27  ;;  %v2105_v37 = vadd.f32 %v3152_v61, %v1729_v47  ;;  %v2152_v9 = vadd.f32 %v3670_v51, %v2102_v63  ;;  %v1727_v50 = vadd.f32 %v1663_v40, %v3658_v26  ;;  %v3797_v61 = vld [vmem:[#allocation4_spill] sm:$0xff]  ;;  %v2055_v4 = vpop.f32.mrf.mxu1 }
 0x182   : > { %v2235_v3 = vmax.f32 %v2149_v20, %v2192_v5  ;;  %v3109_v0 = vpop.f32.mrf.mxu0  ;;  %v2197_v35 = vmul.f32 0.2, %v2154_v33 }
 0x183   : > { %2877 = vst [vmem:[%s3686_s4 + $0x88] sm:$0xff] %v2844_v21   ;;  %v2155_v36 = vadd.f32 %v3670_v51, %v2105_v37  ;;  %v1732_v24 = vadd.f32 %v3109_v0, %v3795_v28  ;;  %v2103_v41 = vadd.f32 %v2039_v56, %v1727_v50  ;;  %v2195_v60 = vmul.f32 0.2, %v2152_v9 }
 0x184   : > { %v2839_v19 = vpack.c.bf16 %v2235_v3, %v2234_v6  ;;  %v1676_v17 = vpop.f32.mrf.mxu0  ;;  %v2240_v25 = vmax.f32 %v2154_v33, %v2197_v35 }
 0x185   : > { %v2198_v22 = vmul.f32 0.2, %v2155_v36  ;;  %v2108_v38 = vadd.f32 %v3155_v12, %v1732_v24  ;;  %v1730_v15 = vadd.f32 %v1676_v17, %v3796_v2  ;;  %v2153_v45 = vadd.f32 %v3670_v51, %v2103_v41 }
 0x186   : > { %2876 = vst [vmem:[%s3686_s4 + $0x80] sm:$0xff] %v2839_v19   ;;  %v3110_v26 = vpop.f32.mrf.mxu0  ;;  %v2238_v14 = vmax.f32 %v2152_v9, %v2195_v60 }
 0x187   : > { %v2241_v8 = vmax.f32 %v2155_v36, %v2198_v22  ;;  %v2158_v31 = vadd.f32 %v3670_v51, %v2108_v38  ;;  %v2106_v46 = vadd.f32 %v2052_v7, %v1730_v15  ;;  %v2196_v13 = vmul.f32 0.2, %v2153_v45 }
 0x188   : > { %v1679_v57 = vpop.f32.mrf.mxu0 }
 0x189   : > { %v2854_v10 = vpack.c.bf16 %v2241_v8, %v2240_v25  ;;  %v2201_v52 = vmul.f32 0.2, %v2158_v31  ;;  %v2156_v53 = vadd.f32 %v3670_v51, %v2106_v46  ;;  %v1731_v55 = vadd.f32 %v1679_v57, %v3797_v61 }
 0x18a   : > { %v2239_v32 = vmax.f32 %v2153_v45, %v2196_v13 }
 0x18b   : > { %2879 = vst [vmem:[%s3686_s4 + $0x98] sm:$0xff] %v2854_v10   ;;  %v2244_v54 = vmax.f32 %v2158_v31, %v2201_v52  ;;  %v2107_v56 = vadd.f32 %v2055_v4, %v1731_v55  ;;  %v2199_v1 = vmul.f32 0.2, %v2156_v53 }
 0x18c   : > { %v2849_v29 = vpack.c.bf16 %v2239_v32, %v2238_v14 }
 0x18d   : > { %v2755_v34 = vpack.c.bf16 %v2244_v54, %v2244_v54  ;;  %v2157_v23 = vadd.f32 %v3670_v51, %v2107_v56  ;;  %v2242_v44 = vmax.f32 %v2156_v53, %v2199_v1 }
 0x18e   : > { %2878 = vst [vmem:[%s3686_s4 + $0x90] sm:$0xff] %v2849_v29  }
 0x18f   : > { %2460 = vst [vmem:[%s3686_s4 + $0xa8] sm:$0x7] %v2755_v34  ;;  %v2200_v58 = vmul.f32 0.2, %v2157_v23 }
 0x191   : > { %v2243_v43 = vmax.f32 %v2157_v23, %v2200_v58 }
 0x193   : > { %v2859_v12 = vpack.c.bf16 %v2243_v43, %v2242_v44 }
 0x195   : > { %2880 = vst [vmem:[%s3686_s4 + $0xa0] sm:$0xff] %v2859_v12  }
 0x196 PF: > { %s13_s12 = sadd.s32 1, %s3227_s12  }
 0x197   : > { %p10_p4 = scmp.ge.s32.totalorder %s13_s12, 4  }
 0x199   :  { %12 = sbr.rel (!%p10_p4) target bundleno = 1 (0x1), region = 65 }

// kernel: colormap_discriminator_forward.7
= control target key start
LH: loop header
LB: loop body
LE: loop exit
PB: predicated region body
PF: predicated region fallthrough
CT: control target
= control target key end

     0   :  { %s460_s19 = smov 0   ;;  %s508_s0 = inlined_call_operand.vmem [shape: bf16[2,12,128], index: 0, kind: input, shape index: {}]   ;;  %s509_s1 = inlined_call_operand.<no memory space> [shape: f32[1,1,1], index: 1, kind: input, shape index: {}]   ;;  %s510_s2 = inlined_call_operand.vmem [shape: f32[9,1,128], index: 2, kind: input, shape index: {}]   ;;  %s511_s4 = inlined_call_operand.vmem [shape: f32[2,1,1], index: 4, kind: output, shape index: {}]   ;;  %s512_s3 = inlined_call_operand.<no memory space> [shape: f32[1,1,1], index: 3, kind: input, shape index: {}]  }
   0x1   :  { %v9_v0 = vstv %s509_s1  ;;  %v11_v1 = vstv %s512_s3 }
   0x2   :  { %10 = vst [vmem:[#allocation2] sm:$0x1] %v9_v0  ;;  %12 = vst [vmem:[#allocation3] sm:$0x1] %v11_v1 }
   0x3 LB: > { %s385_s20 = sadd.s32 4294967295, %s426_s19   ;;  %p389_p0 = scmp.ge.s32.totalorder %s426_s19, 1  ;;  %s426_s19 = sphi %s460_s19, %s18_s19  }
   0x4   : > { %p166_p1 = scmp.lt.s32.totalorder %s426_s19, 3 }
   0x6   : > { %p167_p2 = pnand %p389_p0, %p166_p1 }
   0x7   : > { %p190_p3 = scmp.lt.s32.totalorder (!%p167_p2), %s385_s20, 1 }
   0x8   : > { %170 = sbr.rel (%p167_p2) target bundleno = 305 (0x131), region = 36 }
   0xd   : > { %v198_v2 = vld [vmem:[#allocation2] sm:$0x1]  ;;  %v428_v3 = vmov 0   ;;  %s514_s20 = smov (!%p190_p3, %s385_s20), 1  ;;  %v206_v4 = vlaneseq  ;;  %v393_v16 = vld [vmem:[%s510_s2 + $0x1] ss:$0 sm:$0xff] }
   0xe   : > { %419 = vset.pattern.permute.xlu0 %v428_v3  ;;  %s409_s1 = sshll.u32 %s514_s20, 3  ;;  %v395_v17 = vld [vmem:[%s510_s2 + $0x2] ss:$0 sm:$0xff]  ;;  %v212_v23 = vld [vmem:[%s510_s2] sm:$0x1]  ;;  %vm330_vm0 = vcmask 1040384   ;;  %s197_s17 = scalar_lea.vmem %s511_s4, %s514_s20 }
   0xf   : > { %203 = vperm.xlu0 %419, %v198_v2   ;;  %v207_v5 = vshrl.u32 %v206_v4, 7  ;;  %s194_s22 = scalar_lea.vmem %s508_s0, %s409_s1  ;;  %v397_v24 = vld [vmem:[%s510_s2 + $0x3] ss:$0 sm:$0xff]  ;;  %v399_v27 = vld [vmem:[%s510_s2 + $0x4] ss:$0 sm:$0xff]  ;;  %vm336_vm1 = vcmask 0  }
  0x10   : > { %v199_v6 = vld [vmem:[%s194_s22] sm:$0x1]  ;;  %v228_v7 = vld [vmem:[%s194_s22] sm:$0x2]  ;;  %v245_v8 = vld [vmem:[%s194_s22] sm:$0x4] }
  0x11   : > { %v208_v9 = vsub.s32 0, %v207_v5  ;;  %v200_v10 = vunpack.c.l.bf16 %v199_v6  ;;  %v229_v11 = vunpack.c.l.bf16 %v228_v7  ;;  %v246_v12 = vunpack.c.l.bf16 %v245_v8  ;;  %v275_v14 = vld [vmem:[%s194_s22] sm:$0x8]  ;;  %v292_v22 = vld [vmem:[%s194_s22 + $0x4] sm:$0x1] }
  0x12   : > { %v276_v21 = vunpack.c.l.bf16 %v275_v14  ;;  %v293_v28 = vunpack.c.l.bf16 %v292_v22  ;;  %v313_v29 = vld [vmem:[%s194_s22 + $0x4] sm:$0x2]  ;;  %v404_v43 = vld [vmem:[%s510_s2 + $0x7] ss:$0 sm:$0xff]  ;;  %v402_v47 = vld [vmem:[%s510_s2 + $0x6] sm:$0x1] }
  0x13   : > { %v401_v34 = vld [vmem:[%s510_s2 + $0x5] ss:$0 sm:$0xff]  ;;  %v314_v38 = vunpack.c.l.bf16 %v313_v29  ;;  %v406_v48 = vld [vmem:[%s510_s2 + $0x8] ss:$0 sm:$0xff]  ;;  %v334_v61 = vld [vmem:[#allocation3] sm:$0x1] }
  0x8a   : > { %v204_v13 = vpop.permute.xlu0 %203 }
  0x8b   : > { %v209_v15 = vrot.slane %v204_v13, %v208_v9 }
  0x8d   : > { %v210_v18 = vmul.f32 %v209_v15, %v200_v10  ;;  %v230_v19 = vmul.f32 %v229_v11, %v209_v15  ;;  %v247_v20 = vmul.f32 %v246_v12, %v209_v15  ;;  %v277_v33 = vmul.f32 %v276_v21, %v209_v15 }
  0x8e   : > { %v294_v42 = vmul.f32 %v293_v28, %v209_v15  ;;  %v315_v46 = vmul.f32 %v314_v38, %v209_v15 }
  0x8f   : > { %v223_v25 = vmul.f32 %v393_v16, %v210_v18  ;;  %v240_v26 = vmul.f32 %v395_v17, %v230_v19  ;;  %v213_v30 = vmul.f32 %v212_v23, %v210_v18  ;;  %v257_v32 = vmul.f32 %v397_v24, %v247_v20 }
  0x90   : > { %v270_v37 = vmul.f32 %v399_v27, %v247_v20  ;;  %v287_v41 = vmul.f32 %v401_v34, %v277_v33  ;;  %v308_v51 = vmul.f32 %v404_v43, %v294_v42  ;;  %v298_v53 = vmul.f32 %v402_v47, %v294_v42 }
  0x91   : > { %v225_v31 = vrot.slane %v223_v25, 1  ;;  %v242_v36 = vrot.slane %v240_v26, 2  ;;  %v259_v40 = vrot.slane %v257_v32, 4  ;;  %v325_v54 = vmul.f32 %v406_v48, %v315_v46 }
  0x92   : > { %v272_v45 = vrot.slane %v270_v37, 5  ;;  %v289_v50 = vrot.slane %v287_v41, 6  ;;  %v310_v56 = vrot.slane %v308_v51, 1 }
  0x93   : > { %v227_v35 = vadd.f32 %v225_v31, %v213_v30  ;;  %v327_v58 = vrot.slane %v325_v54, 2 }
  0x95   : > { %v244_v39 = vadd.f32 %v242_v36, %v227_v35 }
  0x97   : > { %v261_v44 = vadd.f32 %v259_v40, %v244_v39 }
  0x99   : > { %v274_v49 = vadd.f32 %v272_v45, %v261_v44 }
  0x9b   : > { %v291_v52 = vadd.f32 %v289_v50, %v274_v49 }
  0x9d   : > { %v299_v55 = vadd.f32 %v298_v53, %v291_v52 }
  0x9f   : > { %v312_v57 = vadd.f32 %v310_v56, %v299_v55 }
  0xa1   : > { %v329_v59 = vadd.f32 %v327_v58, %v312_v57 }
  0xa3   : > { %v331_v60 = vsel %vm330_vm0, %v329_v59, 0.0 }
  0xa4   : > { %332 = vadd.xlane.f32.xlu0 %v331_v60 }
 0x12d   : > { %v333_v62 = vpop.xlane.xlu0 %332 }
 0x12e   : > { %v335_v63 = vadd.f32 %v334_v61, %v333_v62 }
 0x130   : > { %337 = vst.msk [vmem:[%s197_s17] sm:$0x1] %vm336_vm1, %v335_v63 }
 0x131 PF: > { %s18_s19 = sadd.s32 1, %s426_s19  }
 0x132   : > { %p15_p4 = scmp.ge.s32.totalorder %s18_s19, 4  }
 0x134   :  { %17 = sbr.rel (!%p15_p4) target bundleno = 3 (0x3), region = 74 }

// kernel: colormap_discriminator_forward.5
= control target key start
LH: loop header
LB: loop body
LE: loop exit
PB: predicated region body
PF: predicated region fallthrough
CT: control target
= control target key end

     0   :  { %s3748_s15 = smov 0   ;;  %s4788_s0 = inlined_call_operand.vmem [shape: bf16[2,82,512], index: 0, kind: input, shape index: {}]   ;;  %s4789_s1 = inlined_call_operand.vmem [shape: bf16[4,512,128], index: 1, kind: input, shape index: {}]   ;;  %s4790_s2 = inlined_call_operand.vmem [shape: f32[1,128], index: 2, kind: input, shape index: {}]   ;;  %s4791_s3 = inlined_call_operand.vmem [shape: f32[1,72,1], index: 3, kind: input, shape index: {}]   ;;  %s4792_s4 = inlined_call_operand.vmem [shape: bf16[2,72,128], index: 4, kind: output, shape index: {}]  }
   0x1 LB: > { %s2732_s16 = sadd.s32 4294967295, %s3720_s15   ;;  %p2736_p0 = scmp.ge.s32.totalorder %s3720_s15, 1  ;;  %s3720_s15 = sphi %s3748_s15, %s14_s15  }
   0x2   : > { %p162_p1 = scmp.lt.s32.totalorder %s3720_s15, 3 }
   0x4   : > { %p163_p2 = pnand %p2736_p0, %p162_p1 }
   0x5   : > { %p188_p3 = scmp.lt.s32.totalorder (!%p163_p2), %s2732_s16, 1 }
   0x6   : > { %166 = sbr.rel (%p163_p2) target bundleno = 483 (0x1e3), region = 36 }
   0xb   : > { %v3532_v0 = vld [vmem:[%s4789_s1 + $0x178] sm:$0xff]   ;;  %v3536_v4 = vld [vmem:[%s4789_s1 + $0x170] sm:$0xff]   ;;  %v3540_v8 = vld [vmem:[%s4789_s1 + $0x168] sm:$0xff]   ;;  %s4794_s16 = smov (!%p188_p3, %s2732_s16), 1  ;;  %vm428_vm0 = vsmask.f32 7424 }
   0xc   : > { %v3533_v1 = vld [vmem:[%s4789_s1 + $0x1f8] sm:$0xff]   ;;  %3151 = vmatprep.subr.bf16.mxu0 %v3532_v0  ;;  %v3537_v5 = vld [vmem:[%s4789_s1 + $0x1f0] sm:$0xff]   ;;  %v3541_v9 = vld [vmem:[%s4789_s1 + $0x1e8] sm:$0xff]   ;;  %s3519_s21 = smul.u32 176, %s4794_s16  ;;  %vm2064_vm1 = vcmask 1046528  }
   0xd   : > { %v3534_v2 = vld [vmem:[%s4789_s1 + $0x138] sm:$0xff]   ;;  %3197 = vmatprep.subr.bf16.mxu1 %v3533_v1  ;;  %v3538_v6 = vld [vmem:[%s4789_s1 + $0x130] sm:$0xff]   ;;  %v3542_v10 = vld [vmem:[%s4789_s1 + $0x128] sm:$0xff]   ;;  %s3520_s17 = smul.u32 36, %s4794_s16 }
   0xe   : > { %v3535_v3 = vld [vmem:[%s4789_s1 + $0x1b8] sm:$0xff]   ;;  %3152 = vmatpush3.bf16.msra.mxu0 %v3534_v2  ;;  %v3539_v7 = vld [vmem:[%s4789_s1 + $0x1b0] sm:$0xff]   ;;  %v3543_v11 = vld [vmem:[%s4789_s1 + $0x1a8] sm:$0xff]   ;;  %s3856_s6 = scalar_lea.vmem %s4788_s0, %s3519_s21 }
   0xf   : > { %3198 = vmatpush3.bf16.msra.mxu1 %v3535_v3  ;;  %3153 = vmatprep.subr.bf16.mxu0 %v3536_v4  ;;  %v3544_v12 = vld [vmem:[%s4789_s1 + $0x160] sm:$0xff]   ;;  %v3548_v16 = vld [vmem:[%s4789_s1 + $0x158] sm:$0xff]   ;;  %v3552_v20 = vld [vmem:[%s4789_s1 + $0x150] sm:$0xff]   ;;  %s197_s19 = scalar_lea.vmem %s4792_s4, %s3520_s17 }
  0x10   : > { %3199 = vmatprep.subr.bf16.mxu1 %v3537_v5  ;;  %v3545_v13 = vld [vmem:[%s4789_s1 + $0x1e0] sm:$0xff]   ;;  %v3549_v17 = vld [vmem:[%s4789_s1 + $0x1d8] sm:$0xff]   ;;  %v3553_v21 = vld [vmem:[%s4789_s1 + $0x1d0] sm:$0xff]  }
  0x11   : > { %v3546_v14 = vld [vmem:[%s4789_s1 + $0x120] sm:$0xff]   ;;  %v3550_v18 = vld [vmem:[%s4789_s1 + $0x118] sm:$0xff]   ;;  %v3554_v22 = vld [vmem:[%s4789_s1 + $0x110] sm:$0xff]  }
  0x12   : > { %3154 = vmatpush3.bf16.msra.mxu0 %v3538_v6  ;;  %v3547_v15 = vld [vmem:[%s4789_s1 + $0x1a0] sm:$0xff]   ;;  %v3551_v19 = vld [vmem:[%s4789_s1 + $0x198] sm:$0xff]   ;;  %v3555_v23 = vld [vmem:[%s4789_s1 + $0x190] sm:$0xff]  }
  0x13   : > { %3200 = vmatpush3.bf16.msra.mxu1 %v3539_v7  ;;  %3155 = vmatprep.subr.bf16.mxu0 %v3540_v8  ;;  %v3556_v24 = vld [vmem:[%s4789_s1 + $0x148] sm:$0xff]   ;;  %v3560_v28 = vld [vmem:[%s4789_s1 + $0x140] sm:$0xff]   ;;  %v3866_v33 = vld [vmem:[%s3856_s6 + $0x10] sm:$0xff] }
  0x14   : > { %3201 = vmatprep.subr.bf16.mxu1 %v3541_v9  ;;  %v3557_v25 = vld [vmem:[%s4789_s1 + $0x1c8] sm:$0xff]   ;;  %v3561_v29 = vld [vmem:[%s4789_s1 + $0x1c0] sm:$0xff]   ;;  %v3872_v35 = vld [vmem:[%s3856_s6 + $0x30] sm:$0xff] }
  0x15   : > { %v3558_v26 = vld [vmem:[%s4789_s1 + $0x108] sm:$0xff]   ;;  %v3562_v30 = vld [vmem:[%s4789_s1 + $0x100] sm:$0xff]   ;;  %v3879_v38 = vld [vmem:[%s3856_s6 + $0x18] sm:$0xff] }
  0x16   : > { %3156 = vmatpush3.bf16.msra.mxu0 %v3542_v10  ;;  %v3559_v27 = vld [vmem:[%s4789_s1 + $0x188] sm:$0xff]   ;;  %v3563_v31 = vld [vmem:[%s4789_s1 + $0x180] sm:$0xff]   ;;  %v3892_v42 = vld [vmem:[%s3856_s6 + $0x38] sm:$0xff] }
  0x17   : > { %3202 = vmatpush3.bf16.msra.mxu1 %v3543_v11  ;;  %3157 = vmatprep.subr.bf16.mxu0 %v3544_v12  ;;  %v199_v32 = vld [vmem:[%s3856_s6] sm:$0xff]  ;;  %v200_v37 = vld [vmem:[%s3856_s6 + $0x8] sm:$0xff]  ;;  %v3572_v50 = vld [vmem:[%s4789_s1 + $0x78] sm:$0xff]  }
  0x18   : > { %3203 = vmatprep.subr.bf16.mxu1 %v3545_v13  ;;  %v3869_v34 = vld [vmem:[%s3856_s6 + $0x20] sm:$0xff]  ;;  %v3875_v36 = vcombine.high %v199_v32, %v3866_v33  ;;  %v3882_v39 = vcombine.low %v199_v32, %v3866_v33  ;;  %v3889_v41 = vld [vmem:[%s3856_s6 + $0x28] sm:$0xff]  ;;  %v3895_v43 = vcombine.high %v200_v37, %v3879_v38  ;;  %v3902_v45 = vcombine.low %v200_v37, %v3879_v38  ;;  %v3573_v59 = vld [vmem:[%s4789_s1 + $0xf8] sm:$0xff]  }
  0x19   : > { %v3886_v40 = vcombine.high %v3869_v34, %v3872_v35  ;;  %v3899_v44 = vcombine.low %v3869_v34, %v3872_v35  ;;  %v3908_v48 = vcombine.high %v3889_v41, %v3892_v42  ;;  %v3922_v58 = vcombine.low %v3889_v41, %v3892_v42  ;;  %v3574_v7 = vld [vmem:[%s4789_s1 + $0x38] sm:$0xff]   ;;  %v3576_v10 = vld [vmem:[%s4789_s1 + $0x70] sm:$0xff]  }
  0x1a   : > { %3158 = vmatpush3.bf16.msra.mxu0 %v3546_v14  ;;  %v442_v46 = vshrl.u32 %v3875_v36, 16  ;;  %v444_v47 = vshll.u32 %v3875_v36, 16  ;;  %v430_v49 = vshrl.u32 %v3882_v39, 16  ;;  %v466_v52 = vshrl.u32 %v3895_v43, 16  ;;  %v3575_v14 = vld [vmem:[%s4789_s1 + $0xb8] sm:$0xff]  }
  0x1b   : > { %3204 = vmatpush3.bf16.msra.mxu1 %v3547_v15  ;;  %3159 = vmatprep.subr.bf16.mxu0 %v3548_v16  ;;  %v449_v51 = vshll.u32 %v3886_v40, 16  ;;  %v468_v53 = vshll.u32 %v3895_v43, 16  ;;  %v432_v54 = vshll.u32 %v3882_v39, 16  ;;  %v473_v56 = vshll.u32 %v3908_v48, 16  ;;  %v3577_v16 = vld [vmem:[%s4789_s1 + $0xf0] sm:$0xff]  }
  0x1c   : > { %3205 = vmatprep.subr.bf16.mxu1 %v3549_v17  ;;  %v446_v55 = vrot.slane %v444_v47, 1  ;;  %v437_v57 = vshll.u32 %v3899_v44, 16  ;;  %v454_v63 = vshrl.u32 %v3902_v45, 16  ;;  %v456_v3 = vshll.u32 %v3902_v45, 16 }
  0x1d   : > { %v451_v60 = vrot.slane %v449_v51, 1  ;;  %v470_v61 = vrot.slane %v468_v53, 1  ;;  %v434_v62 = vrot.slane %v432_v54, 1  ;;  %v475_v1 = vrot.slane %v473_v56, 1  ;;  %v3586_v53 = vld [vmem:[%s4789_s1 + $0x28] sm:$0xff]  }
  0x1e   : > { %3160 = vmatpush3.bf16.msra.mxu0 %v3550_v18  ;;  %v447_v0 = vor.u32 %v446_v55, %v442_v46  ;;  %v439_v2 = vrot.slane %v437_v57, 1  ;;  %v461_v6 = vshll.u32 %v3922_v58, 16  ;;  %v458_v9 = vrot.slane %v456_v3, 1  ;;  %v3578_v18 = vld [vmem:[%s4789_s1 + $0x30] sm:$0xff]  }
  0x1f   : > { %3206 = vmatpush3.bf16.msra.mxu1 %v3551_v19  ;;  %3161 = vmatprep.subr.bf16.mxu0 %v3552_v20  ;;  %v471_v4 = vor.u32 %v470_v61, %v466_v52  ;;  %v435_v5 = vor.u32 %v434_v62, %v430_v49  ;;  %v485_v17 = vshrl.u32 %v3886_v40, 16  ;;  %v501_v19 = vshrl.u32 %v3908_v48, 16  ;;  %v3584_v49 = vld [vmem:[%s4789_s1 + $0x68] sm:$0xff]  }
  0x20   : > { %3207 = vmatprep.subr.bf16.mxu1 %v3553_v21  ;;  %v452_v8 = vsel %vm428_vm0, %v447_v0, %v451_v60  ;;  %v463_v13 = vrot.slane %v461_v6, 1  ;;  %v459_v15 = vor.u32 %v458_v9, %v454_v63  ;;  %v3579_v21 = vld [vmem:[%s4789_s1 + $0xb0] sm:$0xff]   ;;  %v3585_v52 = vld [vmem:[%s4789_s1 + $0xe8] sm:$0xff]   ;;  %v211_v63 = vld [vmem:[%s3856_s6 + $0x60] sm:$0xff] }
  0x21   : > { %829 = vmatprep.mubr.bf16.mxu0 %v452_v8  ;;  %v476_v11 = vsel %vm428_vm0, %v471_v4, %v475_v1  ;;  %v440_v12 = vsel %vm428_vm0, %v435_v5, %v439_v2  ;;  %v503_v37 = vor.u32 %v501_v19, %v475_v1  ;;  %v212_v4 = vld [vmem:[%s3856_s6 + $0x68] sm:$0xff]  ;;  %v4011_v5 = vld [vmem:[%s3856_s6 + $0x78] sm:$0xff] }
  0x22   : > { %3162 = vmatpush3.bf16.msra.mxu0 %v3554_v22  ;;  %901 = vmatprep.mubr.bf16.mxu1 %v476_v11  ;;  %v464_v20 = vsel %vm428_vm0, %v459_v15, %v463_v13  ;;  %v207_v22 = vld [vmem:[%s3856_s6 + $0x40] sm:$0xff] }
  0x23   : > { %3208 = vmatpush3.bf16.msra.mxu1 %v3555_v23  ;;  %3163 = vmatprep.subr.bf16.mxu0 %v3556_v24  ;;  %v3956_v23 = vld [vmem:[%s3856_s6 + $0x50] sm:$0xff]  ;;  %v208_v24 = vld [vmem:[%s3856_s6 + $0x48] sm:$0xff]  ;;  %v3991_v54 = vcombine.high %v3872_v35, %v207_v22  ;;  %v3591_v15 = vld [vmem:[%s4789_s1 + $0xe0] sm:$0xff]  }
  0x24   : > { %3209 = vmatprep.subr.bf16.mxu1 %v3557_v25  ;;  %v477_v25 = vshrl.u32 %v3899_v44, 16  ;;  %v3994_v55 = vcombine.low %v3892_v42, %v208_v24 }
  0x26   : > { %3164 = vmatpush3.bf16.msra.mxu0 %v3558_v26  ;;  %v493_v26 = vshrl.u32 %v3922_v58, 16  ;;  %v479_v46 = vor.u32 %v477_v25, %v439_v2  ;;  %v4006_v2 = vld [vmem:[%s3856_s6 + $0x70] sm:$0xff]  ;;  %v3595_v25 = vld [vmem:[%s4789_s1 + $0xa0] sm:$0xff]  }
  0x27   : > { %3210 = vmatpush3.bf16.msra.mxu1 %v3559_v27  ;;  %3165 = vmatprep.subr.bf16.mxu0 %v3560_v28  ;;  %v3962_v27 = vcombine.high %v207_v22, %v3956_v23  ;;  %v487_v28 = vor.u32 %v485_v17, %v451_v60  ;;  %v3999_v60 = vcombine.high %v3892_v42, %v208_v24 }
  0x28   : > { %3211 = vmatprep.subr.bf16.mxu1 %v3561_v29  ;;  %v3965_v29 = vld [vmem:[%s3856_s6 + $0x58] sm:$0xff]  ;;  %v495_v57 = vor.u32 %v493_v26, %v463_v13  ;;  %v4014_v42 = vcombine.high %v3956_v23, %v211_v63  ;;  %v4019_v8 = vcombine.high %v211_v63, %v4006_v2 }
  0x29   : > { %v3974_v32 = vcombine.high %v208_v24, %v3965_v29  ;;  %v3977_v47 = vcombine.low %v208_v24, %v3965_v29  ;;  %v517_v3 = vshrl.u32 %v3962_v27, 16  ;;  %v3594_v24 = vld [vmem:[%s4789_s1 + $0x20] sm:$0xff]   ;;  %v4050_v26 = vcombine.high %v3965_v29, %v212_v4 }
  0x2a   : > { %3166 = vmatpush3.bf16.msra.mxu0 %v3562_v30  ;;  %v3968_v30 = vcombine.low %v207_v22, %v3956_v23 }
  0x2b   : > { %3212 = vmatpush3.bf16.msra.mxu1 %v3563_v31  ;;  %3243 = vmatprep.subr.bf16.mxu0 %v3572_v50  ;;  %v3971_v31 = vcombine.low %v3872_v35, %v207_v22  ;;  %v489_v50 = vshll.u32 %v3962_v27, 16  ;;  %v505_v56 = vshll.u32 %v3974_v32, 16  ;;  %v3587_v35 = vld [vmem:[%s4789_s1 + $0xa8] sm:$0xff]   ;;  %v533_v9 = vshrl.u32 %v3974_v32, 16 }
  0x2c   : > { %3289 = vmatprep.subr.bf16.mxu1 %v3573_v59  ;;  %v481_v51 = vshll.u32 %v3968_v30, 16  ;;  %v497_v59 = vshll.u32 %v3977_v47, 16  ;;  %v509_v19 = vshrl.u32 %v3968_v30, 16  ;;  %v525_v22 = vshrl.u32 %v3977_v47, 16 }
  0x2d   : > { %830 = vmatmul.mubr.bf16.vlgmr.msra.gmra.mxu0 %v440_v12  ;;  %v491_v61 = vrot.slane %v489_v50, 1  ;;  %v507_v0 = vrot.slane %v505_v56, 1  ;;  %v3597_v56 = vld [vmem:[%s4789_s1 + $0xd8] sm:$0xff]  }
  0x2e   : > { %3244 = vmatpush3.bf16.msra.mxu0 %v3574_v7  ;;  %902 = vmatmul.mubr.bf16.vlgmr.msra.gmra.mxu1 %v464_v20  ;;  %v483_v62 = vrot.slane %v481_v51, 1  ;;  %v499_v1 = vrot.slane %v497_v59, 1 }
  0x2f   : > { %3245 = vmatprep.subr.bf16.mxu0 %v3576_v10  ;;  %3290 = vmatpush3.bf16.msra.mxu1 %v3575_v14  ;;  %v492_v6 = vsel %vm428_vm0, %v487_v28, %v491_v61  ;;  %v3590_v10 = vld [vmem:[%s4789_s1 + $0x60] sm:$0xff]   ;;  %v508_v11 = vsel %vm428_vm0, %v503_v37, %v507_v0  ;;  %v519_v13 = vor.u32 %v517_v3, %v491_v61  ;;  %v3598_v61 = vld [vmem:[%s4789_s1 + $0x18] sm:$0xff]  }
  0x30   : > { %3291 = vmatprep.subr.bf16.mxu1 %v3577_v16  ;;  %v484_v7 = vsel %vm428_vm0, %v479_v46, %v483_v62  ;;  %837 = vmatprep.mubr.bf16.mxu0 %v492_v6  ;;  %v500_v12 = vsel %vm428_vm0, %v495_v57, %v499_v1  ;;  %v4028_v14 = vcombine.high %v212_v4, %v4011_v5  ;;  %v521_v16 = vshll.u32 %v4019_v8, 16  ;;  %v4082_v6 = vld [vmem:[%s3856_s6 + $0x88] sm:$0xff] }
  0x31   : > { %909 = vmatprep.mubr.bf16.mxu1 %v508_v11  ;;  %v535_v17 = vor.u32 %v533_v9, %v507_v0  ;;  %v511_v37 = vor.u32 %v509_v19, %v483_v62  ;;  %v527_v51 = vor.u32 %v525_v22, %v499_v1  ;;  %v4064_v57 = vcombine.low %v3965_v29, %v212_v4  ;;  %v3599_v29 = vld [vmem:[%s4789_s1 + $0x98] sm:$0xff]   ;;  %v4076_v0 = vld [vmem:[%s3856_s6 + $0x80] sm:$0xff] }
  0x32   : > { %3246 = vmatpush3.bf16.msra.mxu0 %v3578_v18  ;;  %v4035_v18 = vcombine.low %v211_v63, %v4006_v2  ;;  %v537_v20 = vshll.u32 %v4028_v14, 16  ;;  %v523_v28 = vrot.slane %v521_v16, 1  ;;  %v549_v1 = vshrl.u32 %v4019_v8, 16 }
  0x33   : > { %3247 = vmatprep.subr.bf16.mxu0 %v3584_v49  ;;  %3292 = vmatpush3.bf16.msra.mxu1 %v3579_v21  ;;  %v4040_v21 = vcombine.low %v212_v4, %v4011_v5  ;;  %v4054_v49 = vcombine.low %v3956_v23, %v211_v63  ;;  %v281_v4 = vld [vmem:[%s3856_s6 + $0x90] sm:$0x11]  ;;  %v565_v9 = vshrl.u32 %v4028_v14, 16 }
  0x34   : > { %3293 = vmatprep.subr.bf16.mxu1 %v3585_v52  ;;  %v513_v46 = vshll.u32 %v4035_v18, 16  ;;  %v539_v50 = vrot.slane %v537_v20, 1  ;;  %v524_v23 = vsel %vm428_vm0, %v519_v13, %v523_v28  ;;  %v3604_v13 = vld [vmem:[%s4789_s1 + $0x50] sm:$0xff]   ;;  %v541_v16 = vshrl.u32 %v4035_v18, 16 }
  0x35   : > { %838 = vmatmul.mubr.bf16.gmra.mxu0 %v484_v7  ;;  %v529_v52 = vshll.u32 %v4040_v21, 16  ;;  %v282_v7 = vld [vmem:[%s3856_s6 + $0x98] sm:$0x11]  ;;  %v557_v19 = vshrl.u32 %v4040_v21, 16 }
  0x36   : > { %3248 = vmatpush3.bf16.msra.mxu0 %v3586_v53  ;;  %910 = vmatmul.mubr.bf16.gmra.mxu1 %v500_v12  ;;  %v3596_v53 = vld [vmem:[%s4789_s1 + $0x58] sm:$0xff]   ;;  %v515_v59 = vrot.slane %v513_v46, 1  ;;  %v540_v62 = vsel %vm428_vm0, %v535_v17, %v539_v50  ;;  %v2822_v11 = vcombine.high %v4082_v6, %v282_v7  ;;  %v2819_v12 = vcombine.low %v4076_v0, %v281_v4 }
  0x37   : > { %3249 = vmatprep.subr.bf16.mxu0 %v3590_v10  ;;  %3294 = vmatpush3.bf16.msra.mxu1 %v3587_v35  ;;  %v531_v35 = vrot.slane %v529_v52, 1  ;;  %v2820_v10 = vcombine.high %v4076_v0, %v281_v4  ;;  %v2821_v17 = vcombine.low %v4082_v6, %v282_v7  ;;  %v567_v22 = vor.u32 %v565_v9, %v539_v50  ;;  %v3607_v50 = vld [vmem:[%s4789_s1 + $0x90] sm:$0xff]   ;;  %v3609_v7 = vld [vmem:[%s4789_s1 + $0xc8] sm:$0xff]  }
  0x38   : > { %3295 = vmatprep.subr.bf16.mxu1 %v3591_v15  ;;  %845 = vmatprep.mubr.bf16.mxu0 %v524_v23  ;;  %v516_v63 = vsel %vm428_vm0, %v511_v37, %v515_v59  ;;  %v551_v15 = vor.u32 %v549_v1, %v523_v28  ;;  %v3605_v37 = vld [vmem:[%s4789_s1 + $0xd0] sm:$0xff]   ;;  %v543_v46 = vor.u32 %v541_v16, %v515_v59  ;;  %v3608_v59 = vld [vmem:[%s4789_s1 + $0x48] sm:$0xff]  }
  0x39   : > { %917 = vmatprep.mubr.bf16.mxu1 %v540_v62  ;;  %v532_v3 = vsel %vm428_vm0, %v527_v51, %v531_v35  ;;  %v553_v20 = vshll.u32 %v2820_v10, 16  ;;  %v559_v51 = vor.u32 %v557_v19, %v531_v35  ;;  %v561_v52 = vshll.u32 %v2821_v17, 16  ;;  %v3606_v28 = vld [vmem:[%s4789_s1 + $0x10] sm:$0xff]   ;;  %v3611_v19 = vld [vmem:[%s4789_s1 + $0x88] sm:$0xff]  }
  0x3a   : > { %3250 = vmatpush3.bf16.msra.mxu0 %v3594_v24  ;;  %v569_v24 = vshll.u32 %v2822_v11, 16  ;;  %v4113_v35 = vcombine.high %v4011_v5, %v4082_v6  ;;  %v576_v9 = vshrl.u32 %v2820_v10, 16  ;;  %v573_v10 = vshrl.u32 %v2819_v12, 16 }
  0x3b   : > { %3251 = vmatprep.subr.bf16.mxu0 %v3596_v53  ;;  %3296 = vmatpush3.bf16.msra.mxu1 %v3595_v25  ;;  %v545_v25 = vshll.u32 %v2819_v12, 16  ;;  %v555_v53 = vrot.slane %v553_v20, 1  ;;  %v563_v62 = vrot.slane %v561_v52, 1  ;;  %v3614_v12 = vld [vmem:[%s4789_s1] sm:$0xff]   ;;  %v2958_v52 = vcombine.high %v3879_v38, %v3889_v41 }
  0x3c   : > { %3297 = vmatprep.subr.bf16.mxu1 %v3597_v56  ;;  %v571_v56 = vrot.slane %v569_v24, 1  ;;  %v3613_v24 = vld [vmem:[%s4789_s1 + $0xc0] sm:$0xff]  }
  0x3d   : > { %846 = vmatmul.mubr.bf16.gmra.mxu0 %v516_v63  ;;  %v547_v23 = vrot.slane %v545_v25, 1  ;;  %v4121_v63 = vcombine.low %v4011_v5, %v4082_v6  ;;  %v556_v1 = vsel %vm428_vm0, %v551_v15, %v555_v53  ;;  %v3610_v5 = vld [vmem:[%s4789_s1 + $0x8] sm:$0xff]   ;;  %v2956_v15 = vcombine.high %v3866_v33, %v3869_v34 }
  0x3e   : > { %3252 = vmatpush3.bf16.msra.mxu0 %v3598_v61  ;;  %918 = vmatmul.mubr.bf16.gmra.mxu1 %v532_v3  ;;  %v4106_v61 = vcombine.high %v4006_v2, %v4076_v0  ;;  %v572_v3 = vsel %vm428_vm0, %v567_v22, %v571_v56  ;;  %v578_v16 = vor.u32 %v576_v9, %v555_v53  ;;  %v579_v22 = vshrl.u32 %v2821_v17, 16  ;;  %v3615_v17 = vld [vmem:[%s4789_s1 + $0x80] sm:$0xff]   ;;  %v3616_v53 = vld [vmem:[%s4789_s1 + $0x278] sm:$0xff]  }
  0x3f   : > { %3298 = vmatpush3.bf16.msra.mxu1 %v3599_v29  ;;  %3253 = vmatprep.subr.bf16.mxu0 %v3604_v13  ;;  %v4117_v29 = vcombine.low %v4006_v2, %v4076_v0  ;;  %v548_v4 = vsel %vm428_vm0, %v543_v46, %v547_v23  ;;  %v564_v2 = vsel %vm428_vm0, %v559_v51, %v563_v62  ;;  %v582_v13 = vshrl.u32 %v2822_v11, 16  ;;  %v3612_v11 = vld [vmem:[%s4789_s1 + $0x40] sm:$0xff]  }
  0x40   : > { %3299 = vmatprep.subr.bf16.mxu1 %v3605_v37  ;;  %853 = vmatprep.mubr.bf16.mxu0 %v556_v1  ;;  %v1479_v25 = vshrl.u32 %v2956_v15, 16  ;;  %v1481_v37 = vshll.u32 %v2956_v15, 16  ;;  %v575_v46 = vor.u32 %v573_v10, %v547_v23  ;;  %v1486_v51 = vshll.u32 %v3991_v54, 16  ;;  %v3617_v23 = vld [vmem:[%s4789_s1 + $0x2f8] sm:$0xff]  }
  0x41   : > { %925 = vmatprep.mubr.bf16.mxu1 %v572_v3  ;;  %v584_v20 = vor.u32 %v582_v13, %v571_v56  ;;  %v1503_v1 = vshrl.u32 %v2958_v52, 16  ;;  %v1505_v3 = vshll.u32 %v2958_v52, 16  ;;  %v1474_v10 = vshll.u32 %v3971_v31, 16  ;;  %v3628_v52 = vld [vmem:[%s4789_s1 + $0x260] sm:$0xff]  }
  0x42   : > { %3254 = vmatpush3.bf16.msra.mxu0 %v3606_v28  ;;  %v581_v28 = vor.u32 %v579_v22, %v563_v62  ;;  %v1483_v56 = vrot.slane %v1481_v37, 1  ;;  %v2955_v62 = vcombine.low %v3866_v33, %v3869_v34  ;;  %v3620_v33 = vld [vmem:[%s4789_s1 + $0x270] sm:$0xff]  }
  0x43   : > { %3300 = vmatpush3.bf16.msra.mxu1 %v3607_v50  ;;  %3255 = vmatprep.subr.bf16.mxu0 %v3608_v59  ;;  %v1488_v50 = vrot.slane %v1486_v51, 1  ;;  %v1507_v9 = vrot.slane %v1505_v3, 1  ;;  %v1538_v3 = vshrl.u32 %v3999_v60, 16 }
  0x44   : > { %3301 = vmatprep.subr.bf16.mxu1 %v3609_v7  ;;  %v1484_v59 = vor.u32 %v1483_v56, %v1479_v25  ;;  %v1510_v7 = vshll.u32 %v3999_v60, 16  ;;  %v1469_v15 = vshll.u32 %v2955_v62, 16  ;;  %v1526_v56 = vshll.u32 %v4014_v42, 16 }
  0x45   : > { %854 = vmatmul.mubr.bf16.gmra.mxu0 %v548_v4  ;;  %v1508_v34 = vor.u32 %v1507_v9, %v1503_v1 }
  0x46   : > { %926 = vmatmul.mubr.bf16.gmra.mxu1 %v564_v2  ;;  %861 = vmatprep.mubr.bf16.mxu0 %v578_v16  ;;  %v4163_v4 = vsel %vm428_vm0, %v1484_v59, %v1488_v50  ;;  %v3618_v2 = vld [vmem:[%s4789_s1 + $0x238] sm:$0xff]   ;;  %v1512_v13 = vrot.slane %v1510_v7, 1  ;;  %v2957_v16 = vcombine.low %v3879_v38, %v3889_v41  ;;  %v1471_v22 = vrot.slane %v1469_v15, 1  ;;  %v3624_v38 = vld [vmem:[%s4789_s1 + $0x268] sm:$0xff]  }
  0x47   : > { %3256 = vmatpush3.bf16.msra.mxu0 %v3610_v5  ;;  %933 = vmatprep.mubr.bf16.mxu1 %v584_v20  ;;  %v1467_v5 = vshrl.u32 %v2955_v62, 16  ;;  %v3622_v20 = vld [vmem:[%s4789_s1 + $0x230] sm:$0xff]   ;;  %v3631_v62 = vld [vmem:[%s4789_s1 + $0x2a0] sm:$0xff]   ;;  %v1528_v7 = vrot.slane %v1526_v56, 1  ;;  %v1546_v56 = vshrl.u32 %v4054_v49, 16 }
  0x48   : > { %3302 = vmatpush3.bf16.msra.mxu1 %v3611_v19  ;;  %3257 = vmatprep.subr.bf16.mxu0 %v3612_v11  ;;  %v4182_v19 = vsel %vm428_vm0, %v1508_v34, %v1512_v13  ;;  %v3623_v11 = vld [vmem:[%s4789_s1 + $0x2b0] sm:$0xff]   ;;  %v1491_v25 = vshrl.u32 %v2957_v16, 16  ;;  %v1540_v9 = vor.u32 %v1538_v3, %v1512_v13  ;;  %v1518_v34 = vshll.u32 %v4054_v49, 16  ;;  %v3650_v3 = vld [vmem:[%s4789_s1 + $0x200] sm:$0xff]  }
  0x49   : > { %3303 = vmatprep.subr.bf16.mxu1 %v3613_v24  ;;  %v1476_v24 = vrot.slane %v1474_v10, 1  ;;  %v1472_v41 = vor.u32 %v1471_v22, %v1467_v5  ;;  %v3636_v5 = vld [vmem:[%s4789_s1 + $0x250] sm:$0xff]  }
  0x4a   : > { %v1520_v10 = vrot.slane %v1518_v34, 1 }
  0x4b   : > { %3258 = vmatpush3.bf16.msra.mxu0 %v3614_v12  ;;  %v1493_v12 = vshll.u32 %v2957_v16, 16  ;;  %v4201_v37 = vsel %vm428_vm0, %v1472_v41, %v1476_v24  ;;  %v3637_v16 = vld [vmem:[%s4789_s1 + $0x2d0] sm:$0xff]   ;;  %v1554_v41 = vshrl.u32 %v4014_v42, 16 }
  0x4c   : > { %3304 = vmatpush3.bf16.msra.mxu1 %v3615_v17  ;;  %3335 = vmatprep.subr.bf16.mxu0 %v3616_v53  ;;  %v3629_v53 = vld [vmem:[%s4789_s1 + $0x2e0] sm:$0xff]  }
  0x4d   : > { %862 = vmatmul.mubr.bf16.gmra.mxu0 %v575_v46  ;;  %3381 = vmatprep.subr.bf16.mxu1 %v3617_v23  ;;  %v3626_v46 = vld [vmem:[%s4789_s1 + $0x228] sm:$0xff]   ;;  %v1495_v17 = vrot.slane %v1493_v12, 1  ;;  %v3630_v23 = vld [vmem:[%s4789_s1 + $0x220] sm:$0xff]   ;;  %v1556_v12 = vor.u32 %v1554_v41, %v1528_v7  ;;  %v2077_v41 = vrot.slane %v4054_v49, 1 }
  0x4e   : > { %934 = vmatmul.mubr.bf16.gmra.mxu1 %v581_v28  ;;  %1189 = vmatprep.mubr.bf16.mxu0 %v3875_v36  ;;  %v3619_v36 = vld [vmem:[%s4789_s1 + $0x2b8] sm:$0xff]  }
  0x4f   : > { %1261 = vmatprep.mubr.bf16.mxu1 %v3895_v43  ;;  %v3621_v43 = vld [vmem:[%s4789_s1 + $0x2f0] sm:$0xff]   ;;  %v1496_v28 = vor.u32 %v1495_v17, %v1491_v25 }
  0x55   : > { %1190 = vmatmul.mubr.bf16.vlgmr.msra.gmra.mxu0 %v3882_v39  ;;  %v3625_v39 = vld [vmem:[%s4789_s1 + $0x2e8] sm:$0xff]  }
  0x56   : > { %1262 = vmatmul.mubr.bf16.vlgmr.msra.gmra.mxu1 %v3902_v45  ;;  %3336 = vmatpush3.bf16.msra.mxu0 %v3618_v2  ;;  %v1498_v45 = vshll.u32 %v3994_v55, 16 }
  0x57   : > { %3382 = vmatpush3.bf16.msra.mxu1 %v3619_v36  ;;  %3337 = vmatprep.subr.bf16.mxu0 %v3620_v33  ;;  %v1514_v36 = vshrl.u32 %v3971_v31, 16 }
  0x58   : > { %3383 = vmatprep.subr.bf16.mxu1 %v3621_v43  ;;  %1197 = vmatprep.mubr.bf16.mxu0 %v3886_v40  ;;  %v3627_v40 = vld [vmem:[%s4789_s1 + $0x2a8] sm:$0xff]   ;;  %v1500_v51 = vrot.slane %v1498_v45, 1  ;;  %v1530_v43 = vshrl.u32 %v3994_v55, 16 }
  0x59   : > { %1269 = vmatprep.mubr.bf16.mxu1 %v3908_v48  ;;  %v1522_v48 = vshrl.u32 %v3991_v54, 16  ;;  %v1516_v33 = vor.u32 %v1514_v36, %v1476_v24  ;;  %v3639_v24 = vld [vmem:[%s4789_s1 + $0x290] sm:$0xff]   ;;  %v3661_v36 = vld [vmem:[%s4789_s1 + $0x3f8] sm:$0xff]  }
  0x5a   : > { %3338 = vmatpush3.bf16.msra.mxu0 %v3622_v20  ;;  %v4224_v59 = vsel %vm428_vm0, %v1496_v28, %v1500_v51  ;;  %v3638_v20 = vld [vmem:[%s4789_s1 + $0x210] sm:$0xff]   ;;  %v1532_v22 = vor.u32 %v1530_v43, %v1500_v51  ;;  %v3645_v51 = vld [vmem:[%s4789_s1 + $0x288] sm:$0xff]   ;;  %v1574_v28 = vshll.u32 %v4113_v35, 16 }
  0x5b   : > { %3384 = vmatpush3.bf16.msra.mxu1 %v3623_v11  ;;  %3339 = vmatprep.subr.bf16.mxu0 %v3624_v38  ;;  %v1524_v1 = vor.u32 %v1522_v48, %v1488_v50  ;;  %v1542_v50 = vshll.u32 %v4050_v26, 16  ;;  %v1534_v11 = vshll.u32 %v4064_v57, 16  ;;  %v4271_v38 = vsel %vm428_vm0, %v1516_v33, %v1520_v10  ;;  %v3648_v48 = vld [vmem:[%s4789_s1 + $0x240] sm:$0xff]   ;;  %v3664_v43 = vld [vmem:[%s4789_s1 + $0x370] sm:$0xff]  }
  0x5c   : > { %3385 = vmatprep.subr.bf16.mxu1 %v3625_v39  ;;  %v1558_v39 = vshll.u32 %v4106_v61, 16 }
  0x5d   : > { %1198 = vmatmul.mubr.bf16.gmra.mxu0 %v3899_v44  ;;  %v3632_v44 = vld [vmem:[%s4789_s1 + $0x258] sm:$0xff]   ;;  %v4241_v2 = vsel %vm428_vm0, %v1524_v1, %v1528_v7  ;;  %v1544_v13 = vrot.slane %v1542_v50, 1  ;;  %v1536_v25 = vrot.slane %v1534_v11, 1  ;;  %v4312_v1 = vrot.slane %v1574_v28, 1 }
  0x5e   : > { %1270 = vmatmul.mubr.bf16.gmra.mxu1 %v3922_v58  ;;  %3340 = vmatpush3.bf16.msra.mxu0 %v3626_v46  ;;  %v3633_v58 = vld [vmem:[%s4789_s1 + $0x2d8] sm:$0xff]   ;;  %v2856_v46 = vcombine.high %v4076_v0, %v4076_v0  ;;  %v4292_v17 = vrot.slane %v1558_v39, 1  ;;  %v1550_v7 = vshll.u32 %v4117_v29, 16  ;;  %v2066_v11 = vrot.slane %v3971_v31, 1  ;;  %v3674_v39 = vld [vmem:[%s4789_s1 + $0x328] sm:$0xff]  }
  0x5f   : > { %3386 = vmatpush3.bf16.msra.mxu1 %v3627_v40  ;;  %1205 = vmatprep.mubr.bf16.mxu0 %v3962_v27  ;;  %v3634_v27 = vld [vmem:[%s4789_s1 + $0x218] sm:$0xff]   ;;  %v4255_v15 = vsel %vm428_vm0, %v1540_v9, %v1544_v13  ;;  %v4284_v45 = vsel %vm428_vm0, %v1532_v22, %v1536_v25  ;;  %v2858_v40 = vcombine.high %v4082_v6, %v4082_v6  ;;  %v2083_v22 = vrot.slane %v4050_v26, 1 }
  0x60   : > { %1277 = vmatprep.mubr.bf16.mxu1 %v3974_v32  ;;  %3341 = vmatprep.subr.bf16.mxu0 %v3628_v52  ;;  %v3635_v32 = vld [vmem:[%s4789_s1 + $0x298] sm:$0xff]   ;;  %v4330_v50 = vrot.slane %v1550_v7, 1  ;;  %v1594_v7 = vshrl.u32 %v4121_v63, 16 }
  0x61   : > { %3387 = vmatprep.subr.bf16.mxu1 %v3629_v53  ;;  %v4305_v53 = vsel %vm428_vm0, %v1556_v12, %v4292_v17  ;;  %v3660_v9 = vld [vmem:[%s4789_s1 + $0x378] sm:$0xff]   ;;  %v4407_v12 = vld [vmem:[%s3856_s6 + $0x94] ss:$16 sps:$4 sm:$0x1f]  }
  0x62   : > { %3342 = vmatpush3.bf16.msra.mxu0 %v3630_v23  ;;  %v3649_v23 = vld [vmem:[%s4789_s1 + $0x2c0] sm:$0xff]   ;;  %v1590_v28 = vshll.u32 %v4407_v12, 16  ;;  %v2095_v31 = vrot.slane %v4407_v12, 1 }
  0x63   : > { %3388 = vmatpush3.bf16.msra.mxu1 %v3631_v62  ;;  %3343 = vmatprep.subr.bf16.mxu0 %v3632_v44  ;;  %v1548_v62 = vor.u32 %v1546_v56, %v1520_v10  ;;  %v3666_v10 = vld [vmem:[%s4789_s1 + $0x330] sm:$0xff]   ;;  %v3683_v56 = vld [vmem:[%s4789_s1 + $0x3a0] sm:$0xff]  }
  0x64   : > { %3389 = vmatprep.subr.bf16.mxu1 %v3633_v58  ;;  %v2855_v58 = vcombine.low %v4076_v0, %v4076_v0 }
  0x65   : > { %1206 = vmatmul.mubr.bf16.gmra.mxu0 %v3968_v30  ;;  %v3640_v30 = vld [vmem:[%s4789_s1 + $0x248] sm:$0xff]   ;;  %v4342_v33 = vsel %vm428_vm0, %v1548_v62, %v4330_v50  ;;  %v3684_v62 = vld [vmem:[%s4789_s1 + $0x358] sm:$0xff]  }
  0x66   : > { %1278 = vmatmul.mubr.bf16.gmra.mxu1 %v3977_v47  ;;  %3344 = vmatpush3.bf16.msra.mxu0 %v3634_v27  ;;  %v3641_v47 = vld [vmem:[%s4789_s1 + $0x2c8] sm:$0xff]  }
  0x67   : > { %3390 = vmatpush3.bf16.msra.mxu1 %v3635_v32  ;;  %1213 = vmatprep.mubr.bf16.mxu0 %v4019_v8  ;;  %v1570_v8 = vshrl.u32 %v4050_v26, 16  ;;  %v2857_v32 = vcombine.low %v4082_v6, %v4082_v6  ;;  %v3662_v6 = vld [vmem:[%s4789_s1 + $0x338] sm:$0xff]  }
  0x68   : > { %1285 = vmatprep.mubr.bf16.mxu1 %v4028_v14  ;;  %3345 = vmatprep.subr.bf16.mxu0 %v3636_v5  ;;  %v3644_v14 = vld [vmem:[%s4789_s1 + $0x208] sm:$0xff]   ;;  %v3663_v5 = vld [vmem:[%s4789_s1 + $0x3b8] sm:$0xff]  }
  0x69   : > { %3391 = vmatprep.subr.bf16.mxu1 %v3637_v16  ;;  %v1572_v52 = vor.u32 %v1570_v8, %v1544_v13  ;;  %v1566_v13 = vshll.u32 %v4121_v63, 16  ;;  %v3665_v16 = vld [vmem:[%s4789_s1 + $0x3f0] sm:$0xff]   ;;  %v4414_v8 = vld [vmem:[%s3856_s6 + $0x9c] ss:$16 sps:$4 sm:$0x1f]  }
  0x6a   : > { %3346 = vmatpush3.bf16.msra.mxu0 %v3638_v20  ;;  %v2075_v20 = vrot.slane %v3999_v60, 1  ;;  %v1619_v26 = vshrl.u32 %v4414_v8, 16  ;;  %v2487_v60 = vld [vmem:[%s4791_s3 + $0x28] sm:$0xff] }
  0x6b   : > { %3392 = vmatpush3.bf16.msra.mxu1 %v3639_v24  ;;  %3347 = vmatprep.subr.bf16.mxu0 %v3640_v30  ;;  %v4324_v44 = vsel %vm428_vm0, %v1572_v52, %v4312_v1  ;;  %v4344_v34 = vrot.slane %v1566_v13, 1  ;;  %v3667_v30 = vld [vmem:[%s4789_s1 + $0x3b0] sm:$0xff]   ;;  %v3682_v52 = vld [vmem:[%s4789_s1 + $0x320] sm:$0xff]  }
  0x6c   : > { %3393 = vmatprep.subr.bf16.mxu1 %v3641_v47  ;;  %v3673_v47 = vld [vmem:[%s4789_s1 + $0x3e8] sm:$0xff]  }
  0x6d   : > { %1214 = vmatmul.mubr.bf16.gmra.mxu0 %v4035_v18  ;;  %v3651_v18 = vld [vmem:[%s4789_s1 + $0x280] sm:$0xff]  }
  0x6e   : > { %1286 = vmatmul.mubr.bf16.gmra.mxu1 %v4040_v21  ;;  %1221 = vmatprep.mubr.bf16.mxu0 %v2856_v46  ;;  %v1562_v21 = vshrl.u32 %v4064_v57, 16  ;;  %v3678_v46 = vld [vmem:[%s4789_s1 + $0x360] sm:$0xff]  }
  0x6f   : > { %1293 = vmatprep.mubr.bf16.mxu1 %v2858_v40  ;;  %3348 = vmatpush3.bf16.msra.mxu0 %v3644_v14  ;;  %v1586_v14 = vshrl.u32 %v4106_v61, 16  ;;  %v3679_v40 = vld [vmem:[%s4789_s1 + $0x3e0] sm:$0xff]  }
  0x70   : > { %3394 = vmatpush3.bf16.msra.mxu1 %v3645_v51  ;;  %3349 = vmatprep.subr.bf16.mxu0 %v3648_v48  ;;  %v1564_v27 = vor.u32 %v1562_v21, %v1536_v25  ;;  %v3672_v25 = vld [vmem:[%s4789_s1 + $0x368] sm:$0xff]   ;;  %v1578_v51 = vshrl.u32 %v4117_v29, 16  ;;  %v4433_v48 = vld [vmem:[%s3856_s6 + $0x90] ss:$16 sps:$4 sm:$0x1f]  }
  0x71   : > { %3395 = vmatprep.subr.bf16.mxu1 %v3649_v23  ;;  %v1606_v23 = vshll.u32 %v4414_v8, 16  ;;  %v1588_v21 = vor.u32 %v1586_v14, %v4292_v17  ;;  %v2087_v17 = vrot.slane %v4106_v61, 1 }
  0x72   : > { %v4348_v0 = vsel %vm428_vm0, %v1564_v27, %v4344_v34  ;;  %v1582_v27 = vshll.u32 %v4433_v48, 16 }
  0x73   : > { %3350 = vmatpush3.bf16.msra.mxu0 %v3650_v3  ;;  %v4441_v3 = vld [vmem:[%s3856_s6 + $0x98] ss:$16 sps:$4 sm:$0x1f]  }
  0x74   : > { %3396 = vmatpush3.bf16.msra.mxu1 %v3651_v18  ;;  %3427 = vmatprep.subr.bf16.mxu0 %v3660_v9  ;;  %v2072_v18 = vrot.slane %v3994_v55, 1  ;;  %v1592_v9 = vrot.slane %v1590_v28, 1  ;;  %v1598_v13 = vshll.u32 %v4441_v3, 16  ;;  %v3700_v28 = vld [vmem:[%s4789_s1 + $0x308] sm:$0xff]   ;;  %v2099_v55 = vrot.slane %v4414_v8, 1 }
  0x75   : > { %1222 = vmatmul.mubr.bf16.gmra.mxu0 %v2855_v58  ;;  %3473 = vmatprep.subr.bf16.mxu1 %v3661_v36  ;;  %v1608_v36 = vrot.slane %v1606_v23, 1 }
  0x76   : > { %1294 = vmatmul.mubr.bf16.gmra.mxu1 %v2857_v32  ;;  %1866 = vmatprep.mubr.bf16.mxu0 %v4163_v4  ;;  %v2069_v4 = vrot.slane %v3991_v54, 1  ;;  %v1593_v32 = vsel %vm428_vm0, %v1588_v21, %v1592_v9  ;;  %v3722_v21 = vmov 0   ;;  %v2488_v54 = vld [vmem:[%s4791_s3 + $0x30] sm:$0xff] }
  0x77   : > { %1938 = vmatprep.mubr.bf16.mxu1 %v4182_v19  ;;  %v2079_v19 = vrot.slane %v4014_v42, 1  ;;  %3530 = vset.pattern.permute.xlu0 %v3722_v21 }
  0x78   : > { %3531 = vset.pattern.permute.xlu1 %v3722_v21 }
  0x79   : > { %v4378_v24 = vsel %vm2064_vm1, %v2069_v4, %v2079_v19 }
  0x7d   : > { %1867 = vmatmul.mubr.bf16.vlgmr.msra.gmra.mxu0 %v4201_v37  ;;  %v4390_v37 = vsel %vm2064_vm1, %v2075_v20, %v2083_v22 }
  0x7e   : > { %1939 = vmatmul.mubr.bf16.vlgmr.msra.gmra.mxu1 %v4224_v59  ;;  %3428 = vmatpush3.bf16.msra.mxu0 %v3662_v6  ;;  %v4400_v59 = vsel %vm2064_vm1, %v2066_v11, %v2077_v41  ;;  %v3694_v6 = vld [vmem:[%s4789_s1 + $0x350] sm:$0xff]  }
  0x7f   : > { %3474 = vmatpush3.bf16.msra.mxu1 %v3663_v5  ;;  %3429 = vmatprep.subr.bf16.mxu0 %v3664_v43  ;;  %v1580_v43 = vor.u32 %v1578_v51, %v4330_v50  ;;  %v3696_v50 = vld [vmem:[%s4789_s1 + $0x310] sm:$0xff]  }
  0x80   : > { %3475 = vmatprep.subr.bf16.mxu1 %v3665_v16  ;;  %1874 = vmatprep.mubr.bf16.mxu0 %v4241_v2  ;;  %v3675_v2 = vld [vmem:[%s4789_s1 + $0x3a8] sm:$0xff]   ;;  %v3695_v16 = vld [vmem:[%s4789_s1 + $0x3d0] sm:$0xff]  }
  0x81   : > { %1946 = vmatprep.mubr.bf16.mxu1 %v4255_v15  ;;  %v1602_v15 = vshrl.u32 %v4113_v35, 16 }
  0x82   : > { %3430 = vmatpush3.bf16.msra.mxu0 %v3666_v10  ;;  %v4487_v10 = vsel %vm2064_vm1, %v2079_v19, %v2087_v17  ;;  %v2089_v19 = vrot.slane %v4121_v63, 1 }
  0x83   : > { %3476 = vmatpush3.bf16.msra.mxu1 %v3667_v30  ;;  %3431 = vmatprep.subr.bf16.mxu0 %v3672_v25  ;;  %v1604_v58 = vor.u32 %v1602_v15, %v4312_v1  ;;  %v2085_v30 = vrot.slane %v4117_v29, 1  ;;  %v1613_v25 = vshrl.u32 %v4407_v12, 16  ;;  %v1988_v15 = vld [vmem:[%s3856_s6 + $0x18] sm:$0xee] }
  0x84   : > { %3477 = vmatprep.subr.bf16.mxu1 %v3673_v47  ;;  %v1600_v47 = vrot.slane %v1598_v13, 1  ;;  %v3705_v13 = vld [vmem:[%s4789_s1 + $0x380] sm:$0xff]  }
  0x85   : > { %1875 = vmatmul.mubr.bf16.gmra.mxu0 %v4271_v38  ;;  %v3685_v38 = vld [vmem:[%s4789_s1 + $0x3d8] sm:$0xff]   ;;  %v1609_v5 = vsel %vm428_vm0, %v1604_v58, %v1608_v36  ;;  %v1616_v58 = vshrl.u32 %v4441_v3, 16 }
  0x86   : > { %1947 = vmatmul.mubr.bf16.gmra.mxu1 %v4284_v45  ;;  %3432 = vmatpush3.bf16.msra.mxu0 %v3674_v39  ;;  %v3686_v45 = vld [vmem:[%s4789_s1 + $0x318] sm:$0xff]   ;;  %v3697_v39 = vld [vmem:[%s4789_s1 + $0x390] sm:$0xff]  }
  0x87   : > { %3478 = vmatpush3.bf16.msra.mxu1 %v3675_v2  ;;  %1882 = vmatprep.mubr.bf16.mxu0 %v4305_v53  ;;  %v3687_v53 = vld [vmem:[%s4789_s1 + $0x398] sm:$0xff]   ;;  %v3698_v2 = vld [vmem:[%s4789_s1 + $0x348] sm:$0xff]  }
  0x88   : > { %1954 = vmatprep.mubr.bf16.mxu1 %v4324_v44  ;;  %3433 = vmatprep.subr.bf16.mxu0 %v3678_v46  ;;  %v2081_v44 = vrot.slane %v4064_v57, 1  ;;  %v2091_v57 = vrot.slane %v4113_v35, 1  ;;  %v1987_v46 = vld [vmem:[%s3856_s6 + $0x10] sm:$0xee] }
  0x89   : > { %3479 = vmatprep.subr.bf16.mxu1 %v3679_v40  ;;  %v2482_v40 = vld [vmem:[%s4791_s3] sm:$0xff] }
  0x8a   : > { %3434 = vmatpush3.bf16.msra.mxu0 %v3682_v52  ;;  %v4473_v1 = vsel %vm2064_vm1, %v2072_v18, %v2081_v44  ;;  %v4500_v42 = vsel %vm2064_vm1, %v2083_v22, %v2091_v57  ;;  %v4516_v22 = vsel %vm2064_vm1, %v2077_v41, %v2085_v30  ;;  %v4525_v14 = vsel %vm2064_vm1, %v2081_v44, %v2089_v19 }
  0x8b   : > { %3480 = vmatpush3.bf16.msra.mxu1 %v3683_v56  ;;  %3435 = vmatprep.subr.bf16.mxu0 %v3684_v62  ;;  %v1615_v41 = vor.u32 %v1613_v25, %v1592_v9  ;;  %v1621_v52 = vor.u32 %v1619_v26, %v1608_v36  ;;  %v3712_v56 = vld [vmem:[%s3856_s6 + $0x20] sm:$0xff]  ;;  %v3701_v62 = vld [vmem:[%s4789_s1 + $0x388] sm:$0xff]   ;;  %v1610_v9 = vshrl.u32 %v4433_v48, 16 }
  0x8c   : > { %3481 = vmatprep.subr.bf16.mxu1 %v3685_v38  ;;  %v3072_v23 = vcombine.high %v1987_v46, %v3712_v56  ;;  %v3713_v38 = vld [vmem:[%s3856_s6 + $0x28] sm:$0xff]  ;;  %2493 = vperm.xlu0 %3530, %v2482_v40  }
  0x8d   : > { %1883 = vmatmul.mubr.bf16.gmra.mxu0 %v4342_v33  ;;  %v1584_v33 = vrot.slane %v1582_v27, 1  ;;  %v2483_v36 = vld [vmem:[%s4791_s3 + $0x8] sm:$0xff]  ;;  %v3704_v27 = vld [vmem:[%s4789_s1 + $0x300] sm:$0xff]  }
  0x8e   : > { %1955 = vmatmul.mubr.bf16.gmra.mxu1 %v4348_v0  ;;  %3436 = vmatpush3.bf16.msra.mxu0 %v3686_v45  ;;  %v1596_v0 = vor.u32 %v1594_v7, %v4344_v34  ;;  %v3699_v34 = vld [vmem:[%s4789_s1 + $0x3c8] sm:$0xff]   ;;  %v3702_v7 = vld [vmem:[%s4789_s1 + $0x340] sm:$0xff]   ;;  %v3074_v45 = vcombine.high %v1988_v15, %v3713_v38  ;;  %v2068_v44 = vrot.slane %v3072_v23, 1 }
  0x8f   : > { %3482 = vmatpush3.bf16.msra.mxu1 %v3687_v53  ;;  %1890 = vmatprep.mubr.bf16.mxu0 %v1593_v32  ;;  %v1585_v49 = vsel %vm428_vm0, %v1580_v43, %v1584_v33  ;;  %v3703_v53 = vld [vmem:[%s4789_s1 + $0x3c0] sm:$0xff]   ;;  %v1618_v43 = vor.u32 %v1616_v58, %v1600_v47 }
  0x90   : > { %1962 = vmatprep.mubr.bf16.mxu1 %v1609_v5  ;;  %3437 = vmatprep.subr.bf16.mxu0 %v3694_v6  ;;  %v1601_v51 = vsel %vm428_vm0, %v1596_v0, %v1600_v47  ;;  %v2074_v32 = vrot.slane %v3074_v45, 1  ;;  %v2484_v6 = vld [vmem:[%s4791_s3 + $0x10] sm:$0xff]  ;;  %v1612_v5 = vor.u32 %v1610_v9, %v1584_v33  ;;  %v2070_v25 = vsel %vm2064_vm1, %v2068_v44, %v2069_v4  ;;  %v2485_v47 = vld [vmem:[%s4791_s3 + $0x18] sm:$0xff] }
  0x91   : > { %3483 = vmatprep.subr.bf16.mxu1 %v3695_v16  ;;  %2498 = vperm.xlu0 %3530, %v2483_v36   ;;  %v3071_v16 = vcombine.low %v1987_v46, %v3712_v56  ;;  %v3073_v0 = vcombine.low %v1988_v15, %v3713_v38 }
  0x92   : > { %3438 = vmatpush3.bf16.msra.mxu0 %v3696_v50  ;;  %v2486_v50 = vld [vmem:[%s4791_s3 + $0x20] sm:$0xff]  ;;  %2503 = vperm.xlu1 %3531, %v2484_v6   ;;  %v2076_v33 = vsel %vm2064_vm1, %v2074_v32, %v2075_v20 }
  0x93   : > { %3484 = vmatpush3.bf16.msra.mxu1 %v3697_v39  ;;  %3439 = vmatprep.subr.bf16.mxu0 %v3698_v2  ;;  %v2065_v39 = vrot.slane %v3071_v16, 1  ;;  %v2071_v4 = vrot.slane %v3073_v0, 1  ;;  %v2490_v2 = vld [vmem:[%s4791_s3 + $0x40] sm:$0xff] }
  0x94   : > { %3485 = vmatprep.subr.bf16.mxu1 %v3699_v34  ;;  %v2489_v34 = vld [vmem:[%s4791_s3 + $0x38] sm:$0xff] }
  0x95   : > { %1891 = vmatmul.mubr.bf16.gmra.mxu0 %v1585_v49  ;;  %2513 = vperm.xlu0 %3530, %v2486_v50   ;;  %v2067_v20 = vsel %vm2064_vm1, %v2065_v39, %v2066_v11  ;;  %v2073_v26 = vsel %vm2064_vm1, %v2071_v4, %v2072_v18  ;;  %v2096_v11 = vsel %vm2064_vm1, %v2087_v17, %v2095_v31 }
  0x96   : > { %1963 = vmatmul.mubr.bf16.gmra.mxu1 %v1601_v51  ;;  %1898 = vmatprep.mubr.bf16.mxu0 %v1615_v41 }
  0x97   : > { %1970 = vmatprep.mubr.bf16.mxu1 %v1621_v52  ;;  %3440 = vmatpush3.bf16.msra.mxu0 %v3700_v28 }
  0x98   : > { %3486 = vmatpush3.bf16.msra.mxu1 %v3701_v62  ;;  %3441 = vmatprep.subr.bf16.mxu0 %v3702_v7 }
  0x99   : > { %3487 = vmatprep.subr.bf16.mxu1 %v3703_v53  ;;  %2508 = vperm.xlu1 %3531, %v2485_v47  }
  0x9a   : > { %2523 = vperm.xlu0 %3530, %v2488_v54  }
  0x9b   : > { %3442 = vmatpush3.bf16.msra.mxu0 %v3704_v27 }
  0x9c   : > { %3488 = vmatpush3.bf16.msra.mxu1 %v3705_v13 }
  0x9d   : > { %1899 = vmatmul.mubr.bf16.gmra.mxu0 %v1612_v5  ;;  %2518 = vperm.xlu1 %3531, %v2487_v60  }
  0x9e   : > { %1971 = vmatmul.mubr.bf16.gmra.mxu1 %v1618_v43  ;;  %2345 = vmatprep.mubr.bf16.mxu0 %v2070_v25 }
  0x9f   : > { %2417 = vmatprep.mubr.bf16.mxu1 %v2076_v33  ;;  %2533 = vperm.xlu0 %3530, %v2490_v2  }
  0xa1   : > { %2528 = vperm.xlu1 %3531, %v2489_v34  }
  0xa5   : > { %2346 = vmatmul.mubr.bf16.vlgmr.msra.gmra.mxu0 %v2067_v20 }
  0xa6   : > { %2418 = vmatmul.mubr.bf16.vlgmr.msra.gmra.mxu1 %v2073_v26  ;;  %2353 = vmatprep.mubr.bf16.mxu0 %v4378_v24  ;;  %v2100_v24 = vsel %vm2064_vm1, %v2091_v57, %v2099_v55 }
  0xa7   : > { %2425 = vmatprep.mubr.bf16.mxu1 %v4390_v37  ;;  %v2093_v37 = vrot.slane %v4433_v48, 1 }
  0xa9   : > { %v2094_v61 = vsel %vm2064_vm1, %v2085_v30, %v2093_v37 }
  0xad   : > { %2354 = vmatmul.mubr.bf16.gmra.mxu0 %v4400_v59  ;;  %v2097_v59 = vrot.slane %v4441_v3, 1 }
  0xae   : > { %2426 = vmatmul.mubr.bf16.gmra.mxu1 %v4473_v1  ;;  %2361 = vmatprep.mubr.bf16.mxu0 %v4487_v10 }
  0xaf   : > { %2433 = vmatprep.mubr.bf16.mxu1 %v4500_v42  ;;  %v2098_v35 = vsel %vm2064_vm1, %v2089_v19, %v2097_v59 }
  0xb5   : > { %2362 = vmatmul.mubr.bf16.gmra.mxu0 %v4516_v22 }
  0xb6   : > { %2434 = vmatmul.mubr.bf16.gmra.mxu1 %v4525_v14  ;;  %2369 = vmatprep.mubr.bf16.mxu0 %v2096_v11 }
  0xb7   : > { %2441 = vmatprep.mubr.bf16.mxu1 %v2100_v24 }
  0xbd   : > { %2370 = vmatmul.mubr.bf16.gmra.mxu0 %v2094_v61 }
  0xbe   : > { %2442 = vmatmul.mubr.bf16.gmra.mxu1 %v2098_v35  ;;  %2377 = vmatprep.mubr.bf16.mxu0 %v2095_v31 }
  0xbf   : > { %2449 = vmatprep.mubr.bf16.mxu1 %v2099_v55 }
  0xc5   : > { %2378 = vmatmul.mubr.bf16.gmra.mxu0 %v2093_v37 }
  0xc6   : > { %2450 = vmatmul.mubr.bf16.gmra.mxu1 %v2097_v59 }
  0xed   : > { %v3167_v12 = vpop.f32.mrf.mxu0 }
  0xee   : > { %v3213_v48 = vpop.f32.mrf.mxu1 }
  0xef   : > { %v3168_v8 = vpop.f32.mrf.mxu0 }
  0xf0   : > { %v3169_v18 = vadd.f32 %v3168_v8, %v3167_v12  ;;  %v3214_v3 = vpop.f32.mrf.mxu1 }
  0xf1   : > { %v3170_v17 = vpop.f32.mrf.mxu0  ;;  %v3215_v1 = vadd.f32 %v3214_v3, %v3213_v48 }
  0xf2   : > { %v3216_v57 = vpop.f32.mrf.mxu1 }
  0xf3   : > { %v3171_v29 = vpop.f32.mrf.mxu0  ;;  %v4615_v30 = vadd.f32 %v3215_v1, %v3169_v18 }
  0xf4   : > { %v3172_v10 = vadd.f32 %v3171_v29, %v3170_v17  ;;  %v3217_v63 = vpop.f32.mrf.mxu1 }
  0xf5   : > { %v3218_v42 = vadd.f32 %v3217_v63, %v3216_v57  ;;  %v3173_v19 = vpop.f32.mrf.mxu0 }
  0xf6   : > { %v3219_v46 = vpop.f32.mrf.mxu1 }
  0xf7   : > { %v4617_v22 = vadd.f32 %v3218_v42, %v3172_v10  ;;  %v3174_v14 = vpop.f32.mrf.mxu0 }
  0xf8   : > { %v3175_v15 = vadd.f32 %v3174_v14, %v3173_v19  ;;  %v3220_v49 = vpop.f32.mrf.mxu1 }
  0xf9   : > { %v3221_v41 = vadd.f32 %v3220_v49, %v3219_v46  ;;  %v3176_v40 = vpop.f32.mrf.mxu0 }
  0xfa   : > { %v3222_v51 = vpop.f32.mrf.mxu1 }
  0xfb   : > { %v4619_v52 = vadd.f32 %v3221_v41, %v3175_v15  ;;  %v3177_v28 = vpop.f32.mrf.mxu0 }
  0xfc   : > { %v3178_v56 = vadd.f32 %v3177_v28, %v3176_v40  ;;  %v3223_v23 = vpop.f32.mrf.mxu1 }
  0xfd   : > { %v3224_v62 = vadd.f32 %v3223_v23, %v3222_v51  ;;  %v3179_v7 = vpop.f32.mrf.mxu0 }
  0xfe   : > { %v3225_v38 = vpop.f32.mrf.mxu1 }
  0xff   : > { %v4621_v45 = vadd.f32 %v3224_v62, %v3178_v56  ;;  %v3180_v21 = vpop.f32.mrf.mxu0 }
 0x100   : > { %v3181_v9 = vadd.f32 %v3180_v21, %v3179_v7  ;;  %v3226_v53 = vpop.f32.mrf.mxu1 }
 0x101   : > { %v3227_v58 = vadd.f32 %v3226_v53, %v3225_v38  ;;  %v3182_v36 = vpop.f32.mrf.mxu0 }
 0x102   : > { %v3228_v27 = vpop.f32.mrf.mxu1 }
 0x103   : > { %v4623_v44 = vadd.f32 %v3227_v58, %v3181_v9  ;;  %v3183_v13 = vpop.f32.mrf.mxu0 }
 0x104   : > { %v3184_v32 = vadd.f32 %v3183_v13, %v3182_v36  ;;  %v3229_v6 = vpop.f32.mrf.mxu1 }
 0x105   : > { %v3230_v5 = vadd.f32 %v3229_v6, %v3228_v27  ;;  %v3185_v43 = vpop.f32.mrf.mxu0 }
 0x106   : > { %v3231_v16 = vpop.f32.mrf.mxu1 }
 0x107   : > { %v4625_v50 = vadd.f32 %v3230_v5, %v3184_v32  ;;  %v3186_v25 = vpop.f32.mrf.mxu0 }
 0x108   : > { %v3187_v0 = vadd.f32 %v3186_v25, %v3185_v43  ;;  %v3232_v33 = vpop.f32.mrf.mxu1 }
 0x109   : > { %v3233_v47 = vadd.f32 %v3232_v33, %v3231_v16  ;;  %v3188_v39 = vpop.f32.mrf.mxu0 }
 0x10a   : > { %v3234_v54 = vpop.f32.mrf.mxu1 }
 0x10b   : > { %v4627_v4 = vadd.f32 %v3233_v47, %v3187_v0  ;;  %v3189_v60 = vpop.f32.mrf.mxu0 }
 0x10c   : > { %v3190_v20 = vadd.f32 %v3189_v60, %v3188_v39  ;;  %v3235_v2 = vpop.f32.mrf.mxu1 }
 0x10d   : > { %v3236_v26 = vadd.f32 %v3235_v2, %v3234_v54  ;;  %v3191_v34 = vpop.f32.mrf.mxu0 }
 0x10e   : > { %v3237_v31 = vpop.f32.mrf.mxu1 }
 0x10f   : > { %v4629_v55 = vadd.f32 %v3236_v26, %v3190_v20  ;;  %v3192_v11 = vpop.f32.mrf.mxu0 }
 0x110   : > { %v3193_v24 = vadd.f32 %v3192_v11, %v3191_v34  ;;  %v3238_v37 = vpop.f32.mrf.mxu1 }
 0x111   : > { %v3239_v59 = vadd.f32 %v3238_v37, %v3237_v31  ;;  %v3194_v61 = vpop.f32.mrf.mxu0 }
 0x112   : > { %v3240_v35 = vpop.f32.mrf.mxu1 }
 0x113   : > { %v4631_v12 = vadd.f32 %v3239_v59, %v3193_v24  ;;  %v3195_v8 = vpop.f32.mrf.mxu0 }
 0x114   : > { %v3241_v48 = vpop.f32.mrf.mxu1 }
 0x115   : > { %v3259_v18 = vpop.f32.mrf.mxu0 }
 0x116   : > { %v3305_v17 = vpop.f32.mrf.mxu1 }
 0x117   : > { %v3260_v3 = vpop.f32.mrf.mxu0 }
 0x118   : > { %v3261_v1 = vadd.f32 %v3260_v3, %v3259_v18  ;;  %v3306_v29 = vpop.f32.mrf.mxu1 }
 0x119   : > { %v3307_v57 = vadd.f32 %v3306_v29, %v3305_v17  ;;  %v3262_v10 = vpop.f32.mrf.mxu0 }
 0x11a   : > { %v1192_v63 = vadd.f32 %v3261_v1, %v4615_v30  ;;  %v3308_v42 = vpop.f32.mrf.mxu1 }
 0x11b   : > { %v3263_v19 = vpop.f32.mrf.mxu0 }
 0x11c   : > { %v4634_v46 = vadd.f32 %v3307_v57, %v1192_v63  ;;  %v3264_v14 = vadd.f32 %v3263_v19, %v3262_v10  ;;  %v3309_v15 = vpop.f32.mrf.mxu1 }
 0x11d   : > { %v3310_v49 = vadd.f32 %v3309_v15, %v3308_v42  ;;  %v3265_v41 = vpop.f32.mrf.mxu0 }
 0x11e   : > { %v1195_v40 = vadd.f32 %v3264_v14, %v4617_v22  ;;  %v3311_v51 = vpop.f32.mrf.mxu1 }
 0x11f   : > { %v3266_v28 = vpop.f32.mrf.mxu0 }
 0x120   : > { %v4637_v56 = vadd.f32 %v3310_v49, %v1195_v40  ;;  %v3267_v23 = vadd.f32 %v3266_v28, %v3265_v41  ;;  %v3312_v62 = vpop.f32.mrf.mxu1 }
 0x121   : > { %v3313_v7 = vadd.f32 %v3312_v62, %v3311_v51  ;;  %v3268_v38 = vpop.f32.mrf.mxu0 }
 0x122   : > { %v1200_v30 = vadd.f32 %v3267_v23, %v4619_v52  ;;  %v3314_v21 = vpop.f32.mrf.mxu1 }
 0x123   : > { %v3269_v9 = vpop.f32.mrf.mxu0 }
 0x124   : > { %v4640_v53 = vadd.f32 %v3313_v7, %v1200_v30  ;;  %v3270_v58 = vadd.f32 %v3269_v9, %v3268_v38  ;;  %v3315_v36 = vpop.f32.mrf.mxu1 }
 0x125   : > { %v3316_v27 = vadd.f32 %v3315_v36, %v3314_v21  ;;  %v3271_v13 = vpop.f32.mrf.mxu0 }
 0x126   : > { %v1203_v22 = vadd.f32 %v3270_v58, %v4621_v45  ;;  %v3317_v32 = vpop.f32.mrf.mxu1 }
 0x127   : > { %v3272_v6 = vpop.f32.mrf.mxu0 }
 0x128   : > { %v4643_v5 = vadd.f32 %v3316_v27, %v1203_v22  ;;  %v3273_v43 = vadd.f32 %v3272_v6, %v3271_v13  ;;  %v3318_v16 = vpop.f32.mrf.mxu1 }
 0x129   : > { %v3319_v25 = vadd.f32 %v3318_v16, %v3317_v32  ;;  %v3274_v0 = vpop.f32.mrf.mxu0 }
 0x12a   : > { %v1208_v52 = vadd.f32 %v3273_v43, %v4623_v44  ;;  %v3320_v33 = vpop.f32.mrf.mxu1 }
 0x12b   : > { %v3275_v47 = vpop.f32.mrf.mxu0 }
 0x12c   : > { %v4646_v39 = vadd.f32 %v3319_v25, %v1208_v52  ;;  %v3276_v54 = vadd.f32 %v3275_v47, %v3274_v0  ;;  %v3321_v60 = vpop.f32.mrf.mxu1 }
 0x12d   : > { %v3322_v20 = vadd.f32 %v3321_v60, %v3320_v33  ;;  %v3277_v2 = vpop.f32.mrf.mxu0 }
 0x12e   : > { %v1211_v45 = vadd.f32 %v3276_v54, %v4625_v50  ;;  %v3323_v26 = vpop.f32.mrf.mxu1 }
 0x12f   : > { %v3278_v34 = vpop.f32.mrf.mxu0 }
 0x130   : > { %v4649_v31 = vadd.f32 %v3322_v20, %v1211_v45  ;;  %v3279_v11 = vadd.f32 %v3278_v34, %v3277_v2  ;;  %v3324_v24 = vpop.f32.mrf.mxu1 }
 0x131   : > { %v3325_v37 = vadd.f32 %v3324_v24, %v3323_v26  ;;  %v3280_v59 = vpop.f32.mrf.mxu0 }
 0x132   : > { %v1216_v44 = vadd.f32 %v3279_v11, %v4627_v4  ;;  %v3326_v61 = vpop.f32.mrf.mxu1 }
 0x133   : > { %v3281_v35 = vpop.f32.mrf.mxu0 }
 0x134   : > { %v4652_v8 = vadd.f32 %v3325_v37, %v1216_v44  ;;  %v3282_v48 = vadd.f32 %v3281_v35, %v3280_v59  ;;  %v3327_v18 = vpop.f32.mrf.mxu1 }
 0x135   : > { %v3328_v17 = vadd.f32 %v3327_v18, %v3326_v61  ;;  %v3283_v3 = vpop.f32.mrf.mxu0 }
 0x136   : > { %v1219_v50 = vadd.f32 %v3282_v48, %v4629_v55  ;;  %v3329_v1 = vpop.f32.mrf.mxu1 }
 0x137   : > { %v3284_v29 = vpop.f32.mrf.mxu0 }
 0x138   : > { %v4655_v57 = vadd.f32 %v3328_v17, %v1219_v50  ;;  %v3285_v10 = vadd.f32 %v3284_v29, %v3283_v3  ;;  %v3330_v63 = vpop.f32.mrf.mxu1 }
 0x139   : > { %v3331_v42 = vadd.f32 %v3330_v63, %v3329_v1  ;;  %v3286_v19 = vpop.f32.mrf.mxu0 }
 0x13a   : > { %v1224_v4 = vadd.f32 %v3285_v10, %v4631_v12  ;;  %v3332_v14 = vpop.f32.mrf.mxu1 }
 0x13b   : > { %v3287_v15 = vpop.f32.mrf.mxu0 }
 0x13c   : > { %v4658_v49 = vadd.f32 %v3331_v42, %v1224_v4  ;;  %v3333_v41 = vpop.f32.mrf.mxu1 }
 0x13d   : > { %v3351_v40 = vpop.f32.mrf.mxu0 }
 0x13e   : > { %v3397_v51 = vpop.f32.mrf.mxu1 }
 0x13f   : > { %v3352_v28 = vpop.f32.mrf.mxu0 }
 0x140   : > { %v3398_v23 = vpop.f32.mrf.mxu1  ;;  %v3353_v44 = vadd.f32 %v3352_v28, %v3351_v40 }
 0x141   : > { %v3354_v55 = vpop.f32.mrf.mxu0  ;;  %v3399_v61 = vadd.f32 %v3398_v23, %v3397_v51 }
 0x142   : > { %v3400_v62 = vpop.f32.mrf.mxu1 }
 0x143   : > { %v3355_v7 = vpop.f32.mrf.mxu0  ;;  %v1941_v3 = vadd.f32 %v3399_v61, %v3353_v44 }
 0x144   : > { %v3401_v38 = vpop.f32.mrf.mxu1  ;;  %v3356_v1 = vadd.f32 %v3355_v7, %v3354_v55 }
 0x145   : > { %v3357_v30 = vpop.f32.mrf.mxu0  ;;  %v3402_v29 = vadd.f32 %v3401_v38, %v3400_v62  ;;  %v1978_v14 = vadd.f32 %v1941_v3, %v4634_v46  ;;  %v4697_v38 = vpop.permute.xlu0 %2493  ;;  %v4702_v46 = vld [vmem:[%s4790_s2] ss:$0 sm:$0xff] }
 0x146   : > { %v3403_v21 = vpop.f32.mrf.mxu1 }
 0x147   : > { %v3358_v9 = vpop.f32.mrf.mxu0  ;;  %v1944_v41 = vadd.f32 %v3402_v29, %v3356_v1 }
 0x148   : > { %v3404_v58 = vpop.f32.mrf.mxu1 }
 0x149   : > { %v3360_v36 = vpop.f32.mrf.mxu0  ;;  %v3405_v40 = vadd.f32 %v3404_v58, %v3403_v21 }
 0x14a   : > { %v3406_v27 = vpop.f32.mrf.mxu1 }
 0x14b   : > { %v3361_v12 = vpop.f32.mrf.mxu0 }
 0x14c   : > { %v3407_v13 = vpop.f32.mrf.mxu1  ;;  %v3362_v55 = vadd.f32 %v3361_v12, %v3360_v36 }
 0x14d   : > { %v4660_v22 = vpop.f32.mrf.mxu0  ;;  %v3408_v62 = vadd.f32 %v3407_v13, %v3406_v27 }
 0x14e   : > { %v4662_v32 = vpop.f32.mrf.mxu1 }
 0x14f   : > { %v3364_v6 = vpop.f32.mrf.mxu0  ;;  %v1952_v12 = vadd.f32 %v3408_v62, %v3362_v55 }
 0x150   : > { %v3410_v43 = vpop.f32.mrf.mxu1  ;;  %v3365_v13 = vadd.f32 %v3364_v6, %v4660_v22 }
 0x151   : > { %v4664_v16 = vpop.f32.mrf.mxu0  ;;  %v3411_v1 = vadd.f32 %v3410_v43, %v4662_v32 }
 0x152   : > { %v4666_v25 = vpop.f32.mrf.mxu1 }
 0x153   : > { %v4668_v0 = vpop.f32.mrf.mxu0  ;;  %v1957_v43 = vadd.f32 %v3411_v1, %v3365_v13 }
 0x154   : > { %v4670_v52 = vpop.f32.mrf.mxu1 }
 0x155   : > { %v4672_v33 = vpop.f32.mrf.mxu0 }
 0x156   : > { %v4674_v47 = vpop.f32.mrf.mxu1 }
 0x157   : > { %v4676_v54 = vpop.f32.mrf.mxu0 }
 0x158   : > { %v4678_v60 = vpop.f32.mrf.mxu1 }
 0x159   : > { %v4680_v20 = vpop.f32.mrf.mxu0 }
 0x15a   : > { %v4682_v2 = vpop.f32.mrf.mxu1 }
 0x15b   : > { %v4684_v45 = vpop.f32.mrf.mxu0 }
 0x15c   : > { %v4686_v26 = vpop.f32.mrf.mxu1 }
 0x15d   : > { %v4688_v34 = vpop.f32.mrf.mxu0 }
 0x15e   : > { %v4690_v11 = vpop.f32.mrf.mxu1 }
 0x15f   : > { %v4692_v24 = vpop.f32.mrf.mxu0 }
 0x160   : > { %v4694_v37 = vpop.f32.mrf.mxu1 }
 0x161   : > { %v3378_v59 = vpop.f32.mrf.mxu0 }
 0x162   : > { %v3424_v35 = vpop.f32.mrf.mxu1  ;;  %v3359_v59 = vadd.f32 %v3358_v9, %v3357_v30  ;;  %v1979_v30 = vadd.f32 %v1944_v41, %v4637_v56 }
 0x163   : > { %v3379_v48 = vpop.f32.mrf.mxu0 }
 0x164   : > { %v3425_v18 = vpop.f32.mrf.mxu1  ;;  %v1949_v21 = vadd.f32 %v3405_v40, %v3359_v59  ;;  %v3368_v59 = vadd.f32 %v4668_v0, %v4664_v16  ;;  %v1982_v0 = vadd.f32 %v1957_v43, %v4646_v39 }
 0x165   : > { %v3443_v17 = vpop.f32.mrf.mxu0 }
 0x166   : > { %v3489_v50 = vpop.f32.mrf.mxu1 }
 0x167   : > { %v3444_v10 = vpop.f32.mrf.mxu0 }
 0x168   : > { %v3445_v63 = vadd.f32 %v3444_v10, %v3443_v17  ;;  %v3490_v42 = vpop.f32.mrf.mxu1  ;;  %v1980_v10 = vadd.f32 %v1949_v21, %v4640_v53  ;;  %v1981_v53 = vadd.f32 %v1952_v12, %v4643_v5 }
 0x169   : > { %v3491_v19 = vadd.f32 %v3490_v42, %v3489_v50  ;;  %v3446_v4 = vpop.f32.mrf.mxu0 }
 0x16a   : > { %v3492_v15 = vpop.f32.mrf.mxu1 }
 0x16b   : > { %v2420_v51 = vadd.f32 %v3491_v19, %v3445_v63  ;;  %v3447_v28 = vpop.f32.mrf.mxu0  ;;  %v4714_v19 = vpop.permute.xlu0 %2498 }
 0x16c   : > { %v3448_v23 = vadd.f32 %v3447_v28, %v3446_v4  ;;  %v3493_v35 = vpop.f32.mrf.mxu1  ;;  %v3414_v28 = vadd.f32 %v4670_v52, %v4666_v25  ;;  %v3417_v25 = vadd.f32 %v4678_v60, %v4674_v47  ;;  %v3374_v47 = vadd.f32 %v4684_v45, %v4680_v20 }
 0x16d   : > { %v2457_v48 = vadd.f32 %v2420_v51, %v1978_v14  ;;  %v3494_v44 = vadd.f32 %v3493_v35, %v3492_v15  ;;  %v3449_v61 = vpop.f32.mrf.mxu0  ;;  %v4723_v51 = vpop.permute.xlu1 %2503  ;;  %v3420_v60 = vadd.f32 %v4686_v26, %v4682_v2 }
 0x16e   : > { %v3495_v7 = vpop.f32.mrf.mxu1  ;;  %v1960_v21 = vadd.f32 %v3414_v28, %v3368_v59 }
 0x16f   : > { %v2423_v9 = vadd.f32 %v3494_v44, %v3448_v23  ;;  %v3450_v58 = vpop.f32.mrf.mxu0  ;;  %v4706_v50 = vadd.f32 %v4702_v46, %v2457_v48  ;;  %v1968_v26 = vadd.f32 %v3420_v60, %v3374_v47 }
 0x170   : > { %v3451_v18 = vadd.f32 %v3450_v58, %v3449_v61  ;;  %v3496_v17 = vpop.f32.mrf.mxu1 }
 0x171   : > { %v2458_v3 = vadd.f32 %v2423_v9, %v1979_v30  ;;  %v3497_v36 = vadd.f32 %v3496_v17, %v3495_v7  ;;  %v3452_v27 = vpop.f32.mrf.mxu0  ;;  %v2536_v15 = vmul.f32 %v4697_v38, %v4706_v50  ;;  %v3371_v30 = vadd.f32 %v4676_v54, %v4672_v33 }
 0x172   : > { %v3498_v29 = vpop.f32.mrf.mxu1 }
 0x173   : > { %v2428_v56 = vadd.f32 %v3497_v36, %v3451_v18  ;;  %v4712_v63 = vadd.f32 %v4702_v46, %v2458_v3  ;;  %v3453_v42 = vpop.f32.mrf.mxu0  ;;  %v4740_v3 = vpop.permute.xlu1 %2508  ;;  %v1965_v13 = vadd.f32 %v3417_v25, %v3371_v30 }
 0x174   : > { %v3454_v4 = vadd.f32 %v3453_v42, %v3452_v27  ;;  %v3499_v14 = vpop.f32.mrf.mxu1 }
 0x175   : > { %v2459_v41 = vadd.f32 %v2428_v56, %v1980_v10  ;;  %v2537_v22 = vmul.f32 %v4714_v19, %v4712_v63  ;;  %v3500_v32 = vadd.f32 %v3499_v14, %v3498_v29  ;;  %v3455_v6 = vpop.f32.mrf.mxu0  ;;  %v1983_v29 = vadd.f32 %v1960_v21, %v4649_v31  ;;  %v4752_v14 = vpop.permute.xlu0 %2513 }
 0x176   : > { %v3501_v40 = vpop.f32.mrf.mxu1  ;;  %v1984_v2 = vadd.f32 %v1965_v13, %v4652_v8  ;;  %v3377_v31 = vadd.f32 %v4692_v24, %v4688_v34  ;;  %v1985_v34 = vadd.f32 %v1968_v26, %v4655_v57 }
 0x177   : > { %v2545_v23 = vadd.f32 %v2537_v22, %v2536_v15  ;;  %v2431_v35 = vadd.f32 %v3500_v32, %v3454_v4  ;;  %v4728_v48 = vadd.f32 %v4702_v46, %v2459_v41  ;;  %v3456_v44 = vpop.f32.mrf.mxu0 }
 0x178   : > { %v3457_v61 = vadd.f32 %v3456_v44, %v3455_v6  ;;  %v3502_v55 = vpop.f32.mrf.mxu1 }
 0x179   : > { %v2460_v62 = vadd.f32 %v2431_v35, %v1981_v53  ;;  %v2538_v5 = vmul.f32 %v4723_v51, %v4728_v48  ;;  %v3503_v7 = vadd.f32 %v3502_v55, %v3501_v40  ;;  %v3458_v16 = vpop.f32.mrf.mxu0  ;;  %v3423_v53 = vadd.f32 %v4694_v37, %v4690_v11 }
 0x17a   : > { %v3504_v52 = vpop.f32.mrf.mxu1 }
 0x17b   : > { %v2546_v9 = vadd.f32 %v2545_v23, %v2538_v5  ;;  %v2436_v58 = vadd.f32 %v3503_v7, %v3457_v61  ;;  %v4738_v18 = vadd.f32 %v4702_v46, %v2460_v62  ;;  %v3459_v17 = vpop.f32.mrf.mxu0  ;;  %v4762_v23 = vpop.permute.xlu1 %2518  ;;  %v1973_v5 = vadd.f32 %v3423_v53, %v3377_v31 }
 0x17c   : > { %v3460_v36 = vadd.f32 %v3459_v17, %v3458_v16  ;;  %v3505_v27 = vpop.f32.mrf.mxu1 }
 0x17d   : > { %v2461_v12 = vadd.f32 %v2436_v58, %v1982_v0  ;;  %v2539_v39 = vmul.f32 %v4740_v3, %v4738_v18  ;;  %v3506_v33 = vadd.f32 %v3505_v27, %v3504_v52  ;;  %v3461_v54 = vpop.f32.mrf.mxu0  ;;  %v2524_v0 = vpop.permute.xlu0 %2523 }
 0x17e   : > { %v3507_v1 = vpop.f32.mrf.mxu1 }
 0x17f   : > { %v4750_v10 = vadd.f32 %v4702_v46, %v2461_v12  ;;  %v2547_v56 = vadd.f32 %v2546_v9, %v2539_v39  ;;  %v2439_v42 = vadd.f32 %v3506_v33, %v3460_v36  ;;  %v3462_v4 = vpop.f32.mrf.mxu0  ;;  %v1986_v36 = vadd.f32 %v1973_v5, %v4658_v49  ;;  %v2529_v33 = vpop.permute.xlu1 %2528 }
 0x180   : > { %v3463_v15 = vadd.f32 %v3462_v4, %v3461_v54  ;;  %v3508_v41 = vpop.f32.mrf.mxu1 }
 0x181   : > { %v2462_v22 = vadd.f32 %v2439_v42, %v1983_v29  ;;  %v2540_v20 = vmul.f32 %v4752_v14, %v4750_v10  ;;  %v3509_v45 = vadd.f32 %v3508_v41, %v3507_v1  ;;  %v3464_v32 = vpop.f32.mrf.mxu0  ;;  %v2534_v29 = vpop.permute.xlu0 %2533 }
 0x182   : > { %v3510_v6 = vpop.f32.mrf.mxu1 }
 0x183   : > { %v2478_v43 = vadd.f32 %v4702_v46, %v2462_v22  ;;  %v2548_v59 = vadd.f32 %v2547_v56, %v2540_v20  ;;  %v2444_v40 = vadd.f32 %v3509_v45, %v3463_v15  ;;  %v3465_v28 = vpop.f32.mrf.mxu0 }
 0x184   : > { %v3466_v35 = vadd.f32 %v3465_v28, %v3464_v32  ;;  %v3511_v44 = vpop.f32.mrf.mxu1 }
 0x185   : > { %v2541_v61 = vmul.f32 %v4762_v23, %v2478_v43  ;;  %v2463_v8 = vadd.f32 %v2444_v40, %v1984_v2  ;;  %v3512_v55 = vadd.f32 %v3511_v44, %v3510_v6  ;;  %v3467_v62 = vpop.f32.mrf.mxu0 }
 0x186   : > { %v3513_v24 = vpop.f32.mrf.mxu1 }
 0x187   : > { %v2549_v7 = vadd.f32 %v2548_v59, %v2541_v61  ;;  %v2479_v11 = vadd.f32 %v4702_v46, %v2463_v8  ;;  %v2447_v37 = vadd.f32 %v3512_v55, %v3466_v35  ;;  %v3468_v16 = vpop.f32.mrf.mxu0 }
 0x188   : > { %v3469_v30 = vadd.f32 %v3468_v16, %v3467_v62  ;;  %v3514_v25 = vpop.f32.mrf.mxu1 }
 0x189   : > { %v2542_v52 = vmul.f32 %v2524_v0, %v2479_v11  ;;  %v2464_v21 = vadd.f32 %v2447_v37, %v1985_v34  ;;  %v3515_v9 = vadd.f32 %v3514_v25, %v3513_v24  ;;  %v3470_v58 = vpop.f32.mrf.mxu0 }
 0x18a   : > { %v3516_v17 = vpop.f32.mrf.mxu1 }
 0x18b   : > { %v2550_v27 = vadd.f32 %v2549_v7, %v2542_v52  ;;  %v2480_v57 = vadd.f32 %v4702_v46, %v2464_v21  ;;  %v2452_v12 = vadd.f32 %v3515_v9, %v3469_v30  ;;  %v3471_v39 = vpop.f32.mrf.mxu0 }
 0x18c   : > { %v3517_v54 = vpop.f32.mrf.mxu1 }
 0x18d   : > { %v2543_v13 = vmul.f32 %v2529_v33, %v2480_v57  ;;  %v2465_v47 = vadd.f32 %v2452_v12, %v1986_v36 }
 0x18f   : > { %v2551_v60 = vadd.f32 %v2550_v27, %v2543_v13  ;;  %v2481_v1 = vadd.f32 %v4702_v46, %v2465_v47 }
 0x191   : > { %v2544_v56 = vmul.f32 %v2534_v29, %v2481_v1 }
 0x193   : > { %v2552_v42 = vadd.f32 %v2551_v60, %v2544_v56 }
 0x195   : > { %v2553_v4 = vrot.slane %v2552_v42, 4 }
 0x197   : > { %v2554_v15 = vadd.f32 %v2553_v4, %v2552_v42 }
 0x199   : > { %v2555_v41 = vrot.slane %v2554_v15, 2 }
 0x19b   : > { %v2556_v22 = vadd.f32 %v2555_v41, %v2554_v15 }
 0x19d   : > { %v2557_v49 = vrot.slane %v2556_v22, 1 }
 0x19f   : > { %v2558_v20 = vadd.f32 %v2557_v49, %v2556_v22 }
 0x1a1   : > { %v2559_v45 = vmul.f32 0.015625, %v2558_v20 }
 0x1a3   : > { %v2560_v32 = vsub.f32 %v4706_v50, %v2559_v45  ;;  %v2561_v2 = vsub.f32 %v4712_v63, %v2559_v45  ;;  %v2562_v26 = vsub.f32 %v4728_v48, %v2559_v45  ;;  %v2563_v31 = vsub.f32 %v4738_v18, %v2559_v45 }
 0x1a4   : > { %v2564_v46 = vsub.f32 %v4750_v10, %v2559_v45  ;;  %v2565_v6 = vsub.f32 %v2478_v43, %v2559_v45  ;;  %v2566_v53 = vsub.f32 %v2479_v11, %v2559_v45  ;;  %v2567_v59 = vsub.f32 %v2480_v57, %v2559_v45 }
 0x1a5   : > { %v2568_v40 = vsub.f32 %v2481_v1, %v2559_v45  ;;  %v2569_v28 = vmul.f32 %v2560_v32, %v2560_v32  ;;  %v2570_v35 = vmul.f32 %v2561_v2, %v2561_v2  ;;  %v2571_v44 = vmul.f32 %v2562_v26, %v2562_v26 }
 0x1a6   : > { %v2572_v61 = vmul.f32 %v2563_v31, %v2563_v31  ;;  %v2573_v55 = vmul.f32 %v2564_v46, %v2564_v46  ;;  %v2574_v62 = vmul.f32 %v2565_v6, %v2565_v6  ;;  %v2575_v43 = vmul.f32 %v2566_v53, %v2566_v53 }
 0x1a7   : > { %v2578_v8 = vmul.f32 %v2569_v28, %v4697_v38  ;;  %v2579_v50 = vmul.f32 %v2570_v35, %v4714_v19  ;;  %v2580_v63 = vmul.f32 %v2571_v44, %v4723_v51  ;;  %v2576_v5 = vmul.f32 %v2567_v59, %v2567_v59 }
 0x1a8   : > { %v2581_v18 = vmul.f32 %v2572_v61, %v4740_v3  ;;  %v2582_v34 = vmul.f32 %v2573_v55, %v4752_v14  ;;  %v2583_v7 = vmul.f32 %v2574_v62, %v4762_v23  ;;  %v2577_v37 = vmul.f32 %v2568_v40, %v2568_v40 }
 0x1a9   : > { %v2587_v48 = vadd.f32 %v2579_v50, %v2578_v8  ;;  %v2584_v38 = vmul.f32 %v2575_v43, %v2524_v0  ;;  %v2585_v19 = vmul.f32 %v2576_v5, %v2529_v33 }
 0x1aa   : > { %v2586_v25 = vmul.f32 %v2577_v37, %v2534_v29 }
 0x1ab   : > { %v2588_v10 = vadd.f32 %v2587_v48, %v2580_v63 }
 0x1ad   : > { %v2589_v24 = vadd.f32 %v2588_v10, %v2581_v18 }
 0x1af   : > { %v2590_v11 = vadd.f32 %v2589_v24, %v2582_v34 }
 0x1b1   : > { %v2591_v16 = vadd.f32 %v2590_v11, %v2583_v7 }
 0x1b3   : > { %v2592_v30 = vadd.f32 %v2591_v16, %v2584_v38 }
 0x1b5   : > { %v2593_v51 = vadd.f32 %v2592_v30, %v2585_v19 }
 0x1b7   : > { %v2594_v52 = vadd.f32 %v2593_v51, %v2586_v25 }
 0x1b9   : > { %v2595_v21 = vrot.slane %v2594_v52, 4 }
 0x1bb   : > { %v2596_v3 = vadd.f32 %v2595_v21, %v2594_v52 }
 0x1bd   : > { %v2597_v9 = vrot.slane %v2596_v3, 2 }
 0x1bf   : > { %v2598_v58 = vadd.f32 %v2597_v9, %v2596_v3 }
 0x1c1   : > { %v2599_v17 = vrot.slane %v2598_v58, 1 }
 0x1c3   : > { %v2600_v14 = vadd.f32 %v2599_v17, %v2598_v58 }
 0x1c5   : > { %v2601_v36 = vmul.f32 0.015625, %v2600_v14 }
 0x1c7   : > { %v2602_v27 = vadd.f32 1e-05, %v2601_v36 }
 0x1c9   : > { %3710 = vrsqrt.f32 %v2602_v27 }
 0x1d6   : > { %v3711_v23 = vpop.eup %3710 }
 0x1d7   : > { %v2604_v57 = vmul.f32 %v3711_v23, %v2560_v32  ;;  %v2605_v12 = vmul.f32 %v3711_v23, %v2561_v2  ;;  %v2606_v0 = vmul.f32 %v3711_v23, %v2562_v26  ;;  %v2607_v39 = vmul.f32 %v3711_v23, %v2563_v31 }
 0x1d8   : > { %v2608_v33 = vmul.f32 %v3711_v23, %v2564_v46  ;;  %v2609_v54 = vmul.f32 %v3711_v23, %v2565_v6  ;;  %v2610_v13 = vmul.f32 %v3711_v23, %v2566_v53  ;;  %v2611_v47 = vmul.f32 %v3711_v23, %v2567_v59 }
 0x1d9   : > { %v2612_v60 = vmul.f32 %v3711_v23, %v2568_v40  ;;  %v2613_v1 = vmul.f32 0.2, %v2604_v57  ;;  %v2614_v29 = vmul.f32 0.2, %v2605_v12  ;;  %v2615_v56 = vmul.f32 0.2, %v2606_v0 }
 0x1da   : > { %v2616_v42 = vmul.f32 0.2, %v2607_v39  ;;  %v2617_v4 = vmul.f32 0.2, %v2608_v33  ;;  %v2618_v15 = vmul.f32 0.2, %v2609_v54 }
 0x1db   : > { %v2619_v41 = vmul.f32 0.2, %v2610_v13  ;;  %v2620_v22 = vmul.f32 0.2, %v2611_v47  ;;  %v2621_v49 = vmul.f32 0.2, %v2612_v60  ;;  %v2622_v20 = vmax.f32 %v2604_v57, %v2613_v1 }
 0x1dc   : > { %v2623_v45 = vmax.f32 %v2605_v12, %v2614_v29  ;;  %v2624_v32 = vmax.f32 %v2606_v0, %v2615_v56  ;;  %v2625_v2 = vmax.f32 %v2607_v39, %v2616_v42  ;;  %v2626_v26 = vmax.f32 %v2608_v33, %v2617_v4 }
 0x1dd   : > { %v2627_v31 = vmax.f32 %v2609_v54, %v2618_v15  ;;  %v2628_v46 = vmax.f32 %v2610_v13, %v2619_v41  ;;  %v2629_v6 = vmax.f32 %v2611_v47, %v2620_v22  ;;  %v2630_v53 = vmax.f32 %v2612_v60, %v2621_v49 }
 0x1de   : > { %v3131_v59 = vpack.c.bf16 %v2623_v45, %v2622_v20  ;;  %v3136_v40 = vpack.c.bf16 %v2625_v2, %v2624_v32 }
 0x1df   : > { %v3127_v28 = vpack.c.bf16 %v2630_v53, %v2630_v53  ;;  %v3141_v35 = vpack.c.bf16 %v2627_v31, %v2626_v26  ;;  %v3146_v44 = vpack.c.bf16 %v2629_v6, %v2628_v46 }
 0x1e0   : > { %3132 = vst [vmem:[%s197_s19] sm:$0xff] %v3131_v59   ;;  %3148 = vst [vmem:[%s197_s19 + $0x8] sm:$0xff] %v3136_v40  }
 0x1e1   : > { %3149 = vst [vmem:[%s197_s19 + $0x10] sm:$0xff] %v3141_v35   ;;  %3150 = vst [vmem:[%s197_s19 + $0x18] sm:$0xff] %v3146_v44  }
 0x1e2   : > { %2676 = vst [vmem:[%s197_s19 + $0x20] sm:$0xf] %v3127_v28 }
 0x1e3 PF: > { %s14_s15 = sadd.s32 1, %s3720_s15  }
 0x1e4   : > { %p11_p4 = scmp.ge.s32.totalorder %s14_s15, 4  }
 0x1e6   :  { %13 = sbr.rel (!%p11_p4) target bundleno = 1 (0x1), region = 69 }

// kernel: colormap_discriminator_forward.6
= control target key start
LH: loop header
LB: loop body
LE: loop exit
PB: predicated region body
PF: predicated region fallthrough
CT: control target
= control target key end

     0   :  { %s2591_s15 = smov 0   ;;  %s3055_s0 = inlined_call_operand.vmem [shape: bf16[2,17,512], index: 0, kind: input, shape index: {}]   ;;  %s3056_s1 = inlined_call_operand.vmem [shape: bf16[4,512,128], index: 1, kind: input, shape index: {}]   ;;  %s3057_s2 = inlined_call_operand.vmem [shape: f32[1,128], index: 2, kind: input, shape index: {}]   ;;  %s3058_s3 = inlined_call_operand.vmem [shape: f32[1,12,1], index: 3, kind: input, shape index: {}]   ;;  %s3059_s4 = inlined_call_operand.vmem [shape: bf16[2,12,128], index: 4, kind: output, shape index: {}]  }
   0x1 LB: > { %s1864_s16 = sadd.s32 4294967295, %s2563_s15   ;;  %p1868_p0 = scmp.ge.s32.totalorder %s2563_s15, 1  ;;  %s2563_s15 = sphi %s2591_s15, %s14_s15  }
   0x2   : > { %p162_p1 = scmp.lt.s32.totalorder %s2563_s15, 3 }
   0x4   : > { %p163_p2 = pnand %p1868_p0, %p162_p1 }
   0x5   : > { %p188_p3 = scmp.lt.s32.totalorder (!%p163_p2), %s1864_s16, 1 }
   0x6   : > { %166 = sbr.rel (%p163_p2) target bundleno = 416 (0x1a0), region = 36 }
   0xb   : > { %v2407_v0 = vld [vmem:[%s3056_s1 + $0x178] sm:$0xff]   ;;  %v2411_v4 = vld [vmem:[%s3056_s1 + $0x170] sm:$0xff]   ;;  %v2415_v8 = vld [vmem:[%s3056_s1 + $0x168] sm:$0xff]   ;;  %v2565_v21 = vmov 0   ;;  %s3061_s16 = smov (!%p188_p3, %s1864_s16), 1  ;;  %vm1766_vm1 = vcmask 1043456  }
   0xc   : > { %v2408_v1 = vld [vmem:[%s3056_s1 + $0x1f8] sm:$0xff]   ;;  %2220 = vmatprep.subr.bf16.mxu0 %v2407_v0  ;;  %v2412_v5 = vld [vmem:[%s3056_s1 + $0x1f0] sm:$0xff]   ;;  %v2416_v9 = vld [vmem:[%s3056_s1 + $0x1e8] sm:$0xff]   ;;  %2406 = vset.pattern.permute.xlu0 %v2565_v21  ;;  %s2396_s21 = smul.u32 48, %s3061_s16  ;;  %vm1410_vm0 = vsmask.f32 5376 }
   0xd   : > { %v2409_v2 = vld [vmem:[%s3056_s1 + $0x138] sm:$0xff]   ;;  %2242 = vmatprep.subr.bf16.mxu1 %v2408_v1  ;;  %v2413_v6 = vld [vmem:[%s3056_s1 + $0x130] sm:$0xff]   ;;  %v2417_v10 = vld [vmem:[%s3056_s1 + $0x128] sm:$0xff]   ;;  %s2217_s26 = sshll.u32 %s3061_s16, 3 }
   0xe   : > { %v2410_v3 = vld [vmem:[%s3056_s1 + $0x1b8] sm:$0xff]   ;;  %2221 = vmatpush3.bf16.msra.mxu0 %v2409_v2  ;;  %v2414_v7 = vld [vmem:[%s3056_s1 + $0x1b0] sm:$0xff]   ;;  %v2418_v11 = vld [vmem:[%s3056_s1 + $0x1a8] sm:$0xff]   ;;  %s2699_s6 = scalar_lea.vmem %s3055_s0, %s2396_s21  ;;  %s197_s29 = scalar_lea.vmem %s3059_s4, %s2217_s26 }
   0xf   : > { %2243 = vmatpush3.bf16.msra.mxu1 %v2410_v3  ;;  %2222 = vmatprep.subr.bf16.mxu0 %v2411_v4  ;;  %v2419_v12 = vld [vmem:[%s3056_s1 + $0x160] sm:$0xff]   ;;  %v2423_v16 = vld [vmem:[%s3056_s1 + $0x158] sm:$0xff]   ;;  %v2427_v20 = vld [vmem:[%s3056_s1 + $0x150] sm:$0xff]  }
  0x10   : > { %2244 = vmatprep.subr.bf16.mxu1 %v2412_v5  ;;  %v2420_v13 = vld [vmem:[%s3056_s1 + $0x1e0] sm:$0xff]   ;;  %v2424_v17 = vld [vmem:[%s3056_s1 + $0x1d8] sm:$0xff]   ;;  %v2428_v22 = vld [vmem:[%s3056_s1 + $0x1d0] sm:$0xff]  }
  0x11   : > { %v2421_v14 = vld [vmem:[%s3056_s1 + $0x120] sm:$0xff]   ;;  %v2425_v18 = vld [vmem:[%s3056_s1 + $0x118] sm:$0xff]   ;;  %v2429_v23 = vld [vmem:[%s3056_s1 + $0x110] sm:$0xff]  }
  0x12   : > { %2223 = vmatpush3.bf16.msra.mxu0 %v2413_v6  ;;  %v2422_v15 = vld [vmem:[%s3056_s1 + $0x1a0] sm:$0xff]   ;;  %v2426_v19 = vld [vmem:[%s3056_s1 + $0x198] sm:$0xff]   ;;  %v2430_v24 = vld [vmem:[%s3056_s1 + $0x190] sm:$0xff]  }
  0x13   : > { %2245 = vmatpush3.bf16.msra.mxu1 %v2414_v7  ;;  %2224 = vmatprep.subr.bf16.mxu0 %v2415_v8  ;;  %v2431_v25 = vld [vmem:[%s3056_s1 + $0x148] sm:$0xff]   ;;  %v2435_v29 = vld [vmem:[%s3056_s1 + $0x140] sm:$0xff]   ;;  %v267_v34 = vld [vmem:[%s2699_s6 + $0x10] sm:$0x77] }
  0x14   : > { %2246 = vmatprep.subr.bf16.mxu1 %v2416_v9  ;;  %v2432_v26 = vld [vmem:[%s3056_s1 + $0x1c8] sm:$0xff]   ;;  %v2436_v30 = vld [vmem:[%s3056_s1 + $0x1c0] sm:$0xff]   ;;  %v268_v38 = vld [vmem:[%s2699_s6 + $0x18] sm:$0x77] }
  0x15   : > { %v2433_v27 = vld [vmem:[%s3056_s1 + $0x108] sm:$0xff]   ;;  %v2437_v31 = vld [vmem:[%s3056_s1 + $0x100] sm:$0xff]   ;;  %v2443_v41 = vld [vmem:[%s3056_s1 + $0x78] sm:$0xff]  }
  0x16   : > { %2225 = vmatpush3.bf16.msra.mxu0 %v2417_v10  ;;  %v2434_v28 = vld [vmem:[%s3056_s1 + $0x188] sm:$0xff]   ;;  %v2438_v32 = vld [vmem:[%s3056_s1 + $0x180] sm:$0xff]   ;;  %v2444_v46 = vld [vmem:[%s3056_s1 + $0xf8] sm:$0xff]  }
  0x17   : > { %2247 = vmatpush3.bf16.msra.mxu1 %v2418_v11  ;;  %2226 = vmatprep.subr.bf16.mxu0 %v2419_v12  ;;  %v2708_v33 = vld [vmem:[%s2699_s6] sm:$0xff]  ;;  %v2712_v35 = vld [vmem:[%s2699_s6 + $0x8] sm:$0xff]  ;;  %v2445_v53 = vld [vmem:[%s3056_s1 + $0x38] sm:$0xff]  }
  0x18   : > { %2248 = vmatprep.subr.bf16.mxu1 %v2420_v13  ;;  %v1936_v36 = vcombine.low %v2708_v33, %v267_v34  ;;  %v1937_v37 = vcombine.high %v2708_v33, %v267_v34  ;;  %v1938_v39 = vcombine.low %v2712_v35, %v268_v38  ;;  %v1939_v40 = vcombine.high %v2712_v35, %v268_v38  ;;  %v2446_v56 = vld [vmem:[%s3056_s1 + $0xb8] sm:$0xff]   ;;  %v2447_v57 = vld [vmem:[%s3056_s1 + $0x70] sm:$0xff]   ;;  %v2451_v1 = vld [vmem:[%s3056_s1 + $0x68] sm:$0xff]  }
  0x19   : > { %v2448_v62 = vld [vmem:[%s3056_s1 + $0xf0] sm:$0xff]   ;;  %v2452_v2 = vld [vmem:[%s3056_s1 + $0xe8] sm:$0xff]   ;;  %v2455_v5 = vld [vmem:[%s3056_s1 + $0x60] sm:$0xff]  }
  0x1a   : > { %2227 = vmatpush3.bf16.msra.mxu0 %v2421_v14  ;;  %v358_v42 = vshrl.u32 %v1937_v37, 16  ;;  %v360_v43 = vshll.u32 %v1937_v37, 16  ;;  %v351_v44 = vshrl.u32 %v1936_v36, 16  ;;  %v353_v45 = vshll.u32 %v1936_v36, 16  ;;  %v2449_v63 = vld [vmem:[%s3056_s1 + $0x30] sm:$0xff]   ;;  %v2453_v3 = vld [vmem:[%s3056_s1 + $0x28] sm:$0xff]  }
  0x1b   : > { %2249 = vmatpush3.bf16.msra.mxu1 %v2422_v15  ;;  %2228 = vmatprep.subr.bf16.mxu0 %v2423_v16  ;;  %v372_v47 = vshrl.u32 %v1939_v40, 16  ;;  %v374_v48 = vshll.u32 %v1939_v40, 16  ;;  %v365_v49 = vshrl.u32 %v1938_v39, 16  ;;  %v367_v50 = vshll.u32 %v1938_v39, 16  ;;  %v2450_v0 = vld [vmem:[%s3056_s1 + $0xb0] sm:$0xff]   ;;  %v2454_v4 = vld [vmem:[%s3056_s1 + $0xa8] sm:$0xff]  }
  0x1c   : > { %2250 = vmatprep.subr.bf16.mxu1 %v2424_v17  ;;  %v362_v51 = vrot.slane %v360_v43, 1  ;;  %v355_v52 = vrot.slane %v353_v45, 1  ;;  %v2456_v6 = vld [vmem:[%s3056_s1 + $0xe0] sm:$0xff]   ;;  %v2459_v9 = vld [vmem:[%s3056_s1 + $0x58] sm:$0xff]   ;;  %v2463_v13 = vld [vmem:[%s3056_s1 + $0x50] sm:$0xff]  }
  0x1d   : > { %v376_v54 = vrot.slane %v374_v48, 1  ;;  %v369_v55 = vrot.slane %v367_v50, 1  ;;  %v2457_v7 = vld [vmem:[%s3056_s1 + $0x20] sm:$0xff]   ;;  %v2460_v10 = vld [vmem:[%s3056_s1 + $0xd8] sm:$0xff]   ;;  %v2464_v14 = vld [vmem:[%s3056_s1 + $0xd0] sm:$0xff]  }
  0x1e   : > { %2229 = vmatpush3.bf16.msra.mxu0 %v2425_v18  ;;  %v363_v58 = vor.u32 %v362_v51, %v358_v42  ;;  %v356_v59 = vor.u32 %v355_v52, %v351_v44  ;;  %v2458_v8 = vld [vmem:[%s3056_s1 + $0xa0] sm:$0xff]   ;;  %v2461_v11 = vld [vmem:[%s3056_s1 + $0x18] sm:$0xff]   ;;  %v2465_v15 = vld [vmem:[%s3056_s1 + $0x10] sm:$0xff]  }
  0x1f   : > { %2251 = vmatpush3.bf16.msra.mxu1 %v2426_v19  ;;  %2230 = vmatprep.subr.bf16.mxu0 %v2427_v20  ;;  %v377_v60 = vor.u32 %v376_v54, %v372_v47  ;;  %v370_v61 = vor.u32 %v369_v55, %v365_v49  ;;  %v2462_v12 = vld [vmem:[%s3056_s1 + $0x98] sm:$0xff]   ;;  %v2466_v16 = vld [vmem:[%s3056_s1 + $0x90] sm:$0xff]   ;;  %v2467_v17 = vld [vmem:[%s3056_s1 + $0x48] sm:$0xff]  }
  0x20   : > { %2252 = vmatprep.subr.bf16.mxu1 %v2428_v22  ;;  %606 = vmatprep.mubr.bf16.mxu0 %v363_v58  ;;  %v2468_v18 = vld [vmem:[%s3056_s1 + $0xc8] sm:$0xff]   ;;  %v2471_v21 = vld [vmem:[%s3056_s1 + $0x40] sm:$0xff]   ;;  %v2482_v36 = vld [vmem:[%s3056_s1 + $0x2b8] sm:$0xff]  }
  0x21   : > { %647 = vmatprep.mubr.bf16.mxu1 %v377_v60  ;;  %v2469_v19 = vld [vmem:[%s3056_s1 + $0x8] sm:$0xff]   ;;  %v2472_v22 = vld [vmem:[%s3056_s1 + $0xc0] sm:$0xff]   ;;  %v2483_v37 = vld [vmem:[%s3056_s1 + $0x270] sm:$0xff]  }
  0x22   : > { %2231 = vmatpush3.bf16.msra.mxu0 %v2429_v23  ;;  %v2470_v20 = vld [vmem:[%s3056_s1 + $0x88] sm:$0xff]   ;;  %v2473_v23 = vld [vmem:[%s3056_s1] sm:$0xff]   ;;  %v2486_v38 = vld [vmem:[%s3056_s1 + $0x2b0] sm:$0xff]  }
  0x23   : > { %2253 = vmatpush3.bf16.msra.mxu1 %v2430_v24  ;;  %2232 = vmatprep.subr.bf16.mxu0 %v2431_v25  ;;  %v2474_v24 = vld [vmem:[%s3056_s1 + $0x80] sm:$0xff]   ;;  %v201_v25 = vld [vmem:[%s2699_s6 + $0x10] sm:$0x33]  ;;  %v2487_v39 = vld [vmem:[%s3056_s1 + $0x268] sm:$0xff]  }
  0x24   : > { %2254 = vmatprep.subr.bf16.mxu1 %v2432_v26  ;;  %v1973_v26 = vcombine.high %v2708_v33, %v201_v25  ;;  %v2488_v40 = vld [vmem:[%s3056_s1 + $0x2e8] sm:$0xff]   ;;  %v2491_v43 = vld [vmem:[%s3056_s1 + $0x260] sm:$0xff]   ;;  %v2495_v47 = vld [vmem:[%s3056_s1 + $0x258] sm:$0xff]  }
  0x25   : > { %v2490_v42 = vld [vmem:[%s3056_s1 + $0x2a8] sm:$0xff]   ;;  %v2492_v44 = vld [vmem:[%s3056_s1 + $0x2e0] sm:$0xff]   ;;  %v2496_v48 = vld [vmem:[%s3056_s1 + $0x2d8] sm:$0xff]  }
  0x26   : > { %2233 = vmatpush3.bf16.msra.mxu0 %v2433_v27  ;;  %v202_v27 = vld [vmem:[%s2699_s6 + $0x18] sm:$0x33]  ;;  %v2493_v45 = vld [vmem:[%s3056_s1 + $0x220] sm:$0xff]   ;;  %v2499_v51 = vld [vmem:[%s3056_s1 + $0x250] sm:$0xff]  }
  0x27   : > { %2255 = vmatpush3.bf16.msra.mxu1 %v2434_v28  ;;  %2234 = vmatprep.subr.bf16.mxu0 %v2435_v29  ;;  %v1975_v28 = vcombine.high %v2712_v35, %v202_v27  ;;  %v2479_v29 = vld [vmem:[%s3056_s1 + $0x278] sm:$0xff]   ;;  %v1974_v34 = vcombine.low %v2712_v35, %v202_v27  ;;  %v2485_v35 = vld [vmem:[%s3056_s1 + $0x230] sm:$0xff]   ;;  %v2503_v55 = vld [vmem:[%s3056_s1 + $0x248] sm:$0xff]  }
  0x28   : > { %2256 = vmatprep.subr.bf16.mxu1 %v2436_v30  ;;  %v2480_v30 = vld [vmem:[%s3056_s1 + $0x2f8] sm:$0xff]   ;;  %v2500_v52 = vld [vmem:[%s3056_s1 + $0x2d0] sm:$0xff]   ;;  %v2506_v58 = vld [vmem:[%s3056_s1 + $0x288] sm:$0xff]  }
  0x29   : > { %v2497_v49 = vld [vmem:[%s3056_s1 + $0x218] sm:$0xff]   ;;  %v2502_v54 = vld [vmem:[%s3056_s1 + $0x290] sm:$0xff]   ;;  %v2508_v60 = vld [vmem:[%s3056_s1 + $0x2c0] sm:$0xff]  }
  0x2a   : > { %2235 = vmatpush3.bf16.msra.mxu0 %v2437_v31  ;;  %v1972_v31 = vcombine.low %v2708_v33, %v201_v25  ;;  %v2484_v33 = vld [vmem:[%s3056_s1 + $0x2f0] sm:$0xff]   ;;  %v2498_v50 = vld [vmem:[%s3056_s1 + $0x298] sm:$0xff]   ;;  %v2529_v25 = vld [vmem:[%s3056_s1 + $0x320] sm:$0xff]  }
  0x2b   : > { %2257 = vmatpush3.bf16.msra.mxu1 %v2438_v32  ;;  %2264 = vmatprep.subr.bf16.mxu0 %v2443_v41  ;;  %v2481_v32 = vld [vmem:[%s3056_s1 + $0x238] sm:$0xff]   ;;  %v2489_v41 = vld [vmem:[%s3056_s1 + $0x228] sm:$0xff]  }
  0x2c   : > { %2286 = vmatprep.subr.bf16.mxu1 %v2444_v46  ;;  %v2494_v46 = vld [vmem:[%s3056_s1 + $0x2a0] sm:$0xff]   ;;  %v2531_v27 = vld [vmem:[%s3056_s1 + $0x358] sm:$0xff]  }
  0x2d   : > { %607 = vmatmul.mubr.bf16.vlgmr.msra.gmra.mxu0 %v356_v59  ;;  %v2507_v59 = vld [vmem:[%s3056_s1 + $0x240] sm:$0xff]  }
  0x2e   : > { %648 = vmatmul.mubr.bf16.vlgmr.msra.gmra.mxu1 %v370_v61  ;;  %2265 = vmatpush3.bf16.msra.mxu0 %v2445_v53  ;;  %v2501_v53 = vld [vmem:[%s3056_s1 + $0x210] sm:$0xff]   ;;  %v2509_v61 = vld [vmem:[%s3056_s1 + $0x200] sm:$0xff]  }
  0x2f   : > { %2287 = vmatpush3.bf16.msra.mxu1 %v2446_v56  ;;  %2266 = vmatprep.subr.bf16.mxu0 %v2447_v57  ;;  %v2504_v56 = vld [vmem:[%s3056_s1 + $0x2c8] sm:$0xff]  }
  0x30   : > { %2288 = vmatprep.subr.bf16.mxu1 %v2448_v62  ;;  %894 = vmatprep.mubr.bf16.mxu0 %v1973_v26  ;;  %v2505_v57 = vld [vmem:[%s3056_s1 + $0x208] sm:$0xff]   ;;  %v2510_v62 = vld [vmem:[%s3056_s1 + $0x280] sm:$0xff]  }
  0x31   : > { %935 = vmatprep.mubr.bf16.mxu1 %v1975_v28  ;;  %v2530_v26 = vld [vmem:[%s3056_s1 + $0x3a0] sm:$0xff]   ;;  %v2532_v28 = vld [vmem:[%s3056_s1 + $0x3d8] sm:$0xff]  }
  0x32   : > { %2267 = vmatpush3.bf16.msra.mxu0 %v2449_v63  ;;  %v944_v63 = vld [vmem:[%s2699_s6] sm:$0xcc] }
  0x33   : > { %2289 = vmatpush3.bf16.msra.mxu1 %v2450_v0  ;;  %2268 = vmatprep.subr.bf16.mxu0 %v2451_v1  ;;  %v2919_v0 = vld [vmem:[%s2699_s6 + $0x10] sm:$0xff] }
  0x34   : > { %2290 = vmatprep.subr.bf16.mxu1 %v2452_v2  ;;  %v2072_v1 = vcombine.low %v944_v63, %v2919_v0  ;;  %v2073_v2 = vcombine.high %v944_v63, %v2919_v0 }
  0x36   : > { %2269 = vmatpush3.bf16.msra.mxu0 %v2453_v3  ;;  %v945_v3 = vld [vmem:[%s2699_s6 + $0x8] sm:$0xcc] }
  0x37   : > { %2291 = vmatpush3.bf16.msra.mxu1 %v2454_v4  ;;  %2270 = vmatprep.subr.bf16.mxu0 %v2455_v5  ;;  %v2925_v4 = vld [vmem:[%s2699_s6 + $0x18] sm:$0xff] }
  0x38   : > { %2292 = vmatprep.subr.bf16.mxu1 %v2456_v6  ;;  %v2074_v5 = vcombine.low %v945_v3, %v2925_v4  ;;  %v2075_v6 = vcombine.high %v945_v3, %v2925_v4 }
  0x3a   : > { %2271 = vmatpush3.bf16.msra.mxu0 %v2457_v7  ;;  %v2515_v7 = vld [vmem:[%s3056_s1 + $0x378] sm:$0xff]  }
  0x3b   : > { %2293 = vmatpush3.bf16.msra.mxu1 %v2458_v8  ;;  %2272 = vmatprep.subr.bf16.mxu0 %v2459_v9  ;;  %v1029_v8 = vrot.slane %v2072_v1, 2  ;;  %v1030_v9 = vrot.slane %v2073_v2, 2 }
  0x3c   : > { %2294 = vmatprep.subr.bf16.mxu1 %v2460_v10  ;;  %v2516_v10 = vld [vmem:[%s3056_s1 + $0x3f8] sm:$0xff]  }
  0x3e   : > { %2273 = vmatpush3.bf16.msra.mxu0 %v2461_v11  ;;  %v2517_v11 = vld [vmem:[%s3056_s1 + $0x338] sm:$0xff]  }
  0x3f   : > { %2295 = vmatpush3.bf16.msra.mxu1 %v2462_v12  ;;  %2274 = vmatprep.subr.bf16.mxu0 %v2463_v13  ;;  %v1031_v12 = vrot.slane %v2074_v5, 2  ;;  %v1032_v13 = vrot.slane %v2075_v6, 2 }
  0x40   : > { %2296 = vmatprep.subr.bf16.mxu1 %v2464_v14  ;;  %v2518_v14 = vld [vmem:[%s3056_s1 + $0x3b8] sm:$0xff]  }
  0x42   : > { %2275 = vmatpush3.bf16.msra.mxu0 %v2465_v15  ;;  %v2519_v15 = vld [vmem:[%s3056_s1 + $0x370] sm:$0xff]  }
  0x43   : > { %2297 = vmatpush3.bf16.msra.mxu1 %v2466_v16  ;;  %2276 = vmatprep.subr.bf16.mxu0 %v2467_v17  ;;  %v2520_v16 = vld [vmem:[%s3056_s1 + $0x3f0] sm:$0xff]  }
  0x44   : > { %2298 = vmatprep.subr.bf16.mxu1 %v2468_v18  ;;  %v2521_v17 = vld [vmem:[%s3056_s1 + $0x330] sm:$0xff]  }
  0x45   : > { %v2522_v18 = vld [vmem:[%s3056_s1 + $0x3b0] sm:$0xff]  }
  0x46   : > { %2277 = vmatpush3.bf16.msra.mxu0 %v2469_v19  ;;  %v2523_v19 = vld [vmem:[%s3056_s1 + $0x368] sm:$0xff]  }
  0x47   : > { %2299 = vmatpush3.bf16.msra.mxu1 %v2470_v20  ;;  %2278 = vmatprep.subr.bf16.mxu0 %v2471_v21  ;;  %v2524_v20 = vld [vmem:[%s3056_s1 + $0x3e8] sm:$0xff]  }
  0x48   : > { %2300 = vmatprep.subr.bf16.mxu1 %v2472_v22  ;;  %v2525_v21 = vld [vmem:[%s3056_s1 + $0x328] sm:$0xff]  }
  0x49   : > { %v2526_v22 = vld [vmem:[%s3056_s1 + $0x3a8] sm:$0xff]  }
  0x4a   : > { %2279 = vmatpush3.bf16.msra.mxu0 %v2473_v23  ;;  %v2527_v23 = vld [vmem:[%s3056_s1 + $0x360] sm:$0xff]  }
  0x4b   : > { %2301 = vmatpush3.bf16.msra.mxu1 %v2474_v24  ;;  %2308 = vmatprep.subr.bf16.mxu0 %v2479_v29  ;;  %v2528_v24 = vld [vmem:[%s3056_s1 + $0x3e0] sm:$0xff]   ;;  %v2533_v29 = vld [vmem:[%s3056_s1 + $0x318] sm:$0xff]  }
  0x4c   : > { %2330 = vmatprep.subr.bf16.mxu1 %v2480_v30  ;;  %v2534_v30 = vld [vmem:[%s3056_s1 + $0x398] sm:$0xff]  }
  0x4d   : > { %895 = vmatmul.mubr.bf16.vlgmr.msra.gmra.mxu0 %v1972_v31  ;;  %v2535_v31 = vld [vmem:[%s3056_s1 + $0x350] sm:$0xff]  }
  0x4e   : > { %936 = vmatmul.mubr.bf16.vlgmr.msra.gmra.mxu1 %v1974_v34  ;;  %2309 = vmatpush3.bf16.msra.mxu0 %v2481_v32  ;;  %v2536_v32 = vld [vmem:[%s3056_s1 + $0x3d0] sm:$0xff]  }
  0x4f   : > { %2331 = vmatpush3.bf16.msra.mxu1 %v2482_v36  ;;  %2310 = vmatprep.subr.bf16.mxu0 %v2483_v37  ;;  %v2537_v34 = vld [vmem:[%s3056_s1 + $0x310] sm:$0xff]   ;;  %v2539_v37 = vld [vmem:[%s3056_s1 + $0x348] sm:$0xff]  }
  0x50   : > { %2332 = vmatprep.subr.bf16.mxu1 %v2484_v33  ;;  %1261 = vmatprep.mubr.bf16.mxu0 %v1030_v9  ;;  %v2538_v36 = vld [vmem:[%s3056_s1 + $0x390] sm:$0xff]   ;;  %v2540_v33 = vld [vmem:[%s3056_s1 + $0x3c8] sm:$0xff]  }
  0x51   : > { %1302 = vmatprep.mubr.bf16.mxu1 %v1032_v13 }
  0x52   : > { %2311 = vmatpush3.bf16.msra.mxu0 %v2485_v35  ;;  %v2541_v35 = vld [vmem:[%s3056_s1 + $0x308] sm:$0xff]  }
  0x53   : > { %2333 = vmatpush3.bf16.msra.mxu1 %v2486_v38  ;;  %2312 = vmatprep.subr.bf16.mxu0 %v2487_v39  ;;  %v2542_v38 = vld [vmem:[%s3056_s1 + $0x388] sm:$0xff]   ;;  %v2543_v39 = vld [vmem:[%s3056_s1 + $0x340] sm:$0xff]  }
  0x54   : > { %2334 = vmatprep.subr.bf16.mxu1 %v2488_v40  ;;  %v2544_v40 = vld [vmem:[%s3056_s1 + $0x3c0] sm:$0xff]  }
  0x56   : > { %2313 = vmatpush3.bf16.msra.mxu0 %v2489_v41  ;;  %v2545_v41 = vld [vmem:[%s3056_s1 + $0x300] sm:$0xff]  }
  0x57   : > { %2335 = vmatpush3.bf16.msra.mxu1 %v2490_v42  ;;  %2314 = vmatprep.subr.bf16.mxu0 %v2491_v43  ;;  %v2546_v42 = vld [vmem:[%s3056_s1 + $0x380] sm:$0xff]  }
  0x58   : > { %2336 = vmatprep.subr.bf16.mxu1 %v2492_v44  ;;  %v1313_v43 = vld [vmem:[%s2699_s6] sm:$0xcc]  ;;  %v1317_v44 = vld [vmem:[%s2699_s6 + $0x20] sm:$0x11] }
  0x5a   : > { %2315 = vmatpush3.bf16.msra.mxu0 %v2493_v45  ;;  %v1314_v45 = vld [vmem:[%s2699_s6 + $0x8] sm:$0xcc] }
  0x5b   : > { %2337 = vmatpush3.bf16.msra.mxu1 %v2494_v46  ;;  %2316 = vmatprep.subr.bf16.mxu0 %v2495_v47  ;;  %v2173_v46 = vcombine.high %v1313_v43, %v2919_v0  ;;  %v2177_v47 = vcombine.high %v1317_v44, %v1317_v44 }
  0x5c   : > { %2338 = vmatprep.subr.bf16.mxu1 %v2496_v48  ;;  %v1318_v48 = vld [vmem:[%s2699_s6 + $0x28] sm:$0x11] }
  0x5e   : > { %2317 = vmatpush3.bf16.msra.mxu0 %v2497_v49  ;;  %v2175_v49 = vcombine.high %v1314_v45, %v2925_v4 }
  0x5f   : > { %2339 = vmatpush3.bf16.msra.mxu1 %v2498_v50  ;;  %2318 = vmatprep.subr.bf16.mxu0 %v2499_v51  ;;  %v2172_v50 = vcombine.low %v1313_v43, %v2919_v0  ;;  %v1753_v51 = vld [vmem:[%s3058_s3 + $0x8] sm:$0xf]  ;;  %v1752_v0 = vld [vmem:[%s3058_s3] sm:$0xff] }
  0x60   : > { %2340 = vmatprep.subr.bf16.mxu1 %v2500_v52  ;;  %v2179_v52 = vcombine.high %v1318_v48, %v1318_v48  ;;  %1761 = vperm.xlu0 %2406, %v1753_v51  }
  0x61   : > { %v1415_v63 = vshll.u32 %v2172_v50, 16 }
  0x62   : > { %2319 = vmatpush3.bf16.msra.mxu0 %v2501_v53  ;;  %v2176_v53 = vcombine.low %v1317_v44, %v1317_v44 }
  0x63   : > { %2341 = vmatpush3.bf16.msra.mxu1 %v2502_v54  ;;  %2320 = vmatprep.subr.bf16.mxu0 %v2503_v55  ;;  %v2174_v54 = vcombine.low %v1314_v45, %v2925_v4  ;;  %v2178_v55 = vcombine.low %v1318_v48, %v1318_v48 }
  0x64   : > { %2342 = vmatprep.subr.bf16.mxu1 %v2504_v56  ;;  %v1425_v56 = vshrl.u32 %v2173_v46, 16  ;;  %1756 = vperm.xlu0 %2406, %v1752_v0  }
  0x66   : > { %2321 = vmatpush3.bf16.msra.mxu0 %v2505_v57  ;;  %v1428_v57 = vshll.u32 %v2173_v46, 16  ;;  %v1427_v1 = vrot.slane %v1425_v56, 2 }
  0x67   : > { %2343 = vmatpush3.bf16.msra.mxu1 %v2506_v58  ;;  %2322 = vmatprep.subr.bf16.mxu0 %v2507_v59  ;;  %v1433_v58 = vshll.u32 %v2177_v47, 16  ;;  %v1451_v59 = vshrl.u32 %v2175_v49, 16 }
  0x68   : > { %2344 = vmatprep.subr.bf16.mxu1 %v2508_v60  ;;  %v1454_v60 = vshll.u32 %v2175_v49, 16  ;;  %v1430_v2 = vrot.slane %v1428_v57, 3 }
  0x69   : > { %v1435_v3 = vrot.slane %v1433_v58, 3  ;;  %v1453_v5 = vrot.slane %v1451_v59, 2 }
  0x6a   : > { %2323 = vmatpush3.bf16.msra.mxu0 %v2509_v61  ;;  %v1459_v61 = vshll.u32 %v2179_v52, 16  ;;  %v1456_v4 = vrot.slane %v1454_v60, 3  ;;  %v1431_v9 = vor.u32 %v1430_v2, %v1427_v1 }
  0x6b   : > { %2345 = vmatpush3.bf16.msra.mxu1 %v2510_v62  ;;  %2352 = vmatprep.subr.bf16.mxu0 %v2515_v7  ;;  %v1412_v62 = vshrl.u32 %v2172_v50, 16 }
  0x6c   : > { %2374 = vmatprep.subr.bf16.mxu1 %v2516_v10  ;;  %v1461_v6 = vrot.slane %v1459_v61, 3  ;;  %v1420_v10 = vshll.u32 %v2176_v53, 16  ;;  %v1457_v13 = vor.u32 %v1456_v4, %v1453_v5 }
  0x6d   : > { %1262 = vmatmul.mubr.bf16.vlgmr.msra.gmra.mxu0 %v1029_v8  ;;  %v1414_v7 = vrot.slane %v1412_v62, 2  ;;  %v1417_v8 = vrot.slane %v1415_v63, 3 }
  0x6e   : > { %1303 = vmatmul.mubr.bf16.vlgmr.msra.gmra.mxu1 %v1031_v12  ;;  %2353 = vmatpush3.bf16.msra.mxu0 %v2517_v11  ;;  %v1438_v11 = vshrl.u32 %v2174_v54, 16  ;;  %v1441_v12 = vshll.u32 %v2174_v54, 16 }
  0x6f   : > { %2375 = vmatpush3.bf16.msra.mxu1 %v2518_v14  ;;  %2354 = vmatprep.subr.bf16.mxu0 %v2519_v15  ;;  %v1418_v14 = vor.u32 %v1417_v8, %v1414_v7  ;;  %v1446_v15 = vshll.u32 %v2178_v55, 16 }
  0x70   : > { %2376 = vmatprep.subr.bf16.mxu1 %v2520_v16  ;;  %v1436_v16 = vsel %vm1410_vm0, %v1431_v9, %v1435_v3 }
  0x71   : > { %1691 = vmatprep.mubr.bf16.mxu0 %v1436_v16 }
  0x72   : > { %2355 = vmatpush3.bf16.msra.mxu0 %v2521_v17  ;;  %v1422_v17 = vrot.slane %v1420_v10, 3 }
  0x73   : > { %2377 = vmatpush3.bf16.msra.mxu1 %v2522_v18  ;;  %2356 = vmatprep.subr.bf16.mxu0 %v2523_v19  ;;  %v1440_v18 = vrot.slane %v1438_v11, 2  ;;  %v1443_v19 = vrot.slane %v1441_v12, 3 }
  0x74   : > { %2378 = vmatprep.subr.bf16.mxu1 %v2524_v20  ;;  %v1462_v20 = vsel %vm1410_vm0, %v1457_v13, %v1461_v6 }
  0x75   : > { %1732 = vmatprep.mubr.bf16.mxu1 %v1462_v20 }
  0x76   : > { %2357 = vmatpush3.bf16.msra.mxu0 %v2525_v21  ;;  %v1448_v21 = vrot.slane %v1446_v15, 3 }
  0x77   : > { %2379 = vmatpush3.bf16.msra.mxu1 %v2526_v22  ;;  %2358 = vmatprep.subr.bf16.mxu0 %v2527_v23  ;;  %v1423_v22 = vsel %vm1410_vm0, %v1418_v14, %v1422_v17  ;;  %v1444_v23 = vor.u32 %v1443_v19, %v1440_v18 }
  0x78   : > { %2380 = vmatprep.subr.bf16.mxu1 %v2528_v24 }
  0x79   : > { %v1449_v24 = vsel %vm1410_vm0, %v1444_v23, %v1448_v21  ;;  %v2212_v23 = vld [vmem:[%s3057_s2] ss:$0 sm:$0xff] }
  0x7a   : > { %2359 = vmatpush3.bf16.msra.mxu0 %v2529_v25 }
  0x7b   : > { %2381 = vmatpush3.bf16.msra.mxu1 %v2530_v26  ;;  %2360 = vmatprep.subr.bf16.mxu0 %v2531_v27 }
  0x7c   : > { %2382 = vmatprep.subr.bf16.mxu1 %v2532_v28 }
  0x7e   : > { %2361 = vmatpush3.bf16.msra.mxu0 %v2533_v29 }
  0x7f   : > { %2383 = vmatpush3.bf16.msra.mxu1 %v2534_v30  ;;  %2362 = vmatprep.subr.bf16.mxu0 %v2535_v31 }
  0x80   : > { %2384 = vmatprep.subr.bf16.mxu1 %v2536_v32 }
  0x82   : > { %2363 = vmatpush3.bf16.msra.mxu0 %v2537_v34 }
  0x83   : > { %2385 = vmatpush3.bf16.msra.mxu1 %v2538_v36  ;;  %2364 = vmatprep.subr.bf16.mxu0 %v2539_v37 }
  0x84   : > { %2386 = vmatprep.subr.bf16.mxu1 %v2540_v33 }
  0x86   : > { %2365 = vmatpush3.bf16.msra.mxu0 %v2541_v35 }
  0x87   : > { %2387 = vmatpush3.bf16.msra.mxu1 %v2542_v38  ;;  %2366 = vmatprep.subr.bf16.mxu0 %v2543_v39 }
  0x88   : > { %2388 = vmatprep.subr.bf16.mxu1 %v2544_v40 }
  0x8a   : > { %2367 = vmatpush3.bf16.msra.mxu0 %v2545_v41 }
  0x8b   : > { %2389 = vmatpush3.bf16.msra.mxu1 %v2546_v42 }
  0x8d   : > { %1692 = vmatmul.mubr.bf16.vlgmr.msra.gmra.mxu0 %v1423_v22 }
  0x8e   : > { %1733 = vmatmul.mubr.bf16.vlgmr.msra.gmra.mxu1 %v1449_v24 }
  0xdb   : > { %v1762_v18 = vpop.permute.xlu0 %1761 }
  0xed   : > { %v2236_v25 = vpop.f32.mrf.mxu0 }
  0xee   : > { %v2258_v26 = vpop.f32.mrf.mxu1 }
  0xef   : > { %v2237_v27 = vpop.f32.mrf.mxu0 }
  0xf0   : > { %v2259_v28 = vpop.f32.mrf.mxu1  ;;  %v2238_v46 = vadd.f32 %v2237_v27, %v2236_v25 }
  0xf1   : > { %v2239_v29 = vpop.f32.mrf.mxu0  ;;  %v2260_v47 = vadd.f32 %v2259_v28, %v2258_v26  ;;  %v1757_v26 = vpop.permute.xlu0 %1756 }
  0xf2   : > { %v2261_v30 = vpop.f32.mrf.mxu1 }
  0xf3   : > { %v2240_v31 = vpop.f32.mrf.mxu0  ;;  %v650_v53 = vadd.f32 %v2260_v47, %v2238_v46 }
  0xf4   : > { %v2262_v32 = vpop.f32.mrf.mxu1  ;;  %v2241_v51 = vadd.f32 %v2240_v31, %v2239_v29 }
  0xf5   : > { %v2263_v52 = vadd.f32 %v2262_v32, %v2261_v30 }
  0xf7   : > { %v653_v62 = vadd.f32 %v2263_v52, %v2241_v51 }
 0x10d   : > { %v2280_v34 = vpop.f32.mrf.mxu0 }
 0x10e   : > { %v2302_v36 = vpop.f32.mrf.mxu1 }
 0x10f   : > { %v2281_v37 = vpop.f32.mrf.mxu0 }
 0x110   : > { %v2303_v33 = vpop.f32.mrf.mxu1  ;;  %v2282_v49 = vadd.f32 %v2281_v37, %v2280_v34 }
 0x111   : > { %v2283_v35 = vpop.f32.mrf.mxu0  ;;  %v2304_v2 = vadd.f32 %v2303_v33, %v2302_v36 }
 0x112   : > { %v2305_v38 = vpop.f32.mrf.mxu1  ;;  %v897_v59 = vadd.f32 %v2282_v49, %v650_v53 }
 0x113   : > { %v2284_v39 = vpop.f32.mrf.mxu0 }
 0x114   : > { %v2306_v40 = vpop.f32.mrf.mxu1  ;;  %v2285_v58 = vadd.f32 %v2284_v39, %v2283_v35  ;;  %v938_v8 = vadd.f32 %v2304_v2, %v897_v59 }
 0x115   : > { %v2307_v11 = vadd.f32 %v2306_v40, %v2305_v38 }
 0x116   : > { %v900_v6 = vadd.f32 %v2285_v58, %v653_v62 }
 0x118   : > { %v941_v17 = vadd.f32 %v2307_v11, %v900_v6 }
 0x12d   : > { %v2324_v41 = vpop.f32.mrf.mxu0 }
 0x12e   : > { %v2346_v42 = vpop.f32.mrf.mxu1 }
 0x12f   : > { %v2325_v43 = vpop.f32.mrf.mxu0 }
 0x130   : > { %v2347_v44 = vpop.f32.mrf.mxu1  ;;  %v2326_v54 = vadd.f32 %v2325_v43, %v2324_v41 }
 0x131   : > { %v2327_v45 = vpop.f32.mrf.mxu0  ;;  %v2348_v55 = vadd.f32 %v2347_v44, %v2346_v42 }
 0x132   : > { %v2349_v48 = vpop.f32.mrf.mxu1 }
 0x133   : > { %v2328_v50 = vpop.f32.mrf.mxu0  ;;  %v1305_v3 = vadd.f32 %v2348_v55, %v2326_v54 }
 0x134   : > { %v2350_v56 = vpop.f32.mrf.mxu1  ;;  %v2329_v63 = vadd.f32 %v2328_v50, %v2327_v45 }
 0x135   : > { %v2351_v0 = vadd.f32 %v2350_v56, %v2349_v48  ;;  %v1311_v15 = vadd.f32 %v1305_v3, %v938_v8 }
 0x137   : > { %v1308_v12 = vadd.f32 %v2351_v0, %v2329_v63 }
 0x139   : > { %v1312_v21 = vadd.f32 %v1308_v12, %v941_v17 }
 0x14d   : > { %v2368_v57 = vpop.f32.mrf.mxu0 }
 0x14e   : > { %v2390_v60 = vpop.f32.mrf.mxu1 }
 0x14f   : > { %v2369_v61 = vpop.f32.mrf.mxu0 }
 0x150   : > { %v2370_v1 = vadd.f32 %v2369_v61, %v2368_v57  ;;  %v2391_v5 = vpop.f32.mrf.mxu1 }
 0x151   : > { %v2371_v4 = vpop.f32.mrf.mxu0  ;;  %v2392_v7 = vadd.f32 %v2391_v5, %v2390_v60 }
 0x152   : > { %v2393_v9 = vpop.f32.mrf.mxu1 }
 0x153   : > { %v2372_v10 = vpop.f32.mrf.mxu0  ;;  %v1735_v13 = vadd.f32 %v2392_v7, %v2370_v1 }
 0x154   : > { %v2373_v14 = vadd.f32 %v2372_v10, %v2371_v4  ;;  %v2394_v16 = vpop.f32.mrf.mxu1 }
 0x155   : > { %v2395_v19 = vadd.f32 %v2394_v16, %v2393_v9  ;;  %v1741_v20 = vadd.f32 %v1735_v13, %v1311_v15 }
 0x157   : > { %v1738_v22 = vadd.f32 %v2395_v19, %v2373_v14  ;;  %v1750_v25 = vadd.f32 %v2212_v23, %v1741_v20 }
 0x159   : > { %v1742_v24 = vadd.f32 %v1738_v22, %v1312_v21  ;;  %v1764_v29 = vmul.f32 %v1757_v26, %v1750_v25 }
 0x15b   : > { %v1751_v27 = vadd.f32 %v2212_v23, %v1742_v24 }
 0x15d   : > { %v1765_v28 = vmul.f32 %v1762_v18, %v1751_v27 }
 0x15f   : > { %v1767_v30 = vsel %vm1766_vm1, %v1765_v28, 0.0 }
 0x160   : > { %v1768_v31 = vadd.f32 %v1767_v30, %v1764_v29 }
 0x162   : > { %v1769_v32 = vrot.slane %v1768_v31, 4 }
 0x164   : > { %v1770_v34 = vadd.f32 %v1769_v32, %v1768_v31 }
 0x166   : > { %v1771_v36 = vrot.slane %v1770_v34, 2 }
 0x168   : > { %v1772_v37 = vadd.f32 %v1771_v36, %v1770_v34 }
 0x16a   : > { %v1773_v33 = vrot.slane %v1772_v37, 1 }
 0x16c   : > { %v1774_v35 = vadd.f32 %v1773_v33, %v1772_v37 }
 0x16e   : > { %v1775_v38 = vmul.f32 0.11111111, %v1774_v35 }
 0x170   : > { %v1776_v39 = vsub.f32 %v1750_v25, %v1775_v38  ;;  %v1777_v40 = vsub.f32 %v1751_v27, %v1775_v38 }
 0x172   : > { %v1778_v41 = vmul.f32 %v1776_v39, %v1776_v39  ;;  %v1779_v42 = vmul.f32 %v1777_v40, %v1777_v40 }
 0x174   : > { %v1780_v43 = vmul.f32 %v1778_v41, %v1757_v26  ;;  %v1781_v44 = vmul.f32 %v1779_v42, %v1762_v18 }
 0x176   : > { %v1782_v45 = vsel %vm1766_vm1, %v1781_v44, 0.0 }
 0x177   : > { %v1783_v46 = vadd.f32 %v1782_v45, %v1780_v43 }
 0x179   : > { %v1784_v47 = vrot.slane %v1783_v46, 4 }
 0x17b   : > { %v1785_v48 = vadd.f32 %v1784_v47, %v1783_v46 }
 0x17d   : > { %v1786_v49 = vrot.slane %v1785_v48, 2 }
 0x17f   : > { %v1787_v50 = vadd.f32 %v1786_v49, %v1785_v48 }
 0x181   : > { %v1788_v51 = vrot.slane %v1787_v50, 1 }
 0x183   : > { %v1789_v52 = vadd.f32 %v1788_v51, %v1787_v50 }
 0x185   : > { %v1790_v53 = vmul.f32 0.11111111, %v1789_v52 }
 0x187   : > { %v1791_v54 = vadd.f32 1e-05, %v1790_v53 }
 0x189   : > { %2555 = vrsqrt.f32 %v1791_v54 }
 0x196   : > { %v2556_v55 = vpop.eup %2555 }
 0x197   : > { %v1793_v56 = vmul.f32 %v2556_v55, %v1776_v39  ;;  %v1794_v57 = vmul.f32 %v2556_v55, %v1777_v40 }
 0x199   : > { %v1795_v58 = vmul.f32 0.2, %v1793_v56  ;;  %v1796_v59 = vmul.f32 0.2, %v1794_v57 }
 0x19b   : > { %v1797_v60 = vmax.f32 %v1793_v56, %v1795_v58  ;;  %v1798_v61 = vmax.f32 %v1794_v57, %v1796_v59 }
 0x19d   : > { %v2218_v62 = vpack.c.bf16 %v1797_v60, %v1797_v60  ;;  %v2219_v63 = vpack.c.bf16 %v1798_v61, %v1798_v61 }
 0x19f   : > { %1807 = vst [vmem:[%s197_s29] sm:$0xf] %v2218_v62  ;;  %1808 = vst [vmem:[%s197_s29 + $0x4] sm:$0x3] %v2219_v63 }
 0x1a0 PF: > { %s14_s15 = sadd.s32 1, %s2563_s15  }
 0x1a1   : > { %p11_p4 = scmp.ge.s32.totalorder %s14_s15, 4  }
 0x1a3   :  { %13 = sbr.rel (!%p11_p4) target bundleno = 1 (0x1), region = 69 }

</bundles_post_ra>
